<compile_context>
chip_gen: v7x
topology: tpu7x:2x2x1
jax: 0.10.0
libtpu: 0.0.40
codegen_flags: <defaults>
</compile_context>

<pallas_src>
import functools

import jax
import jax.numpy as jnp
from jax.experimental import pallas as pl
from jax.experimental.pallas import tpu as pltpu

HIDDEN = 768          # BERT hidden size
N_FEAT = 5            # extra hand-crafted features (768 + 5 into fc1)
FC1 = 256
FC2 = 2
FC2_PAD = 128         # lane-dense output width; real logits in [:, :FC2]
VOCAB = 1000          # small synthetic vocab for the embedding surrogate
VOCAB_PAD = 1024      # lane/matmul-friendly padded vocab


def _round_up(x, m):
    return (x + m - 1) // m * m


def _pq_kernel(counts_ref, table_ref, wp_ref, bp_ref, w1a_ref, fbias_ref,
               w2_ref, b2_ref, out_ref):
    """grid = (batch tiles,) parallel; all weights VMEM-resident (constant maps)."""
    # Masked-mean pooled embedding expressed as a histogram matmul:
    #   mean[b] = sum_s mask[b,s]/denom[b] * E[ids[b,s]]  ==  counts[b] @ E
    mean = jnp.dot(counts_ref[...].astype(jnp.bfloat16), table_ref[...],
                   preferred_element_type=jnp.float32)             # (tb, H) f32
    # BERT-style pooler: tanh(dense(mean)); bf16 operands -> bf16 MXU, f32 acc.
    pooled = jnp.tanh(
        jnp.dot(mean.astype(jnp.bfloat16), wp_ref[...],
                preferred_element_type=jnp.float32) + bp_ref[...])
    # fc1: pooled @ W1[:H]; the features part (feat @ W1[H:] + b1) is
    # pre-folded into fbias by the wrapper.  Dropout is eval-mode identity.
    h = (jnp.dot(pooled.astype(jnp.bfloat16), w1a_ref[...],
                 preferred_element_type=jnp.float32) + fbias_ref[...])
    h = jnp.maximum(h, 0.0)                                         # ReLU
    # fc2, zero-padded to 128 lanes for unmasked lane-dense stores.
    out_ref[...] = (jnp.dot(h.astype(jnp.bfloat16), w2_ref[...],
                            preferred_element_type=jnp.float32)
                    + b2_ref[...])


@functools.partial(jax.jit, static_argnames=("tb",))
def paragraph_quality_forward(input_ids, attention_mask, features, params,
                              tb=None):
    """input_ids: (B, S) int32; attention_mask: (B, S); features: (B, 5)."""
    B, S = input_ids.shape

    # ---- glue in plain JAX (tiny per-row prep; no (B,S,H) tensor exists) ----
    # TODO(synk): the (B,S)->(B,VOCAB) histogram uses an XLA scatter-add; if a
    # real (non-linear) encoder or a much larger vocab is needed, fall back to
    # streaming gathered embeddings / an in-kernel dynamic gather instead.
    mask_f = attention_mask.astype(jnp.float32)                  # (B, S)
    denom = jnp.maximum(jnp.sum(mask_f, axis=1, keepdims=True), 1.0)
    w = mask_f / denom                                           # (B, S)
    rows = jnp.arange(B, dtype=jnp.int32)[:, None]
    counts = jnp.zeros((B, VOCAB_PAD), jnp.float32).at[
        rows, input_ids].add(w)                                  # (B, Vp) f32
    # Fold the (B,5)@(5,256) features matmul and b1 into a per-row bias.
    fbias = (features.astype(jnp.float32) @ params["W1b"]
             + params["b1"])                                     # (B, 256) f32

    # ---- batch tiling: >=2 tiles when possible (v7x megacore), tb <= 128 ----
    B8 = _round_up(B, 8)
    if tb is None:
        if B8 < 16:
            tb = B8                                  # too small to split
        elif B8 <= 256:
            tb = _round_up((B8 + 1) // 2, 8)         # exactly 2 batch tiles
        else:
            tb = 128
    tb = max(8, min(_round_up(tb, 8), B8))
    B_pad = _round_up(B8, tb)

    if B_pad != B:   # tiny (B, Vp)/(B, 256) pads only; nothing S- or H-sized
        counts = jnp.pad(counts, ((0, B_pad - B), (0, 0)))
        fbias = jnp.pad(fbias, ((0, B_pad - B), (0, 0)))

    grid = (B_pad // tb,)

    flops = 2 * B_pad * (VOCAB_PAD * HIDDEN + HIDDEN * HIDDEN
                         + HIDDEN * FC1 + FC1 * FC2_PAD)
    bytes_accessed = (counts.size * 4 + fbias.size * 4 + B_pad * FC2_PAD * 4
                      + VOCAB_PAD * HIDDEN * 2 + HIDDEN * HIDDEN * 2
                      + HIDDEN * FC1 * 2 + FC1 * FC2_PAD * 2)

    out = pl.pallas_call(
        _pq_kernel,
        out_shape=jax.ShapeDtypeStruct((B_pad, FC2_PAD), jnp.float32),
        grid_spec=pltpu.PrefetchScalarGridSpec(
            num_scalar_prefetch=0,
            grid=grid,
            in_specs=[
                pl.BlockSpec((tb, VOCAB_PAD), lambda i: (i, 0)),      # counts
                pl.BlockSpec((VOCAB_PAD, HIDDEN), lambda i: (0, 0)),  # table
                pl.BlockSpec((HIDDEN, HIDDEN), lambda i: (0, 0)),     # Wp
                pl.BlockSpec((1, HIDDEN), lambda i: (0, 0)),          # bp
                pl.BlockSpec((HIDDEN, FC1), lambda i: (0, 0)),        # W1a
                pl.BlockSpec((tb, FC1), lambda i: (i, 0)),            # fbias
                pl.BlockSpec((FC1, FC2_PAD), lambda i: (0, 0)),       # W2 pad
                pl.BlockSpec((1, FC2_PAD), lambda i: (0, 0)),         # b2 pad
            ],
            out_specs=pl.BlockSpec((tb, FC2_PAD), lambda i: (i, 0)),
        ),
        compiler_params=pltpu.CompilerParams(
            dimension_semantics=("parallel",),
        ),
        cost_estimate=pl.CostEstimate(
            flops=flops,
            transcendentals=B_pad * HIDDEN,
            bytes_accessed=bytes_accessed),
    )(counts, params["table"], params["Wp"], params["bp"], params["W1a"],
      fbias, params["W2p"], params["b2p"])

    return out[:B, :FC2]


def init_params(key):
    ks = jax.random.split(key, 4)
    scale = 0.02
    emb = scale * jax.random.normal(ks[0], (VOCAB, HIDDEN), jnp.float32)
    table = jnp.zeros((VOCAB_PAD, HIDDEN), jnp.float32).at[:VOCAB].set(emb)
    Wp = scale * jax.random.normal(ks[1], (HIDDEN, HIDDEN), jnp.float32)
    bp = jnp.zeros((1, HIDDEN), jnp.float32)
    W1 = scale * jax.random.normal(ks[2], (HIDDEN + N_FEAT, FC1), jnp.float32)
    b1 = jnp.zeros((1, FC1), jnp.float32)
    W2 = scale * jax.random.normal(ks[3], (FC1, FC2), jnp.float32)
    b2 = jnp.zeros((FC2,), jnp.float32)
    # lane-dense padded fc2 (real logits live in the first FC2 columns)
    W2p = jnp.zeros((FC1, FC2_PAD), jnp.float32).at[:, :FC2].set(W2)
    b2p = jnp.zeros((1, FC2_PAD), jnp.float32).at[0, :FC2].set(b2)
    return {
        "table": table.astype(jnp.bfloat16),          # (VOCAB_PAD, H) bf16
        "Wp": Wp.astype(jnp.bfloat16), "bp": bp,
        "W1a": W1[:HIDDEN, :].astype(jnp.bfloat16),   # pooled part of fc1
        "W1b": W1[HIDDEN:, :],                        # features part (wrapper)
        "b1": b1,
        "W2p": W2p.astype(jnp.bfloat16),              # bf16 MXU path for fc2
        "b2p": b2p,
    }


if __name__ == "__main__":
    key = jax.random.PRNGKey(0)
    k_in, k_mask, k_feat, k_param = jax.random.split(key, 4)

    # Small shapes; tb auto-derives to 8 -> 2 batch tiles, exercising the grid.
    B, S = 16, 32
    input_ids = jax.random.randint(k_in, (B, S), 0, VOCAB, dtype=jnp.int32)
    attention_mask = (jax.random.uniform(k_mask, (B, S)) > 0.2).astype(jnp.int32)
    features = jax.random.normal(k_feat, (B, N_FEAT), jnp.float32)

    params = init_params(k_param)

    logits = paragraph_quality_forward(input_ids, attention_mask, features,
                                       params)
    jax.block_until_ready(logits)
    assert logits.shape == (B, FC2) and logits.dtype == jnp.float32
    print("KERNEL_OK")
</pallas_src>

<mosaic_0001>
module attributes {stable_mosaic.version = 11 : i64} {
  func.func private @main(%arg0: i32) attributes {dimension_semantics = [#tpu.dimension_semantics<core_parallel>], iteration_bounds = array<i64: 2>, tpu.core_type = #tpu.core_type<sc_scalar_subcore>, window_params = []} {
    return
  }
}

module attributes {stable_mosaic.version = 11 : i64} {
  func.func private @main(%arg0: i32) attributes {dimension_semantics = [#tpu.dimension_semantics<core_parallel>], iteration_bounds = array<i64: 2>, tpu.core_type = #tpu.core_type<sc_scalar_subcore>, window_params = []} {
    return
  }
}

module attributes {stable_mosaic.version = 11 : i64} {
  func.func @_pq_kernel(%arg0: i32, %arg1: memref<8x1024xf32, #tpu.memory_space<vmem>>, %arg2: memref<1024x768xbf16, #tpu.memory_space<vmem>>, %arg3: memref<768x768xbf16, #tpu.memory_space<vmem>>, %arg4: memref<1x768xf32, #tpu.memory_space<vmem>>, %arg5: memref<768x256xbf16, #tpu.memory_space<vmem>>, %arg6: memref<8x256xf32, #tpu.memory_space<vmem>>, %arg7: memref<256x128xbf16, #tpu.memory_space<vmem>>, %arg8: memref<1x128xf32, #tpu.memory_space<vmem>>, %arg9: memref<8x128xf32, #tpu.memory_space<vmem>>) attributes {dimension_semantics = [#tpu.dimension_semantics<parallel>], iteration_bounds = array<i64: 2>, scalar_prefetch = 0 : i64, scratch_operands = 0 : i64, tpu.core_type = #tpu.core_type<tc>, window_params = [{transform_indices = @transform_0, window_bounds = array<i64: 8, 1024>}, {pipeline_mode = #tpu.pipeline_mode<synchronous>, transform_indices = @transform_1, window_bounds = array<i64: 1024, 768>}, {pipeline_mode = #tpu.pipeline_mode<synchronous>, transform_indices = @transform_2, window_bounds = array<i64: 768, 768>}, {pipeline_mode = #tpu.pipeline_mode<synchronous>, transform_indices = @transform_3, window_bounds = array<i64: 1, 768>}, {pipeline_mode = #tpu.pipeline_mode<synchronous>, transform_indices = @transform_4, window_bounds = array<i64: 768, 256>}, {transform_indices = @transform_5, window_bounds = array<i64: 8, 256>}, {pipeline_mode = #tpu.pipeline_mode<synchronous>, transform_indices = @transform_6, window_bounds = array<i64: 256, 128>}, {pipeline_mode = #tpu.pipeline_mode<synchronous>, transform_indices = @transform_7, window_bounds = array<i64: 1, 128>}, {transform_indices = @transform_8, window_bounds = array<i64: 8, 128>}]} {
    %c0 = arith.constant 0 : index
    %c0_0 = arith.constant 0 : index
    %0 = vector.load %arg1[%c0, %c0_0] : memref<8x1024xf32, #tpu.memory_space<vmem>>, vector<8x1024xf32>
    %1 = arith.truncf %0 : vector<8x1024xf32> to vector<8x1024xbf16>
    %c0_1 = arith.constant 0 : index
    %c0_2 = arith.constant 0 : index
    %2 = vector.load %arg2[%c0_1, %c0_2] : memref<1024x768xbf16, #tpu.memory_space<vmem>>, vector<1024x768xbf16>
    %cst = arith.constant dense<0.000000e+00> : vector<8x768xf32>
    %3 = tpu.matmul %1, %2, %cst {dimension_numbers = #tpu.dot_dimension_numbers<[1], [0], [0], [1], [0, 0, 1, 1], [], []>} : vector<8x1024xbf16>, vector<1024x768xbf16>, vector<8x768xf32> -> vector<8x768xf32>
    %4 = arith.truncf %3 : vector<8x768xf32> to vector<8x768xbf16>
    %c0_3 = arith.constant 0 : index
    %c0_4 = arith.constant 0 : index
    %5 = vector.load %arg3[%c0_3, %c0_4] : memref<768x768xbf16, #tpu.memory_space<vmem>>, vector<768x768xbf16>
    %cst_5 = arith.constant dense<0.000000e+00> : vector<8x768xf32>
    %6 = tpu.matmul %4, %5, %cst_5 {dimension_numbers = #tpu.dot_dimension_numbers<[1], [0], [0], [1], [0, 0, 1, 1], [], []>} : vector<8x768xbf16>, vector<768x768xbf16>, vector<8x768xf32> -> vector<8x768xf32>
    %c0_6 = arith.constant 0 : index
    %c0_7 = arith.constant 0 : index
    %7 = vector.load %arg4[%c0_6, %c0_7] : memref<1x768xf32, #tpu.memory_space<vmem>>, vector<1x768xf32>
    %8 = vector.broadcast %7 : vector<1x768xf32> to vector<8x768xf32>
    %9 = arith.addf %6, %8 : vector<8x768xf32>
    %10 = math.tanh %9 : vector<8x768xf32>
    %11 = arith.truncf %10 : vector<8x768xf32> to vector<8x768xbf16>
    %c0_8 = arith.constant 0 : index
    %c0_9 = arith.constant 0 : index
    %12 = vector.load %arg5[%c0_8, %c0_9] : memref<768x256xbf16, #tpu.memory_space<vmem>>, vector<768x256xbf16>
    %cst_10 = arith.constant dense<0.000000e+00> : vector<8x256xf32>
    %13 = tpu.matmul %11, %12, %cst_10 {dimension_numbers = #tpu.dot_dimension_numbers<[1], [0], [0], [1], [0, 0, 1, 1], [], []>} : vector<8x768xbf16>, vector<768x256xbf16>, vector<8x256xf32> -> vector<8x256xf32>
    %c0_11 = arith.constant 0 : index
    %c0_12 = arith.constant 0 : index
    %14 = vector.load %arg6[%c0_11, %c0_12] : memref<8x256xf32, #tpu.memory_space<vmem>>, vector<8x256xf32>
    %15 = arith.addf %13, %14 : vector<8x256xf32>
    %cst_13 = arith.constant 0.000000e+00 : f32
    %16 = vector.broadcast %cst_13 : f32 to vector<8x256xf32>
    %17 = arith.maximumf %15, %16 : vector<8x256xf32>
    %18 = arith.truncf %17 : vector<8x256xf32> to vector<8x256xbf16>
    %c0_14 = arith.constant 0 : index
    %c0_15 = arith.constant 0 : index
    %19 = vector.load %arg7[%c0_14, %c0_15] : memref<256x128xbf16, #tpu.memory_space<vmem>>, vector<256x128xbf16>
    %cst_16 = arith.constant dense<0.000000e+00> : vector<8x128xf32>
    %20 = tpu.matmul %18, %19, %cst_16 {dimension_numbers = #tpu.dot_dimension_numbers<[1], [0], [0], [1], [0, 0, 1, 1], [], []>} : vector<8x256xbf16>, vector<256x128xbf16>, vector<8x128xf32> -> vector<8x128xf32>
    %c0_17 = arith.constant 0 : index
    %c0_18 = arith.constant 0 : index
    %21 = vector.load %arg8[%c0_17, %c0_18] : memref<1x128xf32, #tpu.memory_space<vmem>>, vector<1x128xf32>
    %22 = vector.broadcast %21 : vector<1x128xf32> to vector<8x128xf32>
    %23 = arith.addf %20, %22 : vector<8x128xf32>
    %c0_19 = arith.constant 0 : index
    %c0_20 = arith.constant 0 : index
    %24 = vector.load %arg9[%c0_19, %c0_20] : memref<8x128xf32, #tpu.memory_space<vmem>>, vector<8x128xf32>
    tpu.vector_store %arg9[%c0_19, %c0_20], %23 {strides = array<i32>} : memref<8x128xf32, #tpu.memory_space<vmem>>, vector<8x128xf32>,
    return
  }
  func.func @transform_0(%arg0: i32) -> (i32, i32) {
    %c0_i32 = arith.constant 0 : i32
    %c0_i32_0 = arith.constant 0 : i32
    return %arg0, %c0_i32 : i32, i32
  }
  func.func @transform_1(%arg0: i32) -> (i32, i32) {
    %c0_i32 = arith.constant 0 : i32
    %c0_i32_0 = arith.constant 0 : i32
    %c0_i32_1 = arith.constant 0 : i32
    return %c0_i32, %c0_i32_0 : i32, i32
  }
  func.func @transform_2(%arg0: i32) -> (i32, i32) {
    %c0_i32 = arith.constant 0 : i32
    %c0_i32_0 = arith.constant 0 : i32
    %c0_i32_1 = arith.constant 0 : i32
    return %c0_i32, %c0_i32_0 : i32, i32
  }
  func.func @transform_3(%arg0: i32) -> (i32, i32) {
    %c0_i32 = arith.constant 0 : i32
    %c0_i32_0 = arith.constant 0 : i32
    %c0_i32_1 = arith.constant 0 : i32
    return %c0_i32, %c0_i32_0 : i32, i32
  }
  func.func @transform_4(%arg0: i32) -> (i32, i32) {
    %c0_i32 = arith.constant 0 : i32
    %c0_i32_0 = arith.constant 0 : i32
    %c0_i32_1 = arith.constant 0 : i32
    return %c0_i32, %c0_i32_0 : i32, i32
  }
  func.func @transform_5(%arg0: i32) -> (i32, i32) {
    %c0_i32 = arith.constant 0 : i32
    %c0_i32_0 = arith.constant 0 : i32
    return %arg0, %c0_i32 : i32, i32
  }
  func.func @transform_6(%arg0: i32) -> (i32, i32) {
    %c0_i32 = arith.constant 0 : i32
    %c0_i32_0 = arith.constant 0 : i32
    %c0_i32_1 = arith.constant 0 : i32
    return %c0_i32, %c0_i32_0 : i32, i32
  }
  func.func @transform_7(%arg0: i32) -> (i32, i32) {
    %c0_i32 = arith.constant 0 : i32
    %c0_i32_0 = arith.constant 0 : i32
    %c0_i32_1 = arith.constant 0 : i32
    return %c0_i32, %c0_i32_0 : i32, i32
  }
  func.func @transform_8(%arg0: i32) -> (i32, i32) {
    %c0_i32 = arith.constant 0 : i32
    %c0_i32_0 = arith.constant 0 : i32
    return %arg0, %c0_i32 : i32, i32
  }
}

</mosaic_0001>

<bundles_post_ra>
// kernel: paragraph_quality_forward.1
= control target key start
LH: loop header
LB: loop body
LE: loop exit
PB: predicated region body
PF: predicated region fallthrough
CT: control target
= control target key end

     0   :  { %13 = vsyncpa [#allocation3], 0  ;;  %s11063_s0 = inlined_call_operand.hbm [shape: f32[16,1024], index: 0, kind: input, shape index: {}]   ;;  %s11064_s1 = inlined_call_operand.vmem [shape: bf16[1024,768], index: 1, kind: input, shape index: {}]   ;;  %s11065_s2 = inlined_call_operand.vmem [shape: bf16[768,768], index: 2, kind: input, shape index: {}]   ;;  %s11066_s3 = inlined_call_operand.vmem [shape: f32[1,768], index: 3, kind: input, shape index: {}]   ;;  %s11067_s4 = inlined_call_operand.vmem [shape: bf16[768,256], index: 4, kind: input, shape index: {}]   ;;  %s11068_s5 = inlined_call_operand.vmem [shape: f32[16,256], index: 5, kind: input, shape index: {}]   ;;  %s11069_s6 = inlined_call_operand.vmem [shape: bf16[256,128], index: 6, kind: input, shape index: {}]   ;;  %s11070_s7 = inlined_call_operand.vmem [shape: f32[1,128], index: 7, kind: input, shape index: {}]   ;;  %s11071_s8 = inlined_call_operand.vmem [shape: f32[16,128], index: 8, kind: output, shape index: {}]  }
   0x1   :  { %15 = vsyncpa [#allocation3 + $0x1], 0  ;;  %s8487_s27 = smov 0   ;;  %s8489_s28 = smov 0  }
   0x2   :  { %s8491_s29 = smov 0   ;;  %s8493_s30 = smov 0  }
   0x3 LB: > { %s8506_s9 = sadd.s32 4294967295, %s8439_s30   ;;  %s8509_s10 = sadd.s32 1, %s8439_s30   ;;  %s8439_s30 = sphi %s8493_s30, %s11079_s30   ;;  %s8435_s29 = sphi %s8491_s29, %s11078_s29   ;;  %s8431_s28 = sphi %s8489_s28, %s11077_s28   ;;  %s8427_s27 = sphi %s8487_s27, %s11076_s27  }
   0x4   : > { %s25_s11 = ssub.s32 %s8439_s30, %s8509_s10  ;;  %s28_s12 = sadd.s32 1, %s8435_s29 }
   0x5   : > { %p26_p0 = scmp.eq.s32.totalorder %s25_s11, 0  ;;  %p35_p1 = scmp.ne.s32.totalorder %s8435_s29, %s8431_s28 }
   0x6   : > { %p36_p2 = scmp.eq.s32.totalorder %s8439_s30, 0  ;;  %p41_p3 = scmp.ne.s32.totalorder %s8431_s28, %s8427_s27 }
   0x7   : > { %s8519_s13 = scalar_select %p26_p0, %s8435_s29, %s28_s12  }
   0x8   : > { %p37_p4 = por %p36_p2, %p35_p1  ;;  %p42_p5 = scmp.eq.s32.totalorder %s8506_s9, 0 }
   0x9   : > { %p7162_p6 = scmp.lt.s32.totalorder %s8439_s30, 2  ;;  %s261_s15 = sand.u32 1, %s8435_s29  }
   0xa   : > { %p8523_p7 = por %p42_p5, %p41_p3  ;;  %s6263_s16 = sshll.u32 %s261_s15, 6 }
   0xb   : > { %s7058_s17 = sshll.u32 %s8439_s30, 10  ;;  %s265_s21 = scalar_lea.vmem [#allocation2], %s6263_s16 }
   0xc   : > { %s8532_s20 = scalar_lea.hbm %s11063_s0, %s7058_s17  ;;  %s273_s22 = sshll.u32 %s265_s21, 4  ;;  %s8534_s22 = int_to_ptr.vmem [resolvable:$true] %s273_s22 }
   0xd   : > { %p8536_p8 = pnand %p7162_p6, %p37_p4  ;;  %s262_s24 = scalar_lea.sflag [#allocation3], %s261_s15 }
   0xe   : > { %s8375_s25 = scalar_lea.hbm %s8532_s20, 1024  ;;  %s8380_s11 = scalar_lea.hbm %s11063_s0, 2048 }
   0xf   : > { %p8376_p11 = scmp.ne.s32.totalorder %s8532_s20, %s8375_s25  ;;  %p8377_p12 = pneg %p8536_p8 }
  0x10   : > { %p8381_p1 = scmp.lt.u32.totalorder %s8532_s20, %s11063_s0  ;;  %p8382_p2 = scmp.lt.u32.totalorder %s8380_s11, %s8375_s25 }
  0x11   : > { %p8378_p13 = pnand %p8377_p12, %p8376_p11  ;;  %p8384_p4 = scmp.lt.u32.totalorder %s8375_s25, %s8532_s20 }
  0x12   : > { %p8383_p3 = por %p8382_p2, %p8381_p1 }
  0x13   : > { %p8379_p0 = pneg %p8378_p13 }
  0x14   : > { %p8385_p5 = por %p8384_p4, %p8383_p3 }
  0x16   : > { %p8386_p6 = pnand %p8385_p5, %p8379_p0 }
  0x18   : > { %8389 = shalt.err (!%p8386_p6)
}
  0x19   : > { %s8390_s15 = scalar_lea.vmem %s8534_s22, 1024  ;;  %s8441_s17 = smov [#allocation2]  }
  0x1a   : > { %p8391_p11 = scmp.ne.s32.totalorder %s8534_s22, %s8390_s15  ;;  %s8395_s18 = sshll.u32 %s8441_s17, 4  ;;  %s8396_s18 = int_to_ptr.vmem [resolvable:$false] %s8395_s18 }
  0x1b   : > { %s8397_s19 = scalar_lea.vmem %s8396_s18, 2048  ;;  %p8398_p10 = scmp.lt.s32.totalorder %s8534_s22, %s8396_s18 }
  0x1c   : > { %p8393_p13 = pnand %p8391_p11, %p8377_p12  ;;  %p8399_p1 = scmp.lt.s32.totalorder %s8397_s19, %s8390_s15 }
  0x1e   : > { %p8394_p9 = pneg %p8393_p13  ;;  %p8400_p2 = por %p8399_p1, %p8398_p10 }
  0x20   : > { %p8401_p3 = pnand %p8400_p2, %p8394_p9 }
  0x22   : > { %8404 = shalt.err (!%p8401_p3)
}
  0x23   : > { %7161 = dma.hbm_to_vmem [thread:$0]  (!%p8536_p8), %s8532_s20, 1024, %s8534_s22, %s262_s24  }
  0x24   : > { %p11074_p0 = scmp.lt.s32.totalorder %s8439_s30, 3  ;;  %p11075_p4 = scmp.ge.s32.totalorder %s8439_s30, 1 }
  0x26   : > { %p287_p12 = pnand %p11075_p4, %p11074_p0 }
  0x27   : > { %s292_s21 = sand.u32 (!%p287_p12), 1, %s8431_s28  }
  0x28   : > { %290 = sbr.rel (%p287_p12) target bundleno = 1764 (0x6e4), region = 52  ;;  %s6267_s25 = sshll.u32 (!%p287_p12), %s292_s21, 6 }
  0x29   : > { %s293_s26 = scalar_lea.sflag (!%p287_p12), [#allocation3], %s292_s21  ;;  %s8572_s27 = scalar_lea.vmem (!%p287_p12), [#allocation2], %s6267_s25 }
  0x2f   : > { %8422 = dma.done.wait (%p8523_p7), %s293_s26, 1024  }
  0x30   : > { %8424 = vsyncadd (%p8523_p7), %s293_s26, 4294966272  ;;  %v7195_v0 = vld [vmem:[%s11064_s1 + $0x4] ss:$24 sps:$4 sm:$0xff]   ;;  %v7197_v1 = vld [vmem:[%s11064_s1] ss:$24 sps:$4 sm:$0xff]   ;;  %p333_p7 = scmp.lt.s32.totalorder %s8506_s9, 1 }
  0x31   : > { %2663 = vmatprep.subr.bf16.mxu0 %v7195_v0  ;;  %v7198_v2 = vld [vmem:[%s11064_s1 + $0x34] ss:$24 sps:$4 sm:$0xff]   ;;  %v7200_v3 = vld [vmem:[%s11064_s1 + $0x30] ss:$24 sps:$4 sm:$0xff]   ;;  %v7201_v4 = vld [vmem:[%s11064_s1 + $0x64] ss:$24 sps:$4 sm:$0xff]  }
  0x32   : > { %2664 = vmatpush1.bf16.msra.mxu0 %v7197_v1  ;;  %v7203_v5 = vld [vmem:[%s11064_s1 + $0x60] ss:$24 sps:$4 sm:$0xff]   ;;  %v7204_v6 = vld [vmem:[%s11064_s1 + $0x94] ss:$24 sps:$4 sm:$0xff]   ;;  %v7206_v7 = vld [vmem:[%s11064_s1 + $0x90] ss:$24 sps:$4 sm:$0xff]  }
  0x33   : > { %2665 = vmatprep.subr.bf16.mxu0 %v7198_v2  ;;  %v7207_v8 = vld [vmem:[%s11064_s1 + $0xc4] ss:$24 sps:$4 sm:$0xff]   ;;  %v7209_v9 = vld [vmem:[%s11064_s1 + $0xc0] ss:$24 sps:$4 sm:$0xff]   ;;  %v7210_v10 = vld [vmem:[%s11064_s1 + $0xf4] ss:$24 sps:$4 sm:$0xff]  }
  0x34   : > { %v7212_v11 = vld [vmem:[%s11064_s1 + $0xf0] ss:$24 sps:$4 sm:$0xff]   ;;  %v7213_v12 = vld [vmem:[%s11064_s1 + $0x124] ss:$24 sps:$4 sm:$0xff]   ;;  %v7215_v15 = vld [vmem:[%s11064_s1 + $0x120] ss:$24 sps:$4 sm:$0xff]  }
  0x35   : > { %v344_v13 = vld [vmem:[%s8572_s27 + $0x8] sm:$0xff]  ;;  %v7216_v16 = vld [vmem:[%s11064_s1 + $0x154] ss:$24 sps:$4 sm:$0xff]   ;;  %v7218_v17 = vld [vmem:[%s11064_s1 + $0x150] ss:$24 sps:$4 sm:$0xff]   ;;  %s11081_s9 = smov (!%p333_p7, %s8506_s9), 1 }
  0x36   : > { %2666 = vmatpush1.bf16.msra.mxu0 %v7200_v3  ;;  %v8618_v14 = vpack.c.bf16 %v344_v13, %v344_v13  ;;  %v7219_v18 = vld [vmem:[%s11064_s1 + $0x184] ss:$24 sps:$4 sm:$0xff]   ;;  %v7221_v19 = vld [vmem:[%s11064_s1 + $0x180] ss:$24 sps:$4 sm:$0xff]   ;;  %v7222_v20 = vld [vmem:[%s11064_s1 + $0x1b4] ss:$24 sps:$4 sm:$0xff]  }
  0x37   : > { %2667 = vmatprep.subr.bf16.mxu0 %v7201_v4  ;;  %v7224_v21 = vld [vmem:[%s11064_s1 + $0x1b0] ss:$24 sps:$4 sm:$0xff]   ;;  %v7225_v22 = vld [vmem:[%s11064_s1 + $0x1e4] ss:$24 sps:$4 sm:$0xff]   ;;  %v7227_v23 = vld [vmem:[%s11064_s1 + $0x1e0] ss:$24 sps:$4 sm:$0xff]  }
  0x38   : > { %2695 = vmatprep.mubr.bf16.mxu0 %v8618_v14  ;;  %v7228_v24 = vld [vmem:[%s11064_s1 + $0x214] ss:$24 sps:$4 sm:$0xff]   ;;  %v7230_v25 = vld [vmem:[%s11064_s1 + $0x210] ss:$24 sps:$4 sm:$0xff]   ;;  %v7231_v27 = vld [vmem:[%s11064_s1 + $0x244] ss:$24 sps:$4 sm:$0xff]  }
  0x39   : > { %v346_v26 = vld [vmem:[%s8572_s27 + $0x18] sm:$0xff]  ;;  %v7233_v31 = vld [vmem:[%s11064_s1 + $0x240] ss:$24 sps:$4 sm:$0xff]   ;;  %v7300_v33 = vld [vmem:[%s11064_s1 + $0x33c] ss:$24 sps:$4 sm:$0xff]   ;;  %s7059_s26 = sshll.u32 %s11081_s9, 4 }
  0x3a   : > { %2668 = vmatpush1.bf16.msra.mxu0 %v7203_v5  ;;  %v8658_v28 = vpack.c.bf16 %v346_v26, %v346_v26  ;;  %v7294_v29 = vld [vmem:[%s11064_s1 + $0x30c] ss:$24 sps:$4 sm:$0xff]   ;;  %v7296_v30 = vld [vmem:[%s11064_s1 + $0x308] ss:$24 sps:$4 sm:$0xff]   ;;  %v7302_v34 = vld [vmem:[%s11064_s1 + $0x338] ss:$24 sps:$4 sm:$0xff]   ;;  %s337_s20 = scalar_lea.vmem %s11068_s5, %s7059_s26 }
  0x3b   : > { %2669 = vmatprep.subr.bf16.mxu0 %v7204_v6  ;;  %v7234_v32 = vld [vmem:[%s11064_s1 + $0x274] ss:$24 sps:$4 sm:$0xff]   ;;  %2868 = vmatprep.subr.bf16.mxu1 %v7294_v29  ;;  %v7236_v35 = vld [vmem:[%s11064_s1 + $0x270] ss:$24 sps:$4 sm:$0xff]   ;;  %v7237_v36 = vld [vmem:[%s11064_s1 + $0x2a4] ss:$24 sps:$4 sm:$0xff]  }
  0x3c   : > { %2900 = vmatprep.mubr.bf16.mxu1 %v8658_v28  ;;  %2869 = vmatpush1.bf16.msra.mxu1 %v7296_v30  ;;  %v7306_v37 = vld [vmem:[%s11064_s1 + $0x36c] ss:$24 sps:$4 sm:$0xff]   ;;  %v7308_v38 = vld [vmem:[%s11064_s1 + $0x368] ss:$24 sps:$4 sm:$0xff]   ;;  %v7312_v39 = vld [vmem:[%s11064_s1 + $0x39c] ss:$24 sps:$4 sm:$0xff]  }
  0x3d   : > { %2870 = vmatprep.subr.bf16.mxu1 %v7300_v33  ;;  %v7239_v40 = vld [vmem:[%s11064_s1 + $0x2a0] ss:$24 sps:$4 sm:$0xff]   ;;  %v7240_v41 = vld [vmem:[%s11064_s1 + $0x2d4] ss:$24 sps:$4 sm:$0xff]   ;;  %v7242_v44 = vld [vmem:[%s11064_s1 + $0x2d0] ss:$24 sps:$4 sm:$0xff]  }
  0x3e   : > { %2670 = vmatpush1.bf16.msra.mxu0 %v7206_v7  ;;  %v7314_v42 = vld [vmem:[%s11064_s1 + $0x398] ss:$24 sps:$4 sm:$0xff]   ;;  %v7318_v43 = vld [vmem:[%s11064_s1 + $0x3cc] ss:$24 sps:$4 sm:$0xff]   ;;  %v7320_v47 = vld [vmem:[%s11064_s1 + $0x3c8] ss:$24 sps:$4 sm:$0xff]  }
  0x3f   : > { %2671 = vmatprep.subr.bf16.mxu0 %v7207_v8  ;;  %v7245_v45 = vld [vmem:[%s11064_s1 + $0x304] ss:$24 sps:$4 sm:$0xff]   ;;  %v343_v46 = vld [vmem:[%s8572_s27] sm:$0xff]  ;;  %v7243_v50 = vld [vmem:[%s11064_s1 + $0x300] ss:$24 sps:$4 sm:$0xff]   ;;  %s6270_s30 = sshll.u32 %s11081_s9, 3 }
  0x40   : > { %2871 = vmatpush1.bf16.msra.mxu1 %v7302_v34  ;;  %v7324_v48 = vld [vmem:[%s11064_s1 + $0x3fc] ss:$24 sps:$4 sm:$0xff]   ;;  %v8719_v49 = vpack.c.bf16 %v343_v46, %v343_v46  ;;  %v7326_v52 = vld [vmem:[%s11064_s1 + $0x3f8] ss:$24 sps:$4 sm:$0xff]   ;;  %v7330_v53 = vld [vmem:[%s11064_s1 + $0x42c] ss:$24 sps:$4 sm:$0xff]   ;;  %s341_s16 = scalar_lea.vmem %s11071_s8, %s6270_s30 }
  0x41   : > { %2872 = vmatprep.subr.bf16.mxu1 %v7306_v37  ;;  %v7248_v51 = vld [vmem:[%s11064_s1 + $0x334] ss:$24 sps:$4 sm:$0xff]   ;;  %v7246_v54 = vld [vmem:[%s11064_s1 + $0x330] ss:$24 sps:$4 sm:$0xff]   ;;  %v7251_v55 = vld [vmem:[%s11064_s1 + $0x364] ss:$24 sps:$4 sm:$0xff]  }
  0x42   : > { %2672 = vmatpush1.bf16.msra.mxu0 %v7209_v9  ;;  %v7332_v56 = vld [vmem:[%s11064_s1 + $0x428] ss:$24 sps:$4 sm:$0xff]   ;;  %v7336_v57 = vld [vmem:[%s11064_s1 + $0x45c] ss:$24 sps:$4 sm:$0xff]   ;;  %v7338_v60 = vld [vmem:[%s11064_s1 + $0x458] ss:$24 sps:$4 sm:$0xff]  }
  0x43   : > { %2673 = vmatprep.subr.bf16.mxu0 %v7210_v10  ;;  %v7249_v58 = vld [vmem:[%s11064_s1 + $0x360] ss:$24 sps:$4 sm:$0xff]   ;;  %v7254_v59 = vld [vmem:[%s11064_s1 + $0x394] ss:$24 sps:$4 sm:$0xff]   ;;  %v7252_v62 = vld [vmem:[%s11064_s1 + $0x390] ss:$24 sps:$4 sm:$0xff]  }
  0x44   : > { %2873 = vmatpush1.bf16.msra.mxu1 %v7308_v38  ;;  %v7342_v61 = vld [vmem:[%s11064_s1 + $0x48c] ss:$24 sps:$4 sm:$0xff]   ;;  %v7344_v0 = vld [vmem:[%s11064_s1 + $0x488] ss:$24 sps:$4 sm:$0xff]   ;;  %v7348_v1 = vld [vmem:[%s11064_s1 + $0x4bc] ss:$24 sps:$4 sm:$0xff]  }
  0x45   : > { %2874 = vmatprep.subr.bf16.mxu1 %v7312_v39  ;;  %v7257_v63 = vld [vmem:[%s11064_s1 + $0x3c4] ss:$24 sps:$4 sm:$0xff]   ;;  %v7255_v2 = vld [vmem:[%s11064_s1 + $0x3c0] ss:$24 sps:$4 sm:$0xff]   ;;  %v7260_v3 = vld [vmem:[%s11064_s1 + $0x3f4] ss:$24 sps:$4 sm:$0xff]  }
  0x46   : > { %2674 = vmatpush1.bf16.msra.mxu0 %v7212_v11  ;;  %v7350_v4 = vld [vmem:[%s11064_s1 + $0x4b8] ss:$24 sps:$4 sm:$0xff]   ;;  %v7354_v5 = vld [vmem:[%s11064_s1 + $0x4ec] ss:$24 sps:$4 sm:$0xff]   ;;  %v7356_v8 = vld [vmem:[%s11064_s1 + $0x4e8] ss:$24 sps:$4 sm:$0xff]  }
  0x47   : > { %2675 = vmatprep.subr.bf16.mxu0 %v7213_v12  ;;  %v7258_v6 = vld [vmem:[%s11064_s1 + $0x3f0] ss:$24 sps:$4 sm:$0xff]   ;;  %v7263_v7 = vld [vmem:[%s11064_s1 + $0x424] ss:$24 sps:$4 sm:$0xff]   ;;  %v7261_v10 = vld [vmem:[%s11064_s1 + $0x420] ss:$24 sps:$4 sm:$0xff]  }
  0x48   : > { %2875 = vmatpush1.bf16.msra.mxu1 %v7314_v42  ;;  %v7360_v9 = vld [vmem:[%s11064_s1 + $0x51c] ss:$24 sps:$4 sm:$0xff]   ;;  %v7362_v12 = vld [vmem:[%s11064_s1 + $0x518] ss:$24 sps:$4 sm:$0xff]   ;;  %v7366_v13 = vld [vmem:[%s11064_s1 + $0x54c] ss:$24 sps:$4 sm:$0xff]  }
  0x49   : > { %2876 = vmatprep.subr.bf16.mxu1 %v7318_v43  ;;  %v7266_v11 = vld [vmem:[%s11064_s1 + $0x454] ss:$24 sps:$4 sm:$0xff]   ;;  %v7386_v30 = vld [vmem:[%s11064_s1 + $0x5d8] ss:$24 sps:$4 sm:$0xff]   ;;  %v345_v33 = vld [vmem:[%s8572_s27 + $0x10] sm:$0xff] }
  0x4a   : > { %2676 = vmatpush1.bf16.msra.mxu0 %v7215_v15  ;;  %v7264_v15 = vld [vmem:[%s11064_s1 + $0x450] ss:$24 sps:$4 sm:$0xff]   ;;  %v7384_v26 = vld [vmem:[%s11064_s1 + $0x5dc] ss:$24 sps:$4 sm:$0xff]   ;;  %v8866_v37 = vpack.c.bf16 %v345_v33, %v345_v33  ;;  %v7279_v39 = vld [vmem:[%s11064_s1 + $0x540] ss:$24 sps:$4 sm:$0xff]  }
  0x4b   : > { %2677 = vmatprep.subr.bf16.mxu0 %v7216_v16  ;;  %v7269_v16 = vld [vmem:[%s11064_s1 + $0x484] ss:$24 sps:$4 sm:$0xff]   ;;  %v7278_v29 = vld [vmem:[%s11064_s1 + $0x514] ss:$24 sps:$4 sm:$0xff]   ;;  %v7396_v42 = vld [vmem:[%s11064_s1 + $0x638] ss:$24 sps:$4 sm:$0xff]  }
  0x4c   : > { %2877 = vmatpush1.bf16.msra.mxu1 %v7320_v47  ;;  %v7281_v34 = vld [vmem:[%s11064_s1 + $0x544] ss:$24 sps:$4 sm:$0xff]   ;;  %v7402_v46 = vld [vmem:[%s11064_s1 + $0x668] ss:$24 sps:$4 sm:$0xff]  }
  0x4d   : > { %2878 = vmatprep.subr.bf16.mxu1 %v7324_v48  ;;  %v7398_v38 = vld [vmem:[%s11064_s1 + $0x63c] ss:$24 sps:$4 sm:$0xff]   ;;  %v7404_v43 = vld [vmem:[%s11064_s1 + $0x66c] ss:$24 sps:$4 sm:$0xff]   ;;  %v7285_v48 = vld [vmem:[%s11064_s1 + $0x5a0] ss:$24 sps:$4 sm:$0xff]  }
  0x4e   : > { %2678 = vmatpush1.bf16.msra.mxu0 %v7218_v17  ;;  %v7368_v17 = vld [vmem:[%s11064_s1 + $0x548] ss:$24 sps:$4 sm:$0xff]   ;;  %v7410_v47 = vld [vmem:[%s11064_s1 + $0x69c] ss:$24 sps:$4 sm:$0xff]  }
  0x4f   : > { %2679 = vmatprep.subr.bf16.mxu0 %v7219_v18  ;;  %v7372_v18 = vld [vmem:[%s11064_s1 + $0x57c] ss:$24 sps:$4 sm:$0xff]   ;;  %v7474_v33 = vld [vmem:[%s11064_s1 + $0x8a8] ss:$24 sps:$4 sm:$0xff]  }
  0x50   : > { %2879 = vmatpush1.bf16.msra.mxu1 %v7326_v52  ;;  %v7416_v52 = vld [vmem:[%s11064_s1 + $0x6cc] ss:$24 sps:$4 sm:$0xff]  }
  0x51   : > { %2880 = vmatprep.subr.bf16.mxu1 %v7330_v53  ;;  %v7288_v53 = vld [vmem:[%s11064_s1 + $0x5d0] ss:$24 sps:$4 sm:$0xff]  }
  0x52   : > { %2680 = vmatpush1.bf16.msra.mxu0 %v7221_v19  ;;  %v7267_v19 = vld [vmem:[%s11064_s1 + $0x480] ss:$24 sps:$4 sm:$0xff]  }
  0x53   : > { %2681 = vmatprep.subr.bf16.mxu0 %v7222_v20  ;;  %v7272_v20 = vld [vmem:[%s11064_s1 + $0x4b4] ss:$24 sps:$4 sm:$0xff]  }
  0x54   : > { %2881 = vmatpush1.bf16.msra.mxu1 %v7332_v56  ;;  %v7422_v56 = vld [vmem:[%s11064_s1 + $0x6fc] ss:$24 sps:$4 sm:$0xff]  }
  0x55   : > { %2882 = vmatprep.subr.bf16.mxu1 %v7336_v57  ;;  %v7291_v57 = vld [vmem:[%s11064_s1 + $0x600] ss:$24 sps:$4 sm:$0xff]  }
  0x56   : > { %2682 = vmatpush1.bf16.msra.mxu0 %v7224_v21  ;;  %v7374_v21 = vld [vmem:[%s11064_s1 + $0x578] ss:$24 sps:$4 sm:$0xff]  }
  0x57   : > { %2683 = vmatprep.subr.bf16.mxu0 %v7225_v22  ;;  %v7378_v22 = vld [vmem:[%s11064_s1 + $0x5ac] ss:$24 sps:$4 sm:$0xff]  }
  0x58   : > { %2883 = vmatpush1.bf16.msra.mxu1 %v7338_v60  ;;  %v7428_v60 = vld [vmem:[%s11064_s1 + $0x72c] ss:$24 sps:$4 sm:$0xff]  }
  0x59   : > { %2884 = vmatprep.subr.bf16.mxu1 %v7342_v61  ;;  %v7297_v61 = vld [vmem:[%s11064_s1 + $0x630] ss:$24 sps:$4 sm:$0xff]  }
  0x5a   : > { %2684 = vmatpush1.bf16.msra.mxu0 %v7227_v23  ;;  %v7270_v23 = vld [vmem:[%s11064_s1 + $0x4b0] ss:$24 sps:$4 sm:$0xff]  }
  0x5b   : > { %2685 = vmatprep.subr.bf16.mxu0 %v7228_v24  ;;  %v7275_v24 = vld [vmem:[%s11064_s1 + $0x4e4] ss:$24 sps:$4 sm:$0xff]  }
  0x5c   : > { %2885 = vmatpush1.bf16.msra.mxu1 %v7344_v0  ;;  %v7434_v0 = vld [vmem:[%s11064_s1 + $0x75c] ss:$24 sps:$4 sm:$0xff]  }
  0x5d   : > { %2886 = vmatprep.subr.bf16.mxu1 %v7348_v1  ;;  %v7303_v1 = vld [vmem:[%s11064_s1 + $0x660] ss:$24 sps:$4 sm:$0xff]  }
  0x5e   : > { %2686 = vmatpush1.bf16.msra.mxu0 %v7230_v25  ;;  %v7380_v25 = vld [vmem:[%s11064_s1 + $0x5a8] ss:$24 sps:$4 sm:$0xff]  }
  0x5f   : > { %2687 = vmatprep.subr.bf16.mxu0 %v7231_v27  ;;  %v7273_v27 = vld [vmem:[%s11064_s1 + $0x4e0] ss:$24 sps:$4 sm:$0xff]  }
  0x60   : > { %2887 = vmatpush1.bf16.msra.mxu1 %v7350_v4  ;;  %v7440_v4 = vld [vmem:[%s11064_s1 + $0x78c] ss:$24 sps:$4 sm:$0xff]  }
  0x61   : > { %2888 = vmatprep.subr.bf16.mxu1 %v7354_v5  ;;  %v7309_v5 = vld [vmem:[%s11064_s1 + $0x690] ss:$24 sps:$4 sm:$0xff]  }
  0x62   : > { %2688 = vmatpush1.bf16.msra.mxu0 %v7233_v31  ;;  %v7276_v31 = vld [vmem:[%s11064_s1 + $0x510] ss:$24 sps:$4 sm:$0xff]  }
  0x63   : > { %2689 = vmatprep.subr.bf16.mxu0 %v7234_v32  ;;  %v7392_v32 = vld [vmem:[%s11064_s1 + $0x60c] ss:$24 sps:$4 sm:$0xff]  }
  0x64   : > { %2889 = vmatpush1.bf16.msra.mxu1 %v7356_v8  ;;  %v7446_v8 = vld [vmem:[%s11064_s1 + $0x7bc] ss:$24 sps:$4 sm:$0xff]  }
  0x65   : > { %2890 = vmatprep.subr.bf16.mxu1 %v7360_v9  ;;  %v7315_v9 = vld [vmem:[%s11064_s1 + $0x6c0] ss:$24 sps:$4 sm:$0xff]  }
  0x66   : > { %2690 = vmatpush1.bf16.msra.mxu0 %v7236_v35  ;;  %v348_v35 = vld [vmem:[%s8572_s27 + $0x28] sm:$0xff] }
  0x67   : > { %2691 = vmatprep.subr.bf16.mxu0 %v7237_v36  ;;  %v7390_v36 = vld [vmem:[%s11064_s1 + $0x608] ss:$24 sps:$4 sm:$0xff]  }
  0x68   : > { %2891 = vmatpush1.bf16.msra.mxu1 %v7362_v12  ;;  %v7452_v12 = vld [vmem:[%s11064_s1 + $0x7ec] ss:$24 sps:$4 sm:$0xff]  }
  0x69   : > { %2892 = vmatprep.subr.bf16.mxu1 %v7366_v13  ;;  %v7321_v13 = vld [vmem:[%s11064_s1 + $0x6f0] ss:$24 sps:$4 sm:$0xff]  }
  0x6a   : > { %2692 = vmatpush1.bf16.msra.mxu0 %v7239_v40  ;;  %v8874_v40 = vpack.c.bf16 %v348_v35, %v348_v35  ;;  %v7351_v35 = vld [vmem:[%s11064_s1 + $0x7e0] ss:$24 sps:$4 sm:$0xff]  }
  0x6b   : > { %2693 = vmatprep.subr.bf16.mxu0 %v7240_v41  ;;  %v7284_v41 = vld [vmem:[%s11064_s1 + $0x574] ss:$24 sps:$4 sm:$0xff]  }
  0x6c   : > { %2893 = vmatpush1.bf16.msra.mxu1 %v7368_v17  ;;  %v7458_v17 = vld [vmem:[%s11064_s1 + $0x81c] ss:$24 sps:$4 sm:$0xff]  }
  0x6d   : > { %2894 = vmatprep.subr.bf16.mxu1 %v7372_v18  ;;  %v7327_v18 = vld [vmem:[%s11064_s1 + $0x720] ss:$24 sps:$4 sm:$0xff]  }
  0x6e   : > { %2694 = vmatpush1.bf16.msra.mxu0 %v7242_v44  ;;  %v7282_v44 = vld [vmem:[%s11064_s1 + $0x570] ss:$24 sps:$4 sm:$0xff]  }
  0x6f   : > { %2704 = vmatprep.subr.bf16.mxu0 %v7245_v45  ;;  %v7287_v45 = vld [vmem:[%s11064_s1 + $0x5a4] ss:$24 sps:$4 sm:$0xff]  }
  0x70   : > { %2895 = vmatpush1.bf16.msra.mxu1 %v7374_v21  ;;  %v7464_v21 = vld [vmem:[%s11064_s1 + $0x84c] ss:$24 sps:$4 sm:$0xff]  }
  0x71   : > { %2696 = vmatmul.mubr.bf16.vlgmr.msra.gmra.mrb[0].mxu0 %v8719_v49  ;;  %2896 = vmatprep.subr.bf16.mxu1 %v7378_v22  ;;  %v7333_v22 = vld [vmem:[%s11064_s1 + $0x750] ss:$24 sps:$4 sm:$0xff]  }
  0x72   : > { %2705 = vmatpush1.bf16.msra.mxu0 %v7243_v50  ;;  %2736 = vmatprep.mubr.bf16.mxu0 %v8658_v28  ;;  %v7290_v50 = vld [vmem:[%s11064_s1 + $0x5d4] ss:$24 sps:$4 sm:$0xff]  }
  0x73   : > { %2706 = vmatprep.subr.bf16.mxu0 %v7248_v51  ;;  %v7408_v51 = vld [vmem:[%s11064_s1 + $0x698] ss:$24 sps:$4 sm:$0xff]  }
  0x74   : > { %2897 = vmatpush1.bf16.msra.mxu1 %v7380_v25  ;;  %v7470_v25 = vld [vmem:[%s11064_s1 + $0x87c] ss:$24 sps:$4 sm:$0xff]  }
  0x75   : > { %2898 = vmatprep.subr.bf16.mxu1 %v7384_v26  ;;  %v7339_v26 = vld [vmem:[%s11064_s1 + $0x780] ss:$24 sps:$4 sm:$0xff]  }
  0x76   : > { %2707 = vmatpush1.bf16.msra.mxu0 %v7246_v54  ;;  %v7293_v54 = vld [vmem:[%s11064_s1 + $0x604] ss:$24 sps:$4 sm:$0xff]  }
  0x77   : > { %2708 = vmatprep.subr.bf16.mxu0 %v7251_v55  ;;  %v7414_v55 = vld [vmem:[%s11064_s1 + $0x6c8] ss:$24 sps:$4 sm:$0xff]  }
  0x78   : > { %2899 = vmatpush1.bf16.msra.mxu1 %v7386_v30  ;;  %v7476_v30 = vld [vmem:[%s11064_s1 + $0x8ac] ss:$24 sps:$4 sm:$0xff]  }
  0x79   : > { %2909 = vmatprep.subr.bf16.mxu1 %v7392_v32  ;;  %v7353_v32 = vld [vmem:[%s11064_s1 + $0x7e4] ss:$24 sps:$4 sm:$0xff]  }
  0x7a   : > { %2709 = vmatpush1.bf16.msra.mxu0 %v7249_v58  ;;  %v7299_v58 = vld [vmem:[%s11064_s1 + $0x634] ss:$24 sps:$4 sm:$0xff]  }
  0x7b   : > { %2710 = vmatprep.subr.bf16.mxu0 %v7254_v59  ;;  %2901 = vmatmul.mubr.bf16.vlgmr.msra.gmra.mrb[0].mxu1 %v8866_v37  ;;  %v7420_v59 = vld [vmem:[%s11064_s1 + $0x6f8] ss:$24 sps:$4 sm:$0xff]  }
  0x7c   : > { %2910 = vmatpush1.bf16.msra.mxu1 %v7390_v36  ;;  %2941 = vmatprep.mubr.bf16.mxu1 %v8874_v40  ;;  %v7359_v36 = vld [vmem:[%s11064_s1 + $0x814] ss:$24 sps:$4 sm:$0xff]  }
  0x7d   : > { %2911 = vmatprep.subr.bf16.mxu1 %v7398_v38  ;;  %v347_v38 = vld [vmem:[%s8572_s27 + $0x20] sm:$0xff] }
  0x7e   : > { %2711 = vmatpush1.bf16.msra.mxu0 %v7252_v62  ;;  %v7305_v62 = vld [vmem:[%s11064_s1 + $0x664] ss:$24 sps:$4 sm:$0xff]  }
  0x7f   : > { %2712 = vmatprep.subr.bf16.mxu0 %v7257_v63  ;;  %v7426_v63 = vld [vmem:[%s11064_s1 + $0x728] ss:$24 sps:$4 sm:$0xff]  }
  0x80   : > { %2912 = vmatpush1.bf16.msra.mxu1 %v7396_v42  ;;  %v7357_v42 = vld [vmem:[%s11064_s1 + $0x810] ss:$24 sps:$4 sm:$0xff]  }
  0x81   : > { %2913 = vmatprep.subr.bf16.mxu1 %v7404_v43  ;;  %v7365_v43 = vld [vmem:[%s11064_s1 + $0x844] ss:$24 sps:$4 sm:$0xff]  }
  0x82   : > { %2713 = vmatpush1.bf16.msra.mxu0 %v7255_v2  ;;  %v7311_v2 = vld [vmem:[%s11064_s1 + $0x694] ss:$24 sps:$4 sm:$0xff]  }
  0x83   : > { %2714 = vmatprep.subr.bf16.mxu0 %v7260_v3  ;;  %v7432_v3 = vld [vmem:[%s11064_s1 + $0x758] ss:$24 sps:$4 sm:$0xff]  }
  0x84   : > { %2914 = vmatpush1.bf16.msra.mxu1 %v7402_v46  ;;  %v7494_v46 = vld [vmem:[%s11064_s1 + $0x93c] ss:$24 sps:$4 sm:$0xff]  }
  0x85   : > { %2915 = vmatprep.subr.bf16.mxu1 %v7410_v47  ;;  %v9071_v47 = vpack.c.bf16 %v347_v38, %v347_v38  ;;  %v7443_v38 = vld [vmem:[%s11064_s1 + $0xab4] ss:$24 sps:$4 sm:$0xff]  }
  0x86   : > { %2715 = vmatpush1.bf16.msra.mxu0 %v7258_v6  ;;  %v7317_v6 = vld [vmem:[%s11064_s1 + $0x6c4] ss:$24 sps:$4 sm:$0xff]  }
  0x87   : > { %2716 = vmatprep.subr.bf16.mxu0 %v7263_v7  ;;  %v7438_v7 = vld [vmem:[%s11064_s1 + $0x788] ss:$24 sps:$4 sm:$0xff]  }
  0x88   : > { %2916 = vmatpush1.bf16.msra.mxu1 %v7408_v51 }
  0x89   : > { %2917 = vmatprep.subr.bf16.mxu1 %v7416_v52  ;;  %v7492_v52 = vld [vmem:[%s11064_s1 + $0x938] ss:$24 sps:$4 sm:$0xff]  }
  0x8a   : > { %2717 = vmatpush1.bf16.msra.mxu0 %v7261_v10  ;;  %v7323_v10 = vld [vmem:[%s11064_s1 + $0x6f4] ss:$24 sps:$4 sm:$0xff]  }
  0x8b   : > { %2718 = vmatprep.subr.bf16.mxu0 %v7266_v11  ;;  %v7444_v11 = vld [vmem:[%s11064_s1 + $0x7b8] ss:$24 sps:$4 sm:$0xff]  }
  0x8c   : > { %2918 = vmatpush1.bf16.msra.mxu1 %v7414_v55  ;;  %v7377_v55 = vld [vmem:[%s11064_s1 + $0x8a4] ss:$24 sps:$4 sm:$0xff]  }
  0x8d   : > { %2919 = vmatprep.subr.bf16.mxu1 %v7422_v56  ;;  %v7498_v56 = vld [vmem:[%s11064_s1 + $0x968] ss:$24 sps:$4 sm:$0xff]  }
  0x8e   : > { %2719 = vmatpush1.bf16.msra.mxu0 %v7264_v15  ;;  %v7329_v15 = vld [vmem:[%s11064_s1 + $0x724] ss:$24 sps:$4 sm:$0xff]  }
  0x8f   : > { %2720 = vmatprep.subr.bf16.mxu0 %v7269_v16  ;;  %v7450_v16 = vld [vmem:[%s11064_s1 + $0x7e8] ss:$24 sps:$4 sm:$0xff]  }
  0x90   : > { %2920 = vmatpush1.bf16.msra.mxu1 %v7420_v59  ;;  %v7383_v59 = vld [vmem:[%s11064_s1 + $0x8d4] ss:$24 sps:$4 sm:$0xff]  }
  0x91   : > { %2921 = vmatprep.subr.bf16.mxu1 %v7428_v60  ;;  %v7504_v60 = vld [vmem:[%s11064_s1 + $0x998] ss:$24 sps:$4 sm:$0xff]  }
  0x92   : > { %2721 = vmatpush1.bf16.msra.mxu0 %v7267_v19  ;;  %v7335_v19 = vld [vmem:[%s11064_s1 + $0x754] ss:$24 sps:$4 sm:$0xff]  }
  0x93   : > { %2722 = vmatprep.subr.bf16.mxu0 %v7272_v20  ;;  %v7456_v20 = vld [vmem:[%s11064_s1 + $0x818] ss:$24 sps:$4 sm:$0xff]  }
  0x94   : > { %2922 = vmatpush1.bf16.msra.mxu1 %v7426_v63  ;;  %v7389_v63 = vld [vmem:[%s11064_s1 + $0x904] ss:$24 sps:$4 sm:$0xff]  }
  0x95   : > { %2923 = vmatprep.subr.bf16.mxu1 %v7434_v0  ;;  %v7510_v0 = vld [vmem:[%s11064_s1 + $0x9c8] ss:$24 sps:$4 sm:$0xff]  }
  0x96   : > { %2723 = vmatpush1.bf16.msra.mxu0 %v7270_v23  ;;  %v7341_v23 = vld [vmem:[%s11064_s1 + $0x784] ss:$24 sps:$4 sm:$0xff]  }
  0x97   : > { %2724 = vmatprep.subr.bf16.mxu0 %v7275_v24  ;;  %v7462_v24 = vld [vmem:[%s11064_s1 + $0x848] ss:$24 sps:$4 sm:$0xff]  }
  0x98   : > { %2924 = vmatpush1.bf16.msra.mxu1 %v7432_v3  ;;  %v7395_v3 = vld [vmem:[%s11064_s1 + $0x934] ss:$24 sps:$4 sm:$0xff]  }
  0x99   : > { %2925 = vmatprep.subr.bf16.mxu1 %v7440_v4  ;;  %v7516_v4 = vld [vmem:[%s11064_s1 + $0x9f8] ss:$24 sps:$4 sm:$0xff]  }
  0x9a   : > { %2725 = vmatpush1.bf16.msra.mxu0 %v7273_v27  ;;  %v7347_v27 = vld [vmem:[%s11064_s1 + $0x7b4] ss:$24 sps:$4 sm:$0xff]  }
  0x9b   : > { %2726 = vmatprep.subr.bf16.mxu0 %v7278_v29  ;;  %v7468_v29 = vld [vmem:[%s11064_s1 + $0x878] ss:$24 sps:$4 sm:$0xff]  }
  0x9c   : > { %2926 = vmatpush1.bf16.msra.mxu1 %v7438_v7  ;;  %v7401_v7 = vld [vmem:[%s11064_s1 + $0x964] ss:$24 sps:$4 sm:$0xff]  }
  0x9d   : > { %2927 = vmatprep.subr.bf16.mxu1 %v7446_v8  ;;  %v7522_v8 = vld [vmem:[%s11064_s1 + $0xa28] ss:$24 sps:$4 sm:$0xff]  }
  0x9e   : > { %2727 = vmatpush1.bf16.msra.mxu0 %v7276_v31  ;;  %v7345_v31 = vld [vmem:[%s11064_s1 + $0x7b0] ss:$24 sps:$4 sm:$0xff]  }
  0x9f   : > { %2728 = vmatprep.subr.bf16.mxu0 %v7281_v34  ;;  %v7482_v34 = vld [vmem:[%s11064_s1 + $0x8dc] ss:$24 sps:$4 sm:$0xff]  }
  0xa0   : > { %2928 = vmatpush1.bf16.msra.mxu1 %v7444_v11  ;;  %v7407_v11 = vld [vmem:[%s11064_s1 + $0x994] ss:$24 sps:$4 sm:$0xff]  }
  0xa1   : > { %2929 = vmatprep.subr.bf16.mxu1 %v7452_v12  ;;  %v7528_v12 = vld [vmem:[%s11064_s1 + $0xa58] ss:$24 sps:$4 sm:$0xff]  }
  0xa2   : > { %2729 = vmatpush1.bf16.msra.mxu0 %v7279_v39  ;;  %v7480_v39 = vld [vmem:[%s11064_s1 + $0x8d8] ss:$24 sps:$4 sm:$0xff]  }
  0xa3   : > { %2730 = vmatprep.subr.bf16.mxu0 %v7284_v41  ;;  %v7488_v41 = vld [vmem:[%s11064_s1 + $0x90c] ss:$24 sps:$4 sm:$0xff]  }
  0xa4   : > { %2930 = vmatpush1.bf16.msra.mxu1 %v7450_v16  ;;  %v7413_v16 = vld [vmem:[%s11064_s1 + $0x9c4] ss:$24 sps:$4 sm:$0xff]  }
  0xa5   : > { %2931 = vmatprep.subr.bf16.mxu1 %v7458_v17  ;;  %v7534_v17 = vld [vmem:[%s11064_s1 + $0xa88] ss:$24 sps:$4 sm:$0xff]  }
  0xa6   : > { %2731 = vmatpush1.bf16.msra.mxu0 %v7282_v44  ;;  %v350_v44 = vld [vmem:[%s8572_s27 + $0x38] sm:$0xff] }
  0xa7   : > { %2732 = vmatprep.subr.bf16.mxu0 %v7287_v45  ;;  %v7486_v45 = vld [vmem:[%s11064_s1 + $0x908] ss:$24 sps:$4 sm:$0xff]   ;;  %v9079_v51 = vpack.c.bf16 %v350_v44, %v350_v44 }
  0xa8   : > { %2932 = vmatpush1.bf16.msra.mxu1 %v7456_v20  ;;  %v7419_v20 = vld [vmem:[%s11064_s1 + $0x9f4] ss:$24 sps:$4 sm:$0xff]   ;;  %v7570_v44 = vld [vmem:[%s11064_s1 + $0xba8] ss:$24 sps:$4 sm:$0xff]  }
  0xa9   : > { %2933 = vmatprep.subr.bf16.mxu1 %v7464_v21  ;;  %v7540_v21 = vld [vmem:[%s11064_s1 + $0xab8] ss:$24 sps:$4 sm:$0xff]  }
  0xaa   : > { %2733 = vmatpush1.bf16.msra.mxu0 %v7285_v48  ;;  %v7363_v48 = vld [vmem:[%s11064_s1 + $0x840] ss:$24 sps:$4 sm:$0xff]  }
  0xab   : > { %2734 = vmatprep.subr.bf16.mxu0 %v7290_v50  ;;  %v7371_v50 = vld [vmem:[%s11064_s1 + $0x874] ss:$24 sps:$4 sm:$0xff]  }
  0xac   : > { %2934 = vmatpush1.bf16.msra.mxu1 %v7462_v24  ;;  %v7425_v24 = vld [vmem:[%s11064_s1 + $0xa24] ss:$24 sps:$4 sm:$0xff]  }
  0xad   : > { %2935 = vmatprep.subr.bf16.mxu1 %v7470_v25  ;;  %v7546_v25 = vld [vmem:[%s11064_s1 + $0xae8] ss:$24 sps:$4 sm:$0xff]  }
  0xae   : > { %2735 = vmatpush1.bf16.msra.mxu0 %v7288_v53  ;;  %v7500_v53 = vld [vmem:[%s11064_s1 + $0x96c] ss:$24 sps:$4 sm:$0xff]  }
  0xaf   : > { %2745 = vmatprep.subr.bf16.mxu0 %v7293_v54  ;;  %v7369_v54 = vld [vmem:[%s11064_s1 + $0x870] ss:$24 sps:$4 sm:$0xff]  }
  0xb0   : > { %2936 = vmatpush1.bf16.msra.mxu1 %v7468_v29  ;;  %v7431_v29 = vld [vmem:[%s11064_s1 + $0xa54] ss:$24 sps:$4 sm:$0xff]  }
  0xb1   : > { %2737 = vmatmul.mubr.bf16.vlgmr.msra.gmra.mrb[0].mxu0 %v8866_v37  ;;  %2937 = vmatprep.subr.bf16.mxu1 %v7476_v30  ;;  %v7552_v30 = vld [vmem:[%s11064_s1 + $0xb18] ss:$24 sps:$4 sm:$0xff]  }
  0xb2   : > { %2746 = vmatpush1.bf16.msra.mxu0 %v7291_v57  ;;  %2777 = vmatprep.mubr.bf16.mxu0 %v8874_v40  ;;  %v7506_v57 = vld [vmem:[%s11064_s1 + $0x99c] ss:$24 sps:$4 sm:$0xff]  }
  0xb3   : > { %2747 = vmatprep.subr.bf16.mxu0 %v7299_v58  ;;  %v7375_v58 = vld [vmem:[%s11064_s1 + $0x8a0] ss:$24 sps:$4 sm:$0xff]  }
  0xb4   : > { %2938 = vmatpush1.bf16.msra.mxu1 %v7474_v33  ;;  %v7437_v33 = vld [vmem:[%s11064_s1 + $0xa84] ss:$24 sps:$4 sm:$0xff]  }
  0xb5   : > { %2939 = vmatprep.subr.bf16.mxu1 %v7482_v34  ;;  %v7558_v34 = vld [vmem:[%s11064_s1 + $0xb48] ss:$24 sps:$4 sm:$0xff]  }
  0xb6   : > { %2748 = vmatpush1.bf16.msra.mxu0 %v7297_v61  ;;  %v7512_v61 = vld [vmem:[%s11064_s1 + $0x9cc] ss:$24 sps:$4 sm:$0xff]  }
  0xb7   : > { %2749 = vmatprep.subr.bf16.mxu0 %v7305_v62  ;;  %v7381_v62 = vld [vmem:[%s11064_s1 + $0x8d0] ss:$24 sps:$4 sm:$0xff]  }
  0xb8   : > { %2940 = vmatpush1.bf16.msra.mxu1 %v7480_v39  ;;  %v7564_v39 = vld [vmem:[%s11064_s1 + $0xb78] ss:$24 sps:$4 sm:$0xff]  }
  0xb9   : > { %2950 = vmatprep.subr.bf16.mxu1 %v7488_v41  ;;  %v7572_v41 = vld [vmem:[%s11064_s1 + $0xbac] ss:$24 sps:$4 sm:$0xff]  }
  0xba   : > { %2750 = vmatpush1.bf16.msra.mxu0 %v7303_v1  ;;  %v7518_v1 = vld [vmem:[%s11064_s1 + $0x9fc] ss:$24 sps:$4 sm:$0xff]  }
  0xbb   : > { %2751 = vmatprep.subr.bf16.mxu0 %v7311_v2  ;;  %2942 = vmatmul.mubr.bf16.vlgmr.msra.gmra.mrb[0].mxu1 %v9071_v47  ;;  %v7387_v2 = vld [vmem:[%s11064_s1 + $0x900] ss:$24 sps:$4 sm:$0xff]  }
  0xbc   : > { %2951 = vmatpush1.bf16.msra.mxu1 %v7486_v45  ;;  %2982 = vmatprep.mubr.bf16.mxu1 %v9079_v51  ;;  %v7578_v45 = vld [vmem:[%s11064_s1 + $0xbdc] ss:$24 sps:$4 sm:$0xff]  }
  0xbd   : > { %2952 = vmatprep.subr.bf16.mxu1 %v7494_v46  ;;  %v7447_v46 = vld [vmem:[%s11064_s1 + $0xae0] ss:$24 sps:$4 sm:$0xff]  }
  0xbe   : > { %2752 = vmatpush1.bf16.msra.mxu0 %v7309_v5  ;;  %v7393_v5 = vld [vmem:[%s11064_s1 + $0x930] ss:$24 sps:$4 sm:$0xff]  }
  0xbf   : > { %2753 = vmatprep.subr.bf16.mxu0 %v7317_v6  ;;  %v7524_v6 = vld [vmem:[%s11064_s1 + $0xa2c] ss:$24 sps:$4 sm:$0xff]  }
  0xc0   : > { %2953 = vmatpush1.bf16.msra.mxu1 %v7492_v52  ;;  %v349_v52 = vld [vmem:[%s8572_s27 + $0x30] sm:$0xff] }
  0xc1   : > { %2954 = vmatprep.subr.bf16.mxu1 %v7500_v53  ;;  %v7453_v53 = vld [vmem:[%s11064_s1 + $0xb10] ss:$24 sps:$4 sm:$0xff]  }
  0xc2   : > { %2754 = vmatpush1.bf16.msra.mxu0 %v7315_v9  ;;  %v7530_v9 = vld [vmem:[%s11064_s1 + $0xa5c] ss:$24 sps:$4 sm:$0xff]  }
  0xc3   : > { %2755 = vmatprep.subr.bf16.mxu0 %v7323_v10  ;;  %v7399_v10 = vld [vmem:[%s11064_s1 + $0x960] ss:$24 sps:$4 sm:$0xff]  }
  0xc4   : > { %2955 = vmatpush1.bf16.msra.mxu1 %v7498_v56  ;;  %v7459_v56 = vld [vmem:[%s11064_s1 + $0xb40] ss:$24 sps:$4 sm:$0xff]  }
  0xc5   : > { %2956 = vmatprep.subr.bf16.mxu1 %v7506_v57  ;;  %v7467_v57 = vld [vmem:[%s11064_s1 + $0xb74] ss:$24 sps:$4 sm:$0xff]  }
  0xc6   : > { %2756 = vmatpush1.bf16.msra.mxu0 %v7321_v13  ;;  %v7536_v13 = vld [vmem:[%s11064_s1 + $0xa8c] ss:$24 sps:$4 sm:$0xff]  }
  0xc7   : > { %2757 = vmatprep.subr.bf16.mxu0 %v7329_v15  ;;  %v7405_v15 = vld [vmem:[%s11064_s1 + $0x990] ss:$24 sps:$4 sm:$0xff]  }
  0xc8   : > { %2957 = vmatpush1.bf16.msra.mxu1 %v7504_v60  ;;  %v7471_v60 = vld [vmem:[%s11064_s1 + $0xba0] ss:$24 sps:$4 sm:$0xff]  }
  0xc9   : > { %2958 = vmatprep.subr.bf16.mxu1 %v7512_v61  ;;  %v7479_v61 = vld [vmem:[%s11064_s1 + $0xbd4] ss:$24 sps:$4 sm:$0xff]  }
  0xca   : > { %2758 = vmatpush1.bf16.msra.mxu0 %v7327_v18  ;;  %v7542_v18 = vld [vmem:[%s11064_s1 + $0xabc] ss:$24 sps:$4 sm:$0xff]  }
  0xcb   : > { %2759 = vmatprep.subr.bf16.mxu0 %v7335_v19  ;;  %v7411_v19 = vld [vmem:[%s11064_s1 + $0x9c0] ss:$24 sps:$4 sm:$0xff]  }
  0xcc   : > { %2959 = vmatpush1.bf16.msra.mxu1 %v7510_v0  ;;  %v7483_v0 = vld [vmem:[%s11064_s1 + $0x8] ss:$24 sps:$4 sm:$0xff]  }
  0xcd   : > { %2960 = vmatprep.subr.bf16.mxu1 %v7518_v1  ;;  %v7491_v1 = vld [vmem:[%s11064_s1 + $0x3c] ss:$24 sps:$4 sm:$0xff]  }
  0xce   : > { %2760 = vmatpush1.bf16.msra.mxu0 %v7333_v22  ;;  %v7548_v22 = vld [vmem:[%s11064_s1 + $0xaec] ss:$24 sps:$4 sm:$0xff]  }
  0xcf   : > { %2761 = vmatprep.subr.bf16.mxu0 %v7341_v23  ;;  %v7417_v23 = vld [vmem:[%s11064_s1 + $0x9f0] ss:$24 sps:$4 sm:$0xff]  }
  0xd0   : > { %2961 = vmatpush1.bf16.msra.mxu1 %v7516_v4  ;;  %v7495_v4 = vld [vmem:[%s11064_s1 + $0x68] ss:$24 sps:$4 sm:$0xff]  }
  0xd1   : > { %2962 = vmatprep.subr.bf16.mxu1 %v7524_v6  ;;  %v7501_v6 = vld [vmem:[%s11064_s1 + $0x98] ss:$24 sps:$4 sm:$0xff]  }
  0xd2   : > { %2762 = vmatpush1.bf16.msra.mxu0 %v7339_v26  ;;  %v7554_v26 = vld [vmem:[%s11064_s1 + $0xb1c] ss:$24 sps:$4 sm:$0xff]  }
  0xd3   : > { %2763 = vmatprep.subr.bf16.mxu0 %v7347_v27  ;;  %v7423_v27 = vld [vmem:[%s11064_s1 + $0xa20] ss:$24 sps:$4 sm:$0xff]  }
  0xd4   : > { %2963 = vmatpush1.bf16.msra.mxu1 %v7522_v8  ;;  %v7507_v8 = vld [vmem:[%s11064_s1 + $0xc8] ss:$24 sps:$4 sm:$0xff]  }
  0xd5   : > { %2964 = vmatprep.subr.bf16.mxu1 %v7530_v9  ;;  %v7515_v9 = vld [vmem:[%s11064_s1 + $0xfc] ss:$24 sps:$4 sm:$0xff]  }
  0xd6   : > { %2764 = vmatpush1.bf16.msra.mxu0 %v7345_v31  ;;  %v7560_v31 = vld [vmem:[%s11064_s1 + $0xb4c] ss:$24 sps:$4 sm:$0xff]  }
  0xd7   : > { %2765 = vmatprep.subr.bf16.mxu0 %v7353_v32  ;;  %v7429_v32 = vld [vmem:[%s11064_s1 + $0xa50] ss:$24 sps:$4 sm:$0xff]  }
  0xd8   : > { %2965 = vmatpush1.bf16.msra.mxu1 %v7528_v12  ;;  %v7519_v12 = vld [vmem:[%s11064_s1 + $0x128] ss:$24 sps:$4 sm:$0xff]  }
  0xd9   : > { %2966 = vmatprep.subr.bf16.mxu1 %v7536_v13  ;;  %v7527_v13 = vld [vmem:[%s11064_s1 + $0x15c] ss:$24 sps:$4 sm:$0xff]  }
  0xda   : > { %2766 = vmatpush1.bf16.msra.mxu0 %v7351_v35  ;;  %v7566_v35 = vld [vmem:[%s11064_s1 + $0xb7c] ss:$24 sps:$4 sm:$0xff]  }
  0xdb   : > { %2767 = vmatprep.subr.bf16.mxu0 %v7359_v36  ;;  %v7435_v36 = vld [vmem:[%s11064_s1 + $0xa80] ss:$24 sps:$4 sm:$0xff]  }
  0xdc   : > { %2967 = vmatpush1.bf16.msra.mxu1 %v7534_v17  ;;  %v7525_v17 = vld [vmem:[%s11064_s1 + $0x158] ss:$24 sps:$4 sm:$0xff]  }
  0xdd   : > { %2968 = vmatprep.subr.bf16.mxu1 %v7542_v18  ;;  %v7533_v18 = vld [vmem:[%s11064_s1 + $0x18c] ss:$24 sps:$4 sm:$0xff]  }
  0xde   : > { %2768 = vmatpush1.bf16.msra.mxu0 %v7357_v42  ;;  %v7441_v42 = vld [vmem:[%s11064_s1 + $0xab0] ss:$24 sps:$4 sm:$0xff]  }
  0xdf   : > { %2769 = vmatprep.subr.bf16.mxu0 %v7365_v43  ;;  %v7449_v43 = vld [vmem:[%s11064_s1 + $0xae4] ss:$24 sps:$4 sm:$0xff]  }
  0xe0   : > { %2969 = vmatpush1.bf16.msra.mxu1 %v7540_v21  ;;  %v7531_v21 = vld [vmem:[%s11064_s1 + $0x188] ss:$24 sps:$4 sm:$0xff]  }
  0xe1   : > { %2970 = vmatprep.subr.bf16.mxu1 %v7548_v22  ;;  %v7539_v22 = vld [vmem:[%s11064_s1 + $0x1bc] ss:$24 sps:$4 sm:$0xff]  }
  0xe2   : > { %2770 = vmatpush1.bf16.msra.mxu0 %v7363_v48  ;;  %v7455_v48 = vld [vmem:[%s11064_s1 + $0xb14] ss:$24 sps:$4 sm:$0xff]  }
  0xe3   : > { %2771 = vmatprep.subr.bf16.mxu0 %v7371_v50  ;;  %v7576_v50 = vld [vmem:[%s11064_s1 + $0xbd8] ss:$24 sps:$4 sm:$0xff]  }
  0xe4   : > { %2971 = vmatpush1.bf16.msra.mxu1 %v7546_v25  ;;  %v7537_v25 = vld [vmem:[%s11064_s1 + $0x1b8] ss:$24 sps:$4 sm:$0xff]  }
  0xe5   : > { %2972 = vmatprep.subr.bf16.mxu1 %v7554_v26  ;;  %v7545_v26 = vld [vmem:[%s11064_s1 + $0x1ec] ss:$24 sps:$4 sm:$0xff]  }
  0xe6   : > { %2772 = vmatpush1.bf16.msra.mxu0 %v7369_v54  ;;  %v7461_v54 = vld [vmem:[%s11064_s1 + $0xb44] ss:$24 sps:$4 sm:$0xff]  }
  0xe7   : > { %2773 = vmatprep.subr.bf16.mxu0 %v7377_v55  ;;  %v9263_v55 = vpack.c.bf16 %v349_v52, %v349_v52  ;;  %v7575_v52 = vld [vmem:[%s11064_s1 + $0x2dc] ss:$24 sps:$4 sm:$0xff]  }
  0xe8   : > { %2973 = vmatpush1.bf16.msra.mxu1 %v7552_v30  ;;  %v7543_v30 = vld [vmem:[%s11064_s1 + $0x1e8] ss:$24 sps:$4 sm:$0xff]  }
  0xe9   : > { %2974 = vmatprep.subr.bf16.mxu1 %v7560_v31  ;;  %v7551_v31 = vld [vmem:[%s11064_s1 + $0x21c] ss:$24 sps:$4 sm:$0xff]  }
  0xea   : > { %2774 = vmatpush1.bf16.msra.mxu0 %v7375_v58  ;;  %v7465_v58 = vld [vmem:[%s11064_s1 + $0xb70] ss:$24 sps:$4 sm:$0xff]  }
  0xeb   : > { %2775 = vmatprep.subr.bf16.mxu0 %v7383_v59  ;;  %v7473_v59 = vld [vmem:[%s11064_s1 + $0xba4] ss:$24 sps:$4 sm:$0xff]  }
  0xec   : > { %2975 = vmatpush1.bf16.msra.mxu1 %v7558_v34  ;;  %v7549_v34 = vld [vmem:[%s11064_s1 + $0x218] ss:$24 sps:$4 sm:$0xff]  }
  0xed   : > { %2976 = vmatprep.subr.bf16.mxu1 %v7566_v35  ;;  %v7557_v35 = vld [vmem:[%s11064_s1 + $0x24c] ss:$24 sps:$4 sm:$0xff]  }
  0xee   : > { %2776 = vmatpush1.bf16.msra.mxu0 %v7381_v62  ;;  %v7477_v62 = vld [vmem:[%s11064_s1 + $0xbd0] ss:$24 sps:$4 sm:$0xff]  }
  0xef   : > { %2786 = vmatprep.subr.bf16.mxu0 %v7389_v63  ;;  %v7485_v63 = vld [vmem:[%s11064_s1 + $0xc] ss:$24 sps:$4 sm:$0xff]  }
  0xf0   : > { %2977 = vmatpush1.bf16.msra.mxu1 %v7564_v39  ;;  %v7555_v39 = vld [vmem:[%s11064_s1 + $0x248] ss:$24 sps:$4 sm:$0xff]  }
  0xf1   : > { %2778 = vmatmul.mubr.bf16.vlgmr.msra.gmra.mrb[0].mxu0 %v9071_v47  ;;  %2978 = vmatprep.subr.bf16.mxu1 %v7572_v41  ;;  %v7563_v41 = vld [vmem:[%s11064_s1 + $0x27c] ss:$24 sps:$4 sm:$0xff]  }
  0xf2   : > { %2787 = vmatpush1.bf16.msra.mxu0 %v7387_v2  ;;  %2818 = vmatprep.mubr.bf16.mxu0 %v9079_v51  ;;  %v7489_v2 = vld [vmem:[%s11064_s1 + $0x38] ss:$24 sps:$4 sm:$0xff]  }
  0xf3   : > { %2788 = vmatprep.subr.bf16.mxu0 %v7395_v3  ;;  %v7497_v3 = vld [vmem:[%s11064_s1 + $0x6c] ss:$24 sps:$4 sm:$0xff]  }
  0xf4   : > { %2979 = vmatpush1.bf16.msra.mxu1 %v7570_v44  ;;  %v7561_v44 = vld [vmem:[%s11064_s1 + $0x278] ss:$24 sps:$4 sm:$0xff]  }
  0xf5   : > { %2980 = vmatprep.subr.bf16.mxu1 %v7578_v45  ;;  %v7569_v45 = vld [vmem:[%s11064_s1 + $0x2ac] ss:$24 sps:$4 sm:$0xff]  }
  0xf6   : > { %2789 = vmatpush1.bf16.msra.mxu0 %v7393_v5  ;;  %v7503_v5 = vld [vmem:[%s11064_s1 + $0x9c] ss:$24 sps:$4 sm:$0xff]  }
  0xf7   : > { %2790 = vmatprep.subr.bf16.mxu0 %v7401_v7  ;;  %v7509_v7 = vld [vmem:[%s11064_s1 + $0xcc] ss:$24 sps:$4 sm:$0xff]  }
  0xf8   : > { %2981 = vmatpush1.bf16.msra.mxu1 %v7576_v50  ;;  %v7567_v50 = vld [vmem:[%s11064_s1 + $0x2a8] ss:$24 sps:$4 sm:$0xff]  }
  0xfa   : > { %2791 = vmatpush1.bf16.msra.mxu0 %v7399_v10  ;;  %v7513_v10 = vld [vmem:[%s11064_s1 + $0xf8] ss:$24 sps:$4 sm:$0xff]  }
  0xfb   : > { %2792 = vmatprep.subr.bf16.mxu0 %v7407_v11  ;;  %2983 = vmatmul.mubr.bf16.vlgmr.msra.gmra.mrb[0].mxu1 %v9263_v55  ;;  %v7521_v11 = vld [vmem:[%s11064_s1 + $0x12c] ss:$24 sps:$4 sm:$0xff]  }
  0xfe   : > { %2793 = vmatpush1.bf16.msra.mxu0 %v7405_v15  ;;  %v7648_v15 = vld [vmem:[%s11065_s2] ss:$24 sps:$4 sm:$0xff]  }
  0xff   : > { %2794 = vmatprep.subr.bf16.mxu0 %v7413_v16  ;;  %v7650_v16 = vld [vmem:[%s11065_s2 + $0x4] ss:$24 sps:$4 sm:$0xff]  }
 0x100   : > { %4921 = vmatprep.subr.bf16.mxu1 %v7650_v16  ;;  %v7594_v16 = vld [vmem:[%s11064_s1 + $0x100] ss:$24 sps:$4 sm:$0xff]  }
 0x101   : > { %4922 = vmatpush1.bf16.msra.mxu1 %v7648_v15  ;;  %v7734_v15 = vld [vmem:[%s11065_s2 + $0x2a4] ss:$24 sps:$4 sm:$0xff]  }
 0x102   : > { %2795 = vmatpush1.bf16.msra.mxu0 %v7411_v19  ;;  %v7654_v19 = vld [vmem:[%s11065_s2 + $0x30] ss:$24 sps:$4 sm:$0xff]  }
 0x103   : > { %2796 = vmatprep.subr.bf16.mxu0 %v7419_v20  ;;  %v7656_v20 = vld [vmem:[%s11065_s2 + $0x34] ss:$24 sps:$4 sm:$0xff]  }
 0x104   : > { %4923 = vmatprep.subr.bf16.mxu1 %v7656_v20  ;;  %v7738_v20 = vld [vmem:[%s11065_s2 + $0x2d0] ss:$24 sps:$4 sm:$0xff]  }
 0x105   : > { %4924 = vmatpush1.bf16.msra.mxu1 %v7654_v19  ;;  %v7597_v19 = vld [vmem:[%s11064_s1 + $0x130] ss:$24 sps:$4 sm:$0xff]  }
 0x106   : > { %2797 = vmatpush1.bf16.msra.mxu0 %v7417_v23  ;;  %v7660_v23 = vld [vmem:[%s11065_s2 + $0x60] ss:$24 sps:$4 sm:$0xff]  }
 0x107   : > { %2798 = vmatprep.subr.bf16.mxu0 %v7425_v24  ;;  %v7662_v24 = vld [vmem:[%s11065_s2 + $0x64] ss:$24 sps:$4 sm:$0xff]  }
 0x108   : > { %4925 = vmatprep.subr.bf16.mxu1 %v7662_v24  ;;  %v7605_v24 = vld [vmem:[%s11064_s1 + $0x194] ss:$24 sps:$4 sm:$0xff]  }
 0x109   : > { %4926 = vmatpush1.bf16.msra.mxu1 %v7660_v23  ;;  %v7600_v23 = vld [vmem:[%s11064_s1 + $0x160] ss:$24 sps:$4 sm:$0xff]  }
 0x10a   : > { %2799 = vmatpush1.bf16.msra.mxu0 %v7423_v27  ;;  %v7666_v27 = vld [vmem:[%s11065_s2 + $0x90] ss:$24 sps:$4 sm:$0xff]  }
 0x10b   : > { %2800 = vmatprep.subr.bf16.mxu0 %v7431_v29  ;;  %v7668_v29 = vld [vmem:[%s11065_s2 + $0x94] ss:$24 sps:$4 sm:$0xff]  }
 0x10c   : > { %4927 = vmatprep.subr.bf16.mxu1 %v7668_v29  ;;  %v7611_v29 = vld [vmem:[%s11064_s1 + $0x1f4] ss:$24 sps:$4 sm:$0xff]  }
 0x10d   : > { %4928 = vmatpush1.bf16.msra.mxu1 %v7666_v27  ;;  %v7606_v27 = vld [vmem:[%s11064_s1 + $0x1c0] ss:$24 sps:$4 sm:$0xff]  }
 0x10e   : > { %2801 = vmatpush1.bf16.msra.mxu0 %v7429_v32  ;;  %v7672_v32 = vld [vmem:[%s11065_s2 + $0xc0] ss:$24 sps:$4 sm:$0xff]  }
 0x10f   : > { %2802 = vmatprep.subr.bf16.mxu0 %v7437_v33  ;;  %v7674_v33 = vld [vmem:[%s11065_s2 + $0xc4] ss:$24 sps:$4 sm:$0xff]  }
 0x110   : > { %4929 = vmatprep.subr.bf16.mxu1 %v7674_v33  ;;  %v7617_v33 = vld [vmem:[%s11064_s1 + $0x254] ss:$24 sps:$4 sm:$0xff]  }
 0x111   : > { %4930 = vmatpush1.bf16.msra.mxu1 %v7672_v32  ;;  %v7612_v32 = vld [vmem:[%s11064_s1 + $0x220] ss:$24 sps:$4 sm:$0xff]  }
 0x112   : > { %2803 = vmatpush1.bf16.msra.mxu0 %v7435_v36  ;;  %v7678_v36 = vld [vmem:[%s11065_s2 + $0xf0] ss:$24 sps:$4 sm:$0xff]  }
 0x113   : > { %2804 = vmatprep.subr.bf16.mxu0 %v7443_v38  ;;  %v7680_v38 = vld [vmem:[%s11065_s2 + $0xf4] ss:$24 sps:$4 sm:$0xff]  }
 0x114   : > { %4931 = vmatprep.subr.bf16.mxu1 %v7680_v38  ;;  %v7623_v38 = vld [vmem:[%s11064_s1 + $0x2b4] ss:$24 sps:$4 sm:$0xff]  }
 0x115   : > { %4932 = vmatpush1.bf16.msra.mxu1 %v7678_v36  ;;  %v7618_v36 = vld [vmem:[%s11064_s1 + $0x280] ss:$24 sps:$4 sm:$0xff]  }
 0x116   : > { %2805 = vmatpush1.bf16.msra.mxu0 %v7441_v42  ;;  %v7684_v42 = vld [vmem:[%s11065_s2 + $0x120] ss:$24 sps:$4 sm:$0xff]  }
 0x117   : > { %2806 = vmatprep.subr.bf16.mxu0 %v7449_v43  ;;  %v7686_v43 = vld [vmem:[%s11065_s2 + $0x124] ss:$24 sps:$4 sm:$0xff]  }
 0x118   : > { %4933 = vmatprep.subr.bf16.mxu1 %v7686_v43  ;;  %v7629_v43 = vld [vmem:[%s11064_s1 + $0x314] ss:$24 sps:$4 sm:$0xff]  }
 0x119   : > { %4934 = vmatpush1.bf16.msra.mxu1 %v7684_v42  ;;  %v7624_v42 = vld [vmem:[%s11064_s1 + $0x2e0] ss:$24 sps:$4 sm:$0xff]  }
 0x11a   : > { %2807 = vmatpush1.bf16.msra.mxu0 %v7447_v46  ;;  %v7690_v46 = vld [vmem:[%s11065_s2 + $0x150] ss:$24 sps:$4 sm:$0xff]  }
 0x11b   : > { %2808 = vmatprep.subr.bf16.mxu0 %v7455_v48  ;;  %v7692_v48 = vld [vmem:[%s11065_s2 + $0x154] ss:$24 sps:$4 sm:$0xff]  }
 0x11c   : > { %4935 = vmatprep.subr.bf16.mxu1 %v7692_v48  ;;  %v7635_v48 = vld [vmem:[%s11064_s1 + $0x374] ss:$24 sps:$4 sm:$0xff]  }
 0x11d   : > { %4936 = vmatpush1.bf16.msra.mxu1 %v7690_v46  ;;  %v7630_v46 = vld [vmem:[%s11064_s1 + $0x340] ss:$24 sps:$4 sm:$0xff]  }
 0x11e   : > { %2809 = vmatpush1.bf16.msra.mxu0 %v7453_v53  ;;  %v7696_v53 = vld [vmem:[%s11065_s2 + $0x180] ss:$24 sps:$4 sm:$0xff]  }
 0x11f   : > { %2810 = vmatprep.subr.bf16.mxu0 %v7461_v54  ;;  %v7698_v54 = vld [vmem:[%s11065_s2 + $0x184] ss:$24 sps:$4 sm:$0xff]  }
 0x120   : > { %4937 = vmatprep.subr.bf16.mxu1 %v7698_v54  ;;  %v7644_v54 = vld [vmem:[%s11064_s1 + $0x404] ss:$24 sps:$4 sm:$0xff]  }
 0x121   : > { %4938 = vmatpush1.bf16.msra.mxu1 %v7696_v53  ;;  %v7639_v53 = vld [vmem:[%s11064_s1 + $0x3d0] ss:$24 sps:$4 sm:$0xff]  }
 0x122   : > { %2811 = vmatpush1.bf16.msra.mxu0 %v7459_v56  ;;  %v7573_v56 = vld [vmem:[%s11064_s1 + $0x2d8] ss:$24 sps:$4 sm:$0xff]  }
 0x123   : > { %2812 = vmatprep.subr.bf16.mxu0 %v7467_v57  ;;  %v7581_v57 = vld [vmem:[%s11064_s1 + $0x14] ss:$24 sps:$4 sm:$0xff]  }
 0x126   : > { %2813 = vmatpush1.bf16.msra.mxu0 %v7465_v58  ;;  %v7702_v58 = vld [vmem:[%s11065_s2 + $0x1b0] ss:$24 sps:$4 sm:$0xff]  }
 0x127   : > { %2814 = vmatprep.subr.bf16.mxu0 %v7473_v59  ;;  %v7704_v59 = vld [vmem:[%s11065_s2 + $0x1b4] ss:$24 sps:$4 sm:$0xff]  }
 0x128   : > { %4939 = vmatprep.subr.bf16.mxu1 %v7704_v59  ;;  %v7653_v59 = vld [vmem:[%s11064_s1 + $0x464] ss:$24 sps:$4 sm:$0xff]  }
 0x129   : > { %4940 = vmatpush1.bf16.msra.mxu1 %v7702_v58  ;;  %v7645_v58 = vld [vmem:[%s11064_s1 + $0x430] ss:$24 sps:$4 sm:$0xff]  }
 0x12a   : > { %2815 = vmatpush1.bf16.msra.mxu0 %v7471_v60  ;;  %v7579_v60 = vld [vmem:[%s11064_s1 + $0x10] ss:$24 sps:$4 sm:$0xff]  }
 0x12b   : > { %2816 = vmatprep.subr.bf16.mxu0 %v7479_v61  ;;  %v7584_v61 = vld [vmem:[%s11064_s1 + $0x44] ss:$24 sps:$4 sm:$0xff]  }
 0x12e   : > { %2817 = vmatpush1.bf16.msra.mxu0 %v7477_v62  ;;  %v7708_v62 = vld [vmem:[%s11065_s2 + $0x1e0] ss:$24 sps:$4 sm:$0xff]  }
 0x12f   : > { %2827 = vmatprep.subr.bf16.mxu0 %v7485_v63  ;;  %v7710_v63 = vld [vmem:[%s11065_s2 + $0x1e4] ss:$24 sps:$4 sm:$0xff]  }
 0x130   : > { %4941 = vmatprep.subr.bf16.mxu1 %v7710_v63  ;;  %v7665_v63 = vld [vmem:[%s11064_s1 + $0x4c4] ss:$24 sps:$4 sm:$0xff]  }
 0x131   : > { %2819 = vmatmul.mubr.bf16.vlgmr.msra.gmra.mrb[0].mxu0 %v9263_v55  ;;  %4942 = vmatpush1.bf16.msra.mxu1 %v7708_v62  ;;  %v7657_v62 = vld [vmem:[%s11064_s1 + $0x490] ss:$24 sps:$4 sm:$0xff]  }
 0x132   : > { %2828 = vmatpush1.bf16.msra.mxu0 %v7483_v0  ;;  %2859 = vmatprep.mubr.bf16.mxu0 %v8618_v14  ;;  %v7582_v0 = vld [vmem:[%s11064_s1 + $0x40] ss:$24 sps:$4 sm:$0xff]  }
 0x133   : > { %2829 = vmatprep.subr.bf16.mxu0 %v7491_v1  ;;  %v7587_v1 = vld [vmem:[%s11064_s1 + $0x74] ss:$24 sps:$4 sm:$0xff]  }
 0x136   : > { %2830 = vmatpush1.bf16.msra.mxu0 %v7489_v2  ;;  %v7714_v2 = vld [vmem:[%s11065_s2 + $0x210] ss:$24 sps:$4 sm:$0xff]  }
 0x137   : > { %2831 = vmatprep.subr.bf16.mxu0 %v7497_v3  ;;  %v7716_v3 = vld [vmem:[%s11065_s2 + $0x214] ss:$24 sps:$4 sm:$0xff]  }
 0x138   : > { %4943 = vmatprep.subr.bf16.mxu1 %v7716_v3  ;;  %v7677_v3 = vld [vmem:[%s11064_s1 + $0x524] ss:$24 sps:$4 sm:$0xff]  }
 0x139   : > { %4944 = vmatpush1.bf16.msra.mxu1 %v7714_v2  ;;  %v7669_v2 = vld [vmem:[%s11064_s1 + $0x4f0] ss:$24 sps:$4 sm:$0xff]  }
 0x13a   : > { %2832 = vmatpush1.bf16.msra.mxu0 %v7495_v4  ;;  %v7585_v4 = vld [vmem:[%s11064_s1 + $0x70] ss:$24 sps:$4 sm:$0xff]  }
 0x13b   : > { %2833 = vmatprep.subr.bf16.mxu0 %v7503_v5  ;;  %v7720_v5 = vld [vmem:[%s11065_s2 + $0x240] ss:$24 sps:$4 sm:$0xff]  }
 0x13e   : > { %2834 = vmatpush1.bf16.msra.mxu0 %v7501_v6  ;;  %v7722_v6 = vld [vmem:[%s11065_s2 + $0x244] ss:$24 sps:$4 sm:$0xff]  }
 0x13f   : > { %2835 = vmatprep.subr.bf16.mxu0 %v7509_v7  ;;  %4945 = vmatprep.subr.bf16.mxu1 %v7722_v6  ;;  %v7588_v7 = vld [vmem:[%s11064_s1 + $0xa0] ss:$24 sps:$4 sm:$0xff]   ;;  %v7689_v6 = vld [vmem:[%s11064_s1 + $0x584] ss:$24 sps:$4 sm:$0xff]  }
 0x140   : > { %4946 = vmatpush1.bf16.msra.mxu1 %v7720_v5  ;;  %v7681_v5 = vld [vmem:[%s11064_s1 + $0x550] ss:$24 sps:$4 sm:$0xff]  }
 0x142   : > { %2836 = vmatpush1.bf16.msra.mxu0 %v7507_v8  ;;  %v7593_v8 = vld [vmem:[%s11064_s1 + $0xd4] ss:$24 sps:$4 sm:$0xff]  }
 0x143   : > { %2837 = vmatprep.subr.bf16.mxu0 %v7515_v9  ;;  %v7726_v9 = vld [vmem:[%s11065_s2 + $0x270] ss:$24 sps:$4 sm:$0xff]  }
 0x146   : > { %2838 = vmatpush1.bf16.msra.mxu0 %v7513_v10  ;;  %v7728_v10 = vld [vmem:[%s11065_s2 + $0x274] ss:$24 sps:$4 sm:$0xff]  }
 0x147   : > { %2839 = vmatprep.subr.bf16.mxu0 %v7521_v11  ;;  %4947 = vmatprep.subr.bf16.mxu1 %v7728_v10  ;;  %v7591_v11 = vld [vmem:[%s11064_s1 + $0xd0] ss:$24 sps:$4 sm:$0xff]   ;;  %v7701_v10 = vld [vmem:[%s11064_s1 + $0x5e4] ss:$24 sps:$4 sm:$0xff]  }
 0x148   : > { %4948 = vmatpush1.bf16.msra.mxu1 %v7726_v9  ;;  %v7693_v9 = vld [vmem:[%s11064_s1 + $0x5b0] ss:$24 sps:$4 sm:$0xff]  }
 0x149   : > { %4949 = vmatprep.subr.bf16.mxu1 %v7734_v15  ;;  %v7713_v15 = vld [vmem:[%s11064_s1 + $0x644] ss:$24 sps:$4 sm:$0xff]  }
 0x14a   : > { %2840 = vmatpush1.bf16.msra.mxu0 %v7519_v12  ;;  %v7596_v12 = vld [vmem:[%s11064_s1 + $0x104] ss:$24 sps:$4 sm:$0xff]  }
 0x14b   : > { %2841 = vmatprep.subr.bf16.mxu0 %v7527_v13  ;;  %v7732_v13 = vld [vmem:[%s11065_s2 + $0x2a0] ss:$24 sps:$4 sm:$0xff]  }
 0x14c   : > { %4950 = vmatpush1.bf16.msra.mxu1 %v7732_v13  ;;  %v7705_v13 = vld [vmem:[%s11064_s1 + $0x610] ss:$24 sps:$4 sm:$0xff]  }
 0x14e   : > { %2842 = vmatpush1.bf16.msra.mxu0 %v7525_v17  ;;  %v7599_v17 = vld [vmem:[%s11064_s1 + $0x134] ss:$24 sps:$4 sm:$0xff]  }
 0x14f   : > { %2843 = vmatprep.subr.bf16.mxu0 %v7533_v18  ;;  %v7740_v18 = vld [vmem:[%s11065_s2 + $0x2d4] ss:$24 sps:$4 sm:$0xff]  }
 0x150   : > { %4951 = vmatprep.subr.bf16.mxu1 %v7740_v18 }
 0x151   : > { %4952 = vmatpush1.bf16.msra.mxu1 %v7738_v20 }
 0x152   : > { %2844 = vmatpush1.bf16.msra.mxu0 %v7531_v21  ;;  %v7602_v21 = vld [vmem:[%s11064_s1 + $0x164] ss:$24 sps:$4 sm:$0xff]  }
 0x153   : > { %2845 = vmatprep.subr.bf16.mxu0 %v7539_v22  ;;  %v7746_v22 = vld [vmem:[%s11065_s2 + $0x304] ss:$24 sps:$4 sm:$0xff]  }
 0x154   : > { %4962 = vmatprep.subr.bf16.mxu1 %v7746_v22  ;;  %v7725_v22 = vld [vmem:[%s11064_s1 + $0x6a4] ss:$24 sps:$4 sm:$0xff]  }
 0x156   : > { %2846 = vmatpush1.bf16.msra.mxu0 %v7537_v25  ;;  %v7603_v25 = vld [vmem:[%s11064_s1 + $0x190] ss:$24 sps:$4 sm:$0xff]  }
 0x157   : > { %2847 = vmatprep.subr.bf16.mxu0 %v7545_v26  ;;  %v7608_v26 = vld [vmem:[%s11064_s1 + $0x1c4] ss:$24 sps:$4 sm:$0xff]  }
 0x15a   : > { %2848 = vmatpush1.bf16.msra.mxu0 %v7543_v30  ;;  %v7609_v30 = vld [vmem:[%s11064_s1 + $0x1f0] ss:$24 sps:$4 sm:$0xff]  }
 0x15b   : > { %2849 = vmatprep.subr.bf16.mxu0 %v7551_v31  ;;  %v7614_v31 = vld [vmem:[%s11064_s1 + $0x224] ss:$24 sps:$4 sm:$0xff]  }
 0x15e   : > { %2850 = vmatpush1.bf16.msra.mxu0 %v7549_v34  ;;  %v7615_v34 = vld [vmem:[%s11064_s1 + $0x250] ss:$24 sps:$4 sm:$0xff]  }
 0x15f   : > { %2851 = vmatprep.subr.bf16.mxu0 %v7557_v35  ;;  %v7620_v35 = vld [vmem:[%s11064_s1 + $0x284] ss:$24 sps:$4 sm:$0xff]  }
 0x162   : > { %2852 = vmatpush1.bf16.msra.mxu0 %v7555_v39  ;;  %v7621_v39 = vld [vmem:[%s11064_s1 + $0x2b0] ss:$24 sps:$4 sm:$0xff]  }
 0x163   : > { %2853 = vmatprep.subr.bf16.mxu0 %v7563_v41  ;;  %v7626_v41 = vld [vmem:[%s11064_s1 + $0x2e4] ss:$24 sps:$4 sm:$0xff]  }
 0x166   : > { %2854 = vmatpush1.bf16.msra.mxu0 %v7561_v44  ;;  %v7627_v44 = vld [vmem:[%s11064_s1 + $0x310] ss:$24 sps:$4 sm:$0xff]  }
 0x167   : > { %2855 = vmatprep.subr.bf16.mxu0 %v7569_v45  ;;  %v7632_v45 = vld [vmem:[%s11064_s1 + $0x344] ss:$24 sps:$4 sm:$0xff]  }
 0x16a   : > { %2856 = vmatpush1.bf16.msra.mxu0 %v7567_v50  ;;  %v7633_v50 = vld [vmem:[%s11064_s1 + $0x370] ss:$24 sps:$4 sm:$0xff]  }
 0x16b   : > { %2857 = vmatprep.subr.bf16.mxu0 %v7575_v52  ;;  %v7636_v52 = vld [vmem:[%s11064_s1 + $0x3a0] ss:$24 sps:$4 sm:$0xff]  }
 0x16e   : > { %2858 = vmatpush1.bf16.msra.mxu0 %v7573_v56  ;;  %v7642_v56 = vld [vmem:[%s11064_s1 + $0x400] ss:$24 sps:$4 sm:$0xff]  }
 0x16f   : > { %2991 = vmatprep.subr.bf16.mxu0 %v7581_v57  ;;  %v7647_v57 = vld [vmem:[%s11064_s1 + $0x434] ss:$24 sps:$4 sm:$0xff]  }
 0x171   : > { %2860 = vmatmul.mubr.bf16.vlgmr.msra.gmra.mrb[4].mxu0 %v8719_v49 }
 0x172   : > { %2992 = vmatpush1.bf16.msra.mxu0 %v7579_v60  ;;  %3023 = vmatprep.mubr.bf16.mxu0 %v8618_v14  ;;  %v7590_v14 = vld [vmem:[%s11064_s1 + $0xa4] ss:$24 sps:$4 sm:$0xff]   ;;  %v7651_v60 = vld [vmem:[%s11064_s1 + $0x460] ss:$24 sps:$4 sm:$0xff]  }
 0x173   : > { %2993 = vmatprep.subr.bf16.mxu0 %v7584_v61  ;;  %v7659_v61 = vld [vmem:[%s11064_s1 + $0x494] ss:$24 sps:$4 sm:$0xff]  }
 0x176   : > { %2994 = vmatpush1.bf16.msra.mxu0 %v7582_v0  ;;  %v7663_v0 = vld [vmem:[%s11064_s1 + $0x4c0] ss:$24 sps:$4 sm:$0xff]  }
 0x177   : > { %2995 = vmatprep.subr.bf16.mxu0 %v7587_v1  ;;  %v7671_v1 = vld [vmem:[%s11064_s1 + $0x4f4] ss:$24 sps:$4 sm:$0xff]  }
 0x17a   : > { %2996 = vmatpush1.bf16.msra.mxu0 %v7585_v4  ;;  %v7675_v4 = vld [vmem:[%s11064_s1 + $0x520] ss:$24 sps:$4 sm:$0xff]  }
 0x17b   : > { %2997 = vmatprep.subr.bf16.mxu0 %v7590_v14  ;;  %v7683_v14 = vld [vmem:[%s11064_s1 + $0x554] ss:$24 sps:$4 sm:$0xff]  }
 0x17e   : > { %2998 = vmatpush1.bf16.msra.mxu0 %v7588_v7  ;;  %v7687_v7 = vld [vmem:[%s11064_s1 + $0x580] ss:$24 sps:$4 sm:$0xff]  }
 0x17f   : > { %2999 = vmatprep.subr.bf16.mxu0 %v7593_v8  ;;  %v7695_v8 = vld [vmem:[%s11064_s1 + $0x5b4] ss:$24 sps:$4 sm:$0xff]  }
 0x182   : > { %3000 = vmatpush1.bf16.msra.mxu0 %v7591_v11  ;;  %v7699_v11 = vld [vmem:[%s11064_s1 + $0x5e0] ss:$24 sps:$4 sm:$0xff]  }
 0x183   : > { %3001 = vmatprep.subr.bf16.mxu0 %v7596_v12  ;;  %v7707_v12 = vld [vmem:[%s11064_s1 + $0x614] ss:$24 sps:$4 sm:$0xff]  }
 0x186   : > { %3002 = vmatpush1.bf16.msra.mxu0 %v7594_v16 }
 0x187   : > { %3003 = vmatprep.subr.bf16.mxu0 %v7599_v17  ;;  %v7711_v17 = vld [vmem:[%s11064_s1 + $0x640] ss:$24 sps:$4 sm:$0xff]  }
 0x18a   : > { %3004 = vmatpush1.bf16.msra.mxu0 %v7597_v19  ;;  %v7719_v19 = vld [vmem:[%s11064_s1 + $0x674] ss:$24 sps:$4 sm:$0xff]  }
 0x18b   : > { %3005 = vmatprep.subr.bf16.mxu0 %v7602_v21 }
 0x18e   : > { %3006 = vmatpush1.bf16.msra.mxu0 %v7600_v23  ;;  %v7731_v23 = vld [vmem:[%s11064_s1 + $0x6d4] ss:$24 sps:$4 sm:$0xff]  }
 0x18f   : > { %3007 = vmatprep.subr.bf16.mxu0 %v7605_v24  ;;  %v7729_v24 = vld [vmem:[%s11064_s1 + $0x6d0] ss:$24 sps:$4 sm:$0xff]  }
 0x192   : > { %3008 = vmatpush1.bf16.msra.mxu0 %v7603_v25  ;;  %v7737_v25 = vld [vmem:[%s11064_s1 + $0x704] ss:$24 sps:$4 sm:$0xff]  }
 0x193   : > { %3009 = vmatprep.subr.bf16.mxu0 %v7608_v26  ;;  %v7735_v26 = vld [vmem:[%s11064_s1 + $0x700] ss:$24 sps:$4 sm:$0xff]  }
 0x196   : > { %3010 = vmatpush1.bf16.msra.mxu0 %v7606_v27  ;;  %v7743_v27 = vld [vmem:[%s11064_s1 + $0x734] ss:$24 sps:$4 sm:$0xff]  }
 0x197   : > { %3011 = vmatprep.subr.bf16.mxu0 %v7611_v29 }
 0x19a   : > { %3012 = vmatpush1.bf16.msra.mxu0 %v7609_v30 }
 0x19b   : > { %3013 = vmatprep.subr.bf16.mxu0 %v7614_v31 }
 0x19e   : > { %3014 = vmatpush1.bf16.msra.mxu0 %v7612_v32 }
 0x19f   : > { %3015 = vmatprep.subr.bf16.mxu0 %v7617_v33  ;;  %v7741_v33 = vld [vmem:[%s11064_s1 + $0x730] ss:$24 sps:$4 sm:$0xff]  }
 0x1a2   : > { %3016 = vmatpush1.bf16.msra.mxu0 %v7615_v34  ;;  %v7744_v34 = vld [vmem:[%s11065_s2 + $0x300] ss:$24 sps:$4 sm:$0xff]  }
 0x1a3   : > { %3017 = vmatprep.subr.bf16.mxu0 %v7620_v35 }
 0x1a6   : > { %3018 = vmatpush1.bf16.msra.mxu0 %v7618_v36 }
 0x1a7   : > { %3019 = vmatprep.subr.bf16.mxu0 %v7623_v38  ;;  %v7749_v38 = vld [vmem:[%s11064_s1 + $0x764] ss:$24 sps:$4 sm:$0xff]  }
 0x1aa   : > { %3020 = vmatpush1.bf16.msra.mxu0 %v7621_v39  ;;  %v7752_v39 = vld [vmem:[%s11065_s2 + $0x334] ss:$24 sps:$4 sm:$0xff]  }
 0x1ab   : > { %3021 = vmatprep.subr.bf16.mxu0 %v7626_v41  ;;  %v7747_v41 = vld [vmem:[%s11064_s1 + $0x760] ss:$24 sps:$4 sm:$0xff]  }
 0x1ae   : > { %3022 = vmatpush1.bf16.msra.mxu0 %v7624_v42  ;;  %v7750_v42 = vld [vmem:[%s11065_s2 + $0x330] ss:$24 sps:$4 sm:$0xff]  }
 0x1af   : > { %3032 = vmatprep.subr.bf16.mxu0 %v7629_v43  ;;  %v7755_v43 = vld [vmem:[%s11064_s1 + $0x794] ss:$24 sps:$4 sm:$0xff]  }
 0x1b1   : > { %3024 = vmatmul.mubr.bf16.vlgmr.msra.gmra.mrb[8].mxu0 %v8719_v49  ;;  %v7638_v49 = vld [vmem:[%s11064_s1 + $0x3a4] ss:$24 sps:$4 sm:$0xff]  }
 0x1b2   : > { %3033 = vmatpush1.bf16.msra.mxu0 %v7627_v44  ;;  %3064 = vmatprep.mubr.bf16.mxu0 %v8658_v28  ;;  %v7641_v28 = vld [vmem:[%s11064_s1 + $0x3d4] ss:$24 sps:$4 sm:$0xff]   ;;  %v7758_v44 = vld [vmem:[%s11065_s2 + $0x364] ss:$24 sps:$4 sm:$0xff]  }
 0x1b3   : > { %3034 = vmatprep.subr.bf16.mxu0 %v7632_v45  ;;  %v7753_v45 = vld [vmem:[%s11064_s1 + $0x790] ss:$24 sps:$4 sm:$0xff]  }
 0x1b6   : > { %3035 = vmatpush1.bf16.msra.mxu0 %v7630_v46  ;;  %v7756_v46 = vld [vmem:[%s11065_s2 + $0x360] ss:$24 sps:$4 sm:$0xff]  }
 0x1b7   : > { %3036 = vmatprep.subr.bf16.mxu0 %v7635_v48  ;;  %v7761_v48 = vld [vmem:[%s11064_s1 + $0x7c4] ss:$24 sps:$4 sm:$0xff]  }
 0x1ba   : > { %3037 = vmatpush1.bf16.msra.mxu0 %v7633_v50  ;;  %v7764_v50 = vld [vmem:[%s11065_s2 + $0x394] ss:$24 sps:$4 sm:$0xff]  }
 0x1bb   : > { %3038 = vmatprep.subr.bf16.mxu0 %v7638_v49  ;;  %v7759_v49 = vld [vmem:[%s11064_s1 + $0x7c0] ss:$24 sps:$4 sm:$0xff]  }
 0x1be   : > { %3039 = vmatpush1.bf16.msra.mxu0 %v7636_v52  ;;  %v7762_v52 = vld [vmem:[%s11065_s2 + $0x390] ss:$24 sps:$4 sm:$0xff]  }
 0x1bf   : > { %3040 = vmatprep.subr.bf16.mxu0 %v7641_v28  ;;  %v7767_v28 = vld [vmem:[%s11064_s1 + $0x7f4] ss:$24 sps:$4 sm:$0xff]  }
 0x1c2   : > { %3041 = vmatpush1.bf16.msra.mxu0 %v7639_v53  ;;  %v7770_v53 = vld [vmem:[%s11065_s2 + $0x3c4] ss:$24 sps:$4 sm:$0xff]  }
 0x1c3   : > { %3042 = vmatprep.subr.bf16.mxu0 %v7644_v54  ;;  %v7765_v54 = vld [vmem:[%s11064_s1 + $0x7f0] ss:$24 sps:$4 sm:$0xff]  }
 0x1c6   : > { %3043 = vmatpush1.bf16.msra.mxu0 %v7642_v56  ;;  %v7768_v56 = vld [vmem:[%s11065_s2 + $0x3c0] ss:$24 sps:$4 sm:$0xff]  }
 0x1c7   : > { %3044 = vmatprep.subr.bf16.mxu0 %v7647_v57  ;;  %v7773_v57 = vld [vmem:[%s11064_s1 + $0x824] ss:$24 sps:$4 sm:$0xff]  }
 0x1ca   : > { %3045 = vmatpush1.bf16.msra.mxu0 %v7645_v58  ;;  %v7776_v58 = vld [vmem:[%s11065_s2 + $0x3f4] ss:$24 sps:$4 sm:$0xff]  }
 0x1cb   : > { %3046 = vmatprep.subr.bf16.mxu0 %v7653_v59  ;;  %v7771_v59 = vld [vmem:[%s11064_s1 + $0x820] ss:$24 sps:$4 sm:$0xff]  }
 0x1ce   : > { %3047 = vmatpush1.bf16.msra.mxu0 %v7651_v60  ;;  %v9690_v16 = vpop.f32.mrb[0].mxu1  ;;  %v7774_v60 = vld [vmem:[%s11065_s2 + $0x3f0] ss:$24 sps:$4 sm:$0xff]  }
 0x1cf   : > { %3048 = vmatprep.subr.bf16.mxu0 %v7659_v61  ;;  %v9696_v18 = vpop.f32.mrb[1].mxu1  ;;  %v7779_v61 = vld [vmem:[%s11064_s1 + $0x854] ss:$24 sps:$4 sm:$0xff]  }
 0x1d0   : > { %v2988_v20 = vpop.f32.mrb[2].mxu1 }
 0x1d1   : > { %v2989_v21 = vpop.f32.mrb[3].mxu1  ;;  %v7812_v20 = vld [vmem:[%s11065_s2 + $0x514] ss:$24 sps:$4 sm:$0xff]  }
 0x1d2   : > { %3049 = vmatpush1.bf16.msra.mxu0 %v7657_v62  ;;  %v7782_v62 = vld [vmem:[%s11065_s2 + $0x424] ss:$24 sps:$4 sm:$0xff]   ;;  %v7807_v21 = vld [vmem:[%s11064_s1 + $0x940] ss:$24 sps:$4 sm:$0xff]  }
 0x1d3   : > { %3050 = vmatprep.subr.bf16.mxu0 %v7665_v63  ;;  %v7777_v63 = vld [vmem:[%s11064_s1 + $0x850] ss:$24 sps:$4 sm:$0xff]  }
 0x1d6   : > { %3051 = vmatpush1.bf16.msra.mxu0 %v7663_v0  ;;  %v7780_v0 = vld [vmem:[%s11065_s2 + $0x420] ss:$24 sps:$4 sm:$0xff]  }
 0x1d7   : > { %3052 = vmatprep.subr.bf16.mxu0 %v7671_v1  ;;  %v7785_v1 = vld [vmem:[%s11064_s1 + $0x884] ss:$24 sps:$4 sm:$0xff]  }
 0x1da   : > { %3053 = vmatpush1.bf16.msra.mxu0 %v7669_v2  ;;  %v7788_v2 = vld [vmem:[%s11065_s2 + $0x454] ss:$24 sps:$4 sm:$0xff]  }
 0x1db   : > { %3054 = vmatprep.subr.bf16.mxu0 %v7677_v3  ;;  %v7783_v3 = vld [vmem:[%s11064_s1 + $0x880] ss:$24 sps:$4 sm:$0xff]  }
 0x1de   : > { %3055 = vmatpush1.bf16.msra.mxu0 %v7675_v4  ;;  %v7786_v4 = vld [vmem:[%s11065_s2 + $0x450] ss:$24 sps:$4 sm:$0xff]  }
 0x1df   : > { %3056 = vmatprep.subr.bf16.mxu0 %v7683_v14  ;;  %v7791_v14 = vld [vmem:[%s11064_s1 + $0x8b4] ss:$24 sps:$4 sm:$0xff]  }
 0x1e2   : > { %3057 = vmatpush1.bf16.msra.mxu0 %v7681_v5  ;;  %v7794_v5 = vld [vmem:[%s11065_s2 + $0x484] ss:$24 sps:$4 sm:$0xff]  }
 0x1e3   : > { %3058 = vmatprep.subr.bf16.mxu0 %v7689_v6  ;;  %v7789_v6 = vld [vmem:[%s11064_s1 + $0x8b0] ss:$24 sps:$4 sm:$0xff]  }
 0x1e6   : > { %3059 = vmatpush1.bf16.msra.mxu0 %v7687_v7  ;;  %v7792_v7 = vld [vmem:[%s11065_s2 + $0x480] ss:$24 sps:$4 sm:$0xff]  }
 0x1e7   : > { %3060 = vmatprep.subr.bf16.mxu0 %v7695_v8  ;;  %v7797_v8 = vld [vmem:[%s11064_s1 + $0x8e4] ss:$24 sps:$4 sm:$0xff]  }
 0x1ea   : > { %3061 = vmatpush1.bf16.msra.mxu0 %v7693_v9  ;;  %v7800_v9 = vld [vmem:[%s11065_s2 + $0x4b4] ss:$24 sps:$4 sm:$0xff]  }
 0x1eb   : > { %3062 = vmatprep.subr.bf16.mxu0 %v7701_v10  ;;  %v7795_v10 = vld [vmem:[%s11064_s1 + $0x8e0] ss:$24 sps:$4 sm:$0xff]  }
 0x1ee   : > { %3063 = vmatpush1.bf16.msra.mxu0 %v7699_v11  ;;  %v7798_v11 = vld [vmem:[%s11065_s2 + $0x4b0] ss:$24 sps:$4 sm:$0xff]  }
 0x1ef   : > { %3073 = vmatprep.subr.bf16.mxu0 %v7707_v12  ;;  %v7803_v12 = vld [vmem:[%s11064_s1 + $0x914] ss:$24 sps:$4 sm:$0xff]  }
 0x1f1   : > { %3065 = vmatmul.mubr.bf16.vlgmr.msra.gmra.mrb[8].mxu0 %v8866_v37  ;;  %v7717_v37 = vld [vmem:[%s11064_s1 + $0x670] ss:$24 sps:$4 sm:$0xff]  }
 0x1f2   : > { %3074 = vmatpush1.bf16.msra.mxu0 %v7705_v13  ;;  %3105 = vmatprep.mubr.bf16.mxu0 %v8874_v40  ;;  %v7723_v40 = vld [vmem:[%s11064_s1 + $0x6a0] ss:$24 sps:$4 sm:$0xff]   ;;  %v7806_v13 = vld [vmem:[%s11065_s2 + $0x4e4] ss:$24 sps:$4 sm:$0xff]  }
 0x1f3   : > { %3075 = vmatprep.subr.bf16.mxu0 %v7713_v15  ;;  %v7801_v15 = vld [vmem:[%s11064_s1 + $0x910] ss:$24 sps:$4 sm:$0xff]  }
 0x1f6   : > { %3076 = vmatpush1.bf16.msra.mxu0 %v7711_v17  ;;  %v7804_v17 = vld [vmem:[%s11065_s2 + $0x4e0] ss:$24 sps:$4 sm:$0xff]  }
 0x1f7   : > { %3077 = vmatprep.subr.bf16.mxu0 %v7719_v19  ;;  %v7809_v19 = vld [vmem:[%s11064_s1 + $0x944] ss:$24 sps:$4 sm:$0xff]  }
 0x1fa   : > { %3078 = vmatpush1.bf16.msra.mxu0 %v7717_v37  ;;  %v7810_v37 = vld [vmem:[%s11065_s2 + $0x510] ss:$24 sps:$4 sm:$0xff]  }
 0x1fb   : > { %3079 = vmatprep.subr.bf16.mxu0 %v7725_v22  ;;  %v7815_v22 = vld [vmem:[%s11064_s1 + $0x974] ss:$24 sps:$4 sm:$0xff]  }
 0x1fe   : > { %3080 = vmatpush1.bf16.msra.mxu0 %v7723_v40  ;;  %v7813_v40 = vld [vmem:[%s11064_s1 + $0x970] ss:$24 sps:$4 sm:$0xff]  }
 0x1ff   : > { %3081 = vmatprep.subr.bf16.mxu0 %v7731_v23  ;;  %v7816_v23 = vld [vmem:[%s11065_s2 + $0x540] ss:$24 sps:$4 sm:$0xff]  }
 0x202   : > { %3082 = vmatpush1.bf16.msra.mxu0 %v7729_v24  ;;  %v7821_v24 = vld [vmem:[%s11064_s1 + $0x9a4] ss:$24 sps:$4 sm:$0xff]  }
 0x203   : > { %3083 = vmatprep.subr.bf16.mxu0 %v7737_v25  ;;  %v7819_v25 = vld [vmem:[%s11064_s1 + $0x9a0] ss:$24 sps:$4 sm:$0xff]  }
 0x204   : > { %v2820_v29 = vpop.f32.mrb[0].mxu0 }
 0x205   : > { %v2822_v30 = vpop.f32.mrb[1].mxu0  ;;  %v9733_v35 = vpack.c.bf16 %v2820_v29, %v2820_v29  ;;  %v7830_v29 = vld [vmem:[%s11065_s2 + $0x5a4] ss:$24 sps:$4 sm:$0xff]  }
 0x206   : > { %v9725_v31 = vpack.c.bf16 %v2822_v30, %v2822_v30  ;;  %v2824_v32 = vpop.f32.mrb[2].mxu0  ;;  %3084 = vmatpush1.bf16.msra.mxu0 %v7735_v26  ;;  %v7822_v26 = vld [vmem:[%s11065_s2 + $0x570] ss:$24 sps:$4 sm:$0xff]  }
 0x207   : > { %v2825_v36 = vpop.f32.mrb[3].mxu0  ;;  %3085 = vmatprep.subr.bf16.mxu0 %v7743_v27  ;;  %v7827_v27 = vld [vmem:[%s11064_s1 + $0x9d4] ss:$24 sps:$4 sm:$0xff]   ;;  %v7825_v30 = vld [vmem:[%s11064_s1 + $0x9d0] ss:$24 sps:$4 sm:$0xff]  }
 0x208   : > { %4953 = vmatprep.mubr.bf16.mxu1 %v9725_v31  ;;  %v7828_v32 = vld [vmem:[%s11065_s2 + $0x5a0] ss:$24 sps:$4 sm:$0xff]  }
 0x209   : > { %4954 = vmatmul.mubr.bf16.vlgmr.msra.gmra.mrb[4].mxu1 %v9733_v35  ;;  %v7831_v36 = vld [vmem:[%s11064_s1 + $0xa00] ss:$24 sps:$4 sm:$0xff]  }
 0x20a   : > { %3086 = vmatpush1.bf16.msra.mxu0 %v7741_v33  ;;  %4963 = vmatpush1.bf16.msra.mxu1 %v7744_v34  ;;  %v7833_v33 = vld [vmem:[%s11064_s1 + $0xa04] ss:$24 sps:$4 sm:$0xff]   ;;  %v7836_v34 = vld [vmem:[%s11065_s2 + $0x5d4] ss:$24 sps:$4 sm:$0xff]  }
 0x20b   : > { %3087 = vmatprep.subr.bf16.mxu0 %v7749_v38  ;;  %4964 = vmatprep.subr.bf16.mxu1 %v7752_v39  ;;  %v7834_v38 = vld [vmem:[%s11065_s2 + $0x5d0] ss:$24 sps:$4 sm:$0xff]   ;;  %v7839_v39 = vld [vmem:[%s11064_s1 + $0xa34] ss:$24 sps:$4 sm:$0xff]  }
 0x20e   : > { %3088 = vmatpush1.bf16.msra.mxu0 %v7747_v41  ;;  %4965 = vmatpush1.bf16.msra.mxu1 %v7750_v42 }
 0x20f   : > { %3089 = vmatprep.subr.bf16.mxu0 %v7755_v43  ;;  %4966 = vmatprep.subr.bf16.mxu1 %v7758_v44 }
 0x212   : > { %3090 = vmatpush1.bf16.msra.mxu0 %v7753_v45  ;;  %4967 = vmatpush1.bf16.msra.mxu1 %v7756_v46  ;;  %v7837_v46 = vld [vmem:[%s11064_s1 + $0xa30] ss:$24 sps:$4 sm:$0xff]  }
 0x213   : > { %3091 = vmatprep.subr.bf16.mxu0 %v7761_v48  ;;  %4968 = vmatprep.subr.bf16.mxu1 %v7764_v50 }
 0x216   : > { %3092 = vmatpush1.bf16.msra.mxu0 %v7759_v49  ;;  %4969 = vmatpush1.bf16.msra.mxu1 %v7762_v52  ;;  %v7842_v49 = vld [vmem:[%s11064_s1 + $0xa64] ss:$24 sps:$4 sm:$0xff]  }
 0x217   : > { %3093 = vmatprep.subr.bf16.mxu0 %v7767_v28  ;;  %4970 = vmatprep.subr.bf16.mxu1 %v7770_v53  ;;  %v7843_v28 = vld [vmem:[%s11064_s1 + $0xa90] ss:$24 sps:$4 sm:$0xff]   ;;  %v7848_v53 = vld [vmem:[%s11064_s1 + $0xac4] ss:$24 sps:$4 sm:$0xff]  }
 0x21a   : > { %3094 = vmatpush1.bf16.msra.mxu0 %v7765_v54  ;;  %4971 = vmatpush1.bf16.msra.mxu1 %v7768_v56  ;;  %v7846_v54 = vld [vmem:[%s11064_s1 + $0xac0] ss:$24 sps:$4 sm:$0xff]   ;;  %v7851_v56 = vld [vmem:[%s11064_s1 + $0xaf4] ss:$24 sps:$4 sm:$0xff]  }
 0x21b   : > { %3095 = vmatprep.subr.bf16.mxu0 %v7773_v57  ;;  %4972 = vmatprep.subr.bf16.mxu1 %v7776_v58  ;;  %v7849_v57 = vld [vmem:[%s11064_s1 + $0xaf0] ss:$24 sps:$4 sm:$0xff]   ;;  %v7854_v58 = vld [vmem:[%s11064_s1 + $0xb24] ss:$24 sps:$4 sm:$0xff]  }
 0x21e   : > { %3096 = vmatpush1.bf16.msra.mxu0 %v7771_v59  ;;  %4973 = vmatpush1.bf16.msra.mxu1 %v7774_v60  ;;  %v7852_v59 = vld [vmem:[%s11064_s1 + $0xb20] ss:$24 sps:$4 sm:$0xff]   ;;  %v7857_v60 = vld [vmem:[%s11064_s1 + $0xb54] ss:$24 sps:$4 sm:$0xff]  }
 0x21f   : > { %3097 = vmatprep.subr.bf16.mxu0 %v7779_v61  ;;  %4974 = vmatprep.subr.bf16.mxu1 %v7782_v62  ;;  %v7855_v61 = vld [vmem:[%s11064_s1 + $0xb50] ss:$24 sps:$4 sm:$0xff]   ;;  %v7860_v62 = vld [vmem:[%s11064_s1 + $0xb84] ss:$24 sps:$4 sm:$0xff]  }
 0x222   : > { %3098 = vmatpush1.bf16.msra.mxu0 %v7777_v63  ;;  %4975 = vmatpush1.bf16.msra.mxu1 %v7780_v0  ;;  %v7858_v63 = vld [vmem:[%s11064_s1 + $0xb80] ss:$24 sps:$4 sm:$0xff]   ;;  %v7863_v0 = vld [vmem:[%s11064_s1 + $0xbb4] ss:$24 sps:$4 sm:$0xff]  }
 0x223   : > { %3099 = vmatprep.subr.bf16.mxu0 %v7785_v1  ;;  %4976 = vmatprep.subr.bf16.mxu1 %v7788_v2  ;;  %v7861_v1 = vld [vmem:[%s11064_s1 + $0xbb0] ss:$24 sps:$4 sm:$0xff]   ;;  %v7866_v2 = vld [vmem:[%s11064_s1 + $0xbe4] ss:$24 sps:$4 sm:$0xff]  }
 0x226   : > { %3100 = vmatpush1.bf16.msra.mxu0 %v7783_v3  ;;  %4977 = vmatpush1.bf16.msra.mxu1 %v7786_v4  ;;  %v7864_v3 = vld [vmem:[%s11064_s1 + $0xbe0] ss:$24 sps:$4 sm:$0xff]   ;;  %v7869_v4 = vld [vmem:[%s11065_s2 + $0x14] ss:$24 sps:$4 sm:$0xff]  }
 0x227   : > { %3101 = vmatprep.subr.bf16.mxu0 %v7791_v14  ;;  %4978 = vmatprep.subr.bf16.mxu1 %v7794_v5  ;;  %v7867_v14 = vld [vmem:[%s11065_s2 + $0x10] ss:$24 sps:$4 sm:$0xff]   ;;  %v7872_v5 = vld [vmem:[%s11065_s2 + $0x44] ss:$24 sps:$4 sm:$0xff]  }
 0x22a   : > { %3102 = vmatpush1.bf16.msra.mxu0 %v7789_v6  ;;  %4979 = vmatpush1.bf16.msra.mxu1 %v7792_v7  ;;  %v7963_v6 = vld [vmem:[%s11065_s2 + $0x600] ss:$24 sps:$4 sm:$0xff]   ;;  %v7965_v7 = vld [vmem:[%s11065_s2 + $0x604] ss:$24 sps:$4 sm:$0xff]  }
 0x22b   : > { %3103 = vmatprep.subr.bf16.mxu0 %v7797_v8  ;;  %4980 = vmatprep.subr.bf16.mxu1 %v7800_v9  ;;  %v7870_v8 = vld [vmem:[%s11065_s2 + $0x40] ss:$24 sps:$4 sm:$0xff]   ;;  %v7971_v9 = vld [vmem:[%s11065_s2 + $0x634] ss:$24 sps:$4 sm:$0xff]  }
 0x22e   : > { %3104 = vmatpush1.bf16.msra.mxu0 %v7795_v10  ;;  %4981 = vmatpush1.bf16.msra.mxu1 %v7798_v11  ;;  %v7969_v10 = vld [vmem:[%s11065_s2 + $0x630] ss:$24 sps:$4 sm:$0xff]  }
 0x22f   : > { %3114 = vmatprep.subr.bf16.mxu0 %v7803_v12  ;;  %4982 = vmatprep.subr.bf16.mxu1 %v7806_v13  ;;  %v7873_v11 = vld [vmem:[%s11065_s2 + $0x70] ss:$24 sps:$4 sm:$0xff]   ;;  %v7977_v12 = vld [vmem:[%s11065_s2 + $0x664] ss:$24 sps:$4 sm:$0xff]  }
 0x230   : > { %v7878_v13 = vld [vmem:[%s11065_s2 + $0xa4] ss:$24 sps:$4 sm:$0xff]  }
 0x231   : > { %3106 = vmatmul.mubr.bf16.vlgmr.msra.gmra.mrb[8].mxu0 %v9071_v47  ;;  %v7818_v47 = vld [vmem:[%s11065_s2 + $0x544] ss:$24 sps:$4 sm:$0xff]  }
 0x232   : > { %3115 = vmatpush1.bf16.msra.mxu0 %v7801_v15  ;;  %4983 = vmatpush1.bf16.msra.mxu1 %v7804_v17  ;;  %v7975_v15 = vld [vmem:[%s11065_s2 + $0x660] ss:$24 sps:$4 sm:$0xff]  }
 0x233   : > { %3116 = vmatprep.subr.bf16.mxu0 %v7809_v19  ;;  %4984 = vmatprep.subr.bf16.mxu1 %v7812_v20  ;;  %v7876_v17 = vld [vmem:[%s11065_s2 + $0xa0] ss:$24 sps:$4 sm:$0xff]   ;;  %v7983_v19 = vld [vmem:[%s11065_s2 + $0x694] ss:$24 sps:$4 sm:$0xff]  }
 0x234   : > { %3146 = vmatprep.mubr.bf16.mxu0 %v9079_v51  ;;  %v7824_v51 = vld [vmem:[%s11065_s2 + $0x574] ss:$24 sps:$4 sm:$0xff]  }
 0x235   : > { %v7881_v20 = vld [vmem:[%s11065_s2 + $0xd4] ss:$24 sps:$4 sm:$0xff]  }
 0x236   : > { %3117 = vmatpush1.bf16.msra.mxu0 %v7807_v21  ;;  %4985 = vmatpush1.bf16.msra.mxu1 %v7810_v37  ;;  %v7981_v21 = vld [vmem:[%s11065_s2 + $0x690] ss:$24 sps:$4 sm:$0xff]  }
 0x237   : > { %3118 = vmatprep.subr.bf16.mxu0 %v7815_v22  ;;  %4986 = vmatprep.subr.bf16.mxu1 %v7818_v47  ;;  %v7879_v37 = vld [vmem:[%s11065_s2 + $0xd0] ss:$24 sps:$4 sm:$0xff]   ;;  %v7989_v22 = vld [vmem:[%s11065_s2 + $0x6c4] ss:$24 sps:$4 sm:$0xff]  }
 0x238   : > { %v7884_v47 = vld [vmem:[%s11065_s2 + $0x104] ss:$24 sps:$4 sm:$0xff]  }
 0x23a   : > { %3119 = vmatpush1.bf16.msra.mxu0 %v7813_v40  ;;  %4987 = vmatpush1.bf16.msra.mxu1 %v7816_v23  ;;  %v7987_v40 = vld [vmem:[%s11065_s2 + $0x6c0] ss:$24 sps:$4 sm:$0xff]  }
 0x23b   : > { %3120 = vmatprep.subr.bf16.mxu0 %v7821_v24  ;;  %4988 = vmatprep.subr.bf16.mxu1 %v7824_v51  ;;  %v7882_v23 = vld [vmem:[%s11065_s2 + $0x100] ss:$24 sps:$4 sm:$0xff]   ;;  %v7995_v24 = vld [vmem:[%s11065_s2 + $0x6f4] ss:$24 sps:$4 sm:$0xff]  }
 0x23c   : > { %v7887_v51 = vld [vmem:[%s11065_s2 + $0x134] ss:$24 sps:$4 sm:$0xff]  }
 0x23e   : > { %3121 = vmatpush1.bf16.msra.mxu0 %v7819_v25  ;;  %4989 = vmatpush1.bf16.msra.mxu1 %v7822_v26  ;;  %v7993_v25 = vld [vmem:[%s11065_s2 + $0x6f0] ss:$24 sps:$4 sm:$0xff]  }
 0x23f   : > { %3122 = vmatprep.subr.bf16.mxu0 %v7827_v27  ;;  %4990 = vmatprep.subr.bf16.mxu1 %v7830_v29  ;;  %v7885_v26 = vld [vmem:[%s11065_s2 + $0x130] ss:$24 sps:$4 sm:$0xff]   ;;  %v8001_v27 = vld [vmem:[%s11065_s2 + $0x724] ss:$24 sps:$4 sm:$0xff]  }
 0x240   : > { %v7890_v29 = vld [vmem:[%s11065_s2 + $0x164] ss:$24 sps:$4 sm:$0xff]  }
 0x242   : > { %3123 = vmatpush1.bf16.msra.mxu0 %v7825_v30  ;;  %4991 = vmatpush1.bf16.msra.mxu1 %v7828_v32  ;;  %v7999_v30 = vld [vmem:[%s11065_s2 + $0x720] ss:$24 sps:$4 sm:$0xff]  }
 0x243   : > { %3124 = vmatprep.subr.bf16.mxu0 %v7833_v33  ;;  %4992 = vmatprep.subr.bf16.mxu1 %v7836_v34  ;;  %v7888_v32 = vld [vmem:[%s11065_s2 + $0x160] ss:$24 sps:$4 sm:$0xff]   ;;  %v8007_v33 = vld [vmem:[%s11065_s2 + $0x754] ss:$24 sps:$4 sm:$0xff]  }
 0x244   : > { %v2861_v41 = vpop.f32.mrb[4].mxu0  ;;  %v7893_v34 = vld [vmem:[%s11065_s2 + $0x194] ss:$24 sps:$4 sm:$0xff]  }
 0x245   : > { %v7082_v42 = vadd.f32 %v9690_v16, %v2861_v41  ;;  %v2863_v43 = vpop.f32.mrb[5].mxu0  ;;  %v7840_v16 = vld [vmem:[%s11064_s1 + $0xa60] ss:$24 sps:$4 sm:$0xff]   ;;  %v7896_v41 = vld [vmem:[%s11065_s2 + $0x1c4] ss:$24 sps:$4 sm:$0xff]  }
 0x246   : > { %v7083_v44 = vadd.f32 %v9696_v18, %v2863_v43  ;;  %v2865_v45 = vpop.f32.mrb[6].mxu0  ;;  %3125 = vmatpush1.bf16.msra.mxu0 %v7831_v36  ;;  %4993 = vmatpush1.bf16.msra.mxu1 %v7834_v38  ;;  %v7845_v18 = vld [vmem:[%s11064_s1 + $0xa94] ss:$24 sps:$4 sm:$0xff]   ;;  %v8005_v36 = vld [vmem:[%s11065_s2 + $0x750] ss:$24 sps:$4 sm:$0xff]  }
 0x247   : > { %v9927_v48 = vpack.c.bf16 %v7082_v42, %v7082_v42  ;;  %v2866_v50 = vpop.f32.mrb[7].mxu0  ;;  %3126 = vmatprep.subr.bf16.mxu0 %v7839_v39  ;;  %5003 = vmatprep.subr.bf16.mxu1 %v7965_v7  ;;  %v7891_v38 = vld [vmem:[%s11065_s2 + $0x190] ss:$24 sps:$4 sm:$0xff]   ;;  %v8013_v39 = vld [vmem:[%s11065_s2 + $0x784] ss:$24 sps:$4 sm:$0xff]  }
 0x248   : > { %v9932_v52 = vpack.c.bf16 %v7083_v44, %v7083_v44  ;;  %v8011_v42 = vld [vmem:[%s11065_s2 + $0x780] ss:$24 sps:$4 sm:$0xff]   ;;  %v8019_v44 = vld [vmem:[%s11065_s2 + $0x7b4] ss:$24 sps:$4 sm:$0xff]   ;;  %v7897_v50 = vld [vmem:[%s11065_s2 + $0x1f0] ss:$24 sps:$4 sm:$0xff]  }
 0x249   : > { %v7894_v43 = vld [vmem:[%s11065_s2 + $0x1c0] ss:$24 sps:$4 sm:$0xff]   ;;  %v7899_v45 = vld [vmem:[%s11065_s2 + $0x1f4] ss:$24 sps:$4 sm:$0xff]   ;;  %v7920_v7 = vld [vmem:[%s11065_s2 + $0x344] ss:$24 sps:$4 sm:$0xff]  }
 0x24a   : > { %3127 = vmatpush1.bf16.msra.mxu0 %v7837_v46  ;;  %4994 = vmatprep.mubr.bf16.mxu1 %v9932_v52  ;;  %v8017_v46 = vld [vmem:[%s11065_s2 + $0x7b0] ss:$24 sps:$4 sm:$0xff]  }
 0x24b   : > { %4995 = vmatmul.mubr.bf16.vlgmr.msra.gmra.mrb[4].mxu1 %v9927_v48  ;;  %3128 = vmatprep.subr.bf16.mxu0 %v7842_v49  ;;  %v8025_v49 = vld [vmem:[%s11065_s2 + $0x7e4] ss:$24 sps:$4 sm:$0xff]  }
 0x24c   : > { %5004 = vmatpush1.bf16.msra.mxu1 %v7963_v6  ;;  %v7915_v6 = vld [vmem:[%s11065_s2 + $0x310] ss:$24 sps:$4 sm:$0xff]  }
 0x24d   : > { %5005 = vmatprep.subr.bf16.mxu1 %v7971_v9  ;;  %v7923_v9 = vld [vmem:[%s11065_s2 + $0x374] ss:$24 sps:$4 sm:$0xff]  }
 0x24e   : > { %3129 = vmatpush1.bf16.msra.mxu0 %v7840_v16  ;;  %v7902_v16 = vld [vmem:[%s11065_s2 + $0x224] ss:$24 sps:$4 sm:$0xff]  }
 0x24f   : > { %3130 = vmatprep.subr.bf16.mxu0 %v7845_v18  ;;  %v8023_v18 = vld [vmem:[%s11065_s2 + $0x7e0] ss:$24 sps:$4 sm:$0xff]  }
 0x250   : > { %5006 = vmatpush1.bf16.msra.mxu1 %v7969_v10  ;;  %v7926_v10 = vld [vmem:[%s11065_s2 + $0x3a4] ss:$24 sps:$4 sm:$0xff]  }
 0x251   : > { %5007 = vmatprep.subr.bf16.mxu1 %v7977_v12  ;;  %v7929_v12 = vld [vmem:[%s11065_s2 + $0x3d4] ss:$24 sps:$4 sm:$0xff]  }
 0x252   : > { %3131 = vmatpush1.bf16.msra.mxu0 %v7843_v28  ;;  %v7900_v28 = vld [vmem:[%s11065_s2 + $0x220] ss:$24 sps:$4 sm:$0xff]  }
 0x253   : > { %3132 = vmatprep.subr.bf16.mxu0 %v7848_v53  ;;  %v8031_v53 = vld [vmem:[%s11065_s2 + $0x814] ss:$24 sps:$4 sm:$0xff]  }
 0x254   : > { %5008 = vmatpush1.bf16.msra.mxu1 %v7975_v15  ;;  %v7932_v15 = vld [vmem:[%s11065_s2 + $0x404] ss:$24 sps:$4 sm:$0xff]  }
 0x255   : > { %5009 = vmatprep.subr.bf16.mxu1 %v7983_v19  ;;  %v8055_v19 = vld [vmem:[%s11065_s2 + $0x8d4] ss:$24 sps:$4 sm:$0xff]  }
 0x256   : > { %3133 = vmatpush1.bf16.msra.mxu0 %v7846_v54  ;;  %v7905_v54 = vld [vmem:[%s11065_s2 + $0x254] ss:$24 sps:$4 sm:$0xff]  }
 0x257   : > { %3134 = vmatprep.subr.bf16.mxu0 %v7851_v56  ;;  %v8029_v56 = vld [vmem:[%s11065_s2 + $0x810] ss:$24 sps:$4 sm:$0xff]  }
 0x258   : > { %5010 = vmatpush1.bf16.msra.mxu1 %v7981_v21  ;;  %v8053_v21 = vld [vmem:[%s11065_s2 + $0x8d0] ss:$24 sps:$4 sm:$0xff]  }
 0x259   : > { %5011 = vmatprep.subr.bf16.mxu1 %v7989_v22  ;;  %v8061_v22 = vld [vmem:[%s11065_s2 + $0xc] ss:$24 sps:$4 sm:$0xff]  }
 0x25a   : > { %3135 = vmatpush1.bf16.msra.mxu0 %v7849_v57  ;;  %v7903_v57 = vld [vmem:[%s11065_s2 + $0x250] ss:$24 sps:$4 sm:$0xff]  }
 0x25b   : > { %3136 = vmatprep.subr.bf16.mxu0 %v7854_v58  ;;  %v8037_v58 = vld [vmem:[%s11065_s2 + $0x844] ss:$24 sps:$4 sm:$0xff]  }
 0x25c   : > { %5012 = vmatpush1.bf16.msra.mxu1 %v7987_v40  ;;  %v7936_v40 = vld [vmem:[%s11065_s2 + $0x460] ss:$24 sps:$4 sm:$0xff]  }
 0x25d   : > { %5013 = vmatprep.subr.bf16.mxu1 %v7995_v24  ;;  %v7939_v24 = vld [vmem:[%s11065_s2 + $0x490] ss:$24 sps:$4 sm:$0xff]  }
 0x25e   : > { %3137 = vmatpush1.bf16.msra.mxu0 %v7852_v59  ;;  %v7908_v59 = vld [vmem:[%s11065_s2 + $0x284] ss:$24 sps:$4 sm:$0xff]  }
 0x25f   : > { %3138 = vmatprep.subr.bf16.mxu0 %v7857_v60  ;;  %v8035_v60 = vld [vmem:[%s11065_s2 + $0x840] ss:$24 sps:$4 sm:$0xff]  }
 0x260   : > { %5014 = vmatpush1.bf16.msra.mxu1 %v7993_v25  ;;  %v7942_v25 = vld [vmem:[%s11065_s2 + $0x4c0] ss:$24 sps:$4 sm:$0xff]  }
 0x261   : > { %5015 = vmatprep.subr.bf16.mxu1 %v8001_v27  ;;  %v7945_v27 = vld [vmem:[%s11065_s2 + $0x4f0] ss:$24 sps:$4 sm:$0xff]  }
 0x262   : > { %3139 = vmatpush1.bf16.msra.mxu0 %v7855_v61  ;;  %v7906_v61 = vld [vmem:[%s11065_s2 + $0x280] ss:$24 sps:$4 sm:$0xff]  }
 0x263   : > { %3140 = vmatprep.subr.bf16.mxu0 %v7860_v62  ;;  %v8043_v62 = vld [vmem:[%s11065_s2 + $0x874] ss:$24 sps:$4 sm:$0xff]  }
 0x264   : > { %5016 = vmatpush1.bf16.msra.mxu1 %v7999_v30  ;;  %v7948_v30 = vld [vmem:[%s11065_s2 + $0x520] ss:$24 sps:$4 sm:$0xff]  }
 0x265   : > { %5017 = vmatprep.subr.bf16.mxu1 %v8007_v33  ;;  %v7951_v33 = vld [vmem:[%s11065_s2 + $0x550] ss:$24 sps:$4 sm:$0xff]  }
 0x266   : > { %3141 = vmatpush1.bf16.msra.mxu0 %v7858_v63  ;;  %v7911_v63 = vld [vmem:[%s11065_s2 + $0x2b4] ss:$24 sps:$4 sm:$0xff]  }
 0x267   : > { %3142 = vmatprep.subr.bf16.mxu0 %v7863_v0  ;;  %v8041_v0 = vld [vmem:[%s11065_s2 + $0x870] ss:$24 sps:$4 sm:$0xff]  }
 0x268   : > { %5018 = vmatpush1.bf16.msra.mxu1 %v8005_v36  ;;  %v7954_v36 = vld [vmem:[%s11065_s2 + $0x580] ss:$24 sps:$4 sm:$0xff]  }
 0x269   : > { %5019 = vmatprep.subr.bf16.mxu1 %v8013_v39  ;;  %v7957_v39 = vld [vmem:[%s11065_s2 + $0x5b0] ss:$24 sps:$4 sm:$0xff]  }
 0x26a   : > { %3143 = vmatpush1.bf16.msra.mxu0 %v7861_v1  ;;  %v7909_v1 = vld [vmem:[%s11065_s2 + $0x2b0] ss:$24 sps:$4 sm:$0xff]  }
 0x26b   : > { %3144 = vmatprep.subr.bf16.mxu0 %v7866_v2  ;;  %v8049_v2 = vld [vmem:[%s11065_s2 + $0x8a4] ss:$24 sps:$4 sm:$0xff]  }
 0x26c   : > { %5020 = vmatpush1.bf16.msra.mxu1 %v8011_v42  ;;  %v7960_v42 = vld [vmem:[%s11065_s2 + $0x5e0] ss:$24 sps:$4 sm:$0xff]  }
 0x26d   : > { %5021 = vmatprep.subr.bf16.mxu1 %v8019_v44  ;;  %v7966_v44 = vld [vmem:[%s11065_s2 + $0x610] ss:$24 sps:$4 sm:$0xff]  }
 0x26e   : > { %3145 = vmatpush1.bf16.msra.mxu0 %v7864_v3  ;;  %v7914_v3 = vld [vmem:[%s11065_s2 + $0x2e4] ss:$24 sps:$4 sm:$0xff]  }
 0x26f   : > { %5167 = vmatprep.subr.bf16.mxu0 %v7869_v4  ;;  %v8047_v4 = vld [vmem:[%s11065_s2 + $0x8a0] ss:$24 sps:$4 sm:$0xff]  }
 0x270   : > { %5022 = vmatpush1.bf16.msra.mxu1 %v8017_v46  ;;  %v7972_v46 = vld [vmem:[%s11065_s2 + $0x640] ss:$24 sps:$4 sm:$0xff]  }
 0x271   : > { %3147 = vmatmul.mubr.bf16.vlgmr.msra.gmra.mrb[8].mxu0 %v9263_v55  ;;  %v7875_v55 = vld [vmem:[%s11065_s2 + $0x74] ss:$24 sps:$4 sm:$0xff]   ;;  %5023 = vmatprep.subr.bf16.mxu1 %v8025_v49  ;;  %v7978_v49 = vld [vmem:[%s11065_s2 + $0x670] ss:$24 sps:$4 sm:$0xff]  }
 0x272   : > { %5168 = vmatpush1.bf16.msra.mxu0 %v7867_v14  ;;  %5199 = vmatprep.mubr.bf16.mxu0 %v9725_v31  ;;  %v7912_v14 = vld [vmem:[%s11065_s2 + $0x2e0] ss:$24 sps:$4 sm:$0xff]  }
 0x273   : > { %5169 = vmatprep.subr.bf16.mxu0 %v7872_v5  ;;  %v7917_v5 = vld [vmem:[%s11065_s2 + $0x314] ss:$24 sps:$4 sm:$0xff]  }
 0x274   : > { %5024 = vmatpush1.bf16.msra.mxu1 %v8023_v18  ;;  %v7984_v18 = vld [vmem:[%s11065_s2 + $0x6a0] ss:$24 sps:$4 sm:$0xff]  }
 0x275   : > { %5025 = vmatprep.subr.bf16.mxu1 %v8031_v53  ;;  %v7990_v53 = vld [vmem:[%s11065_s2 + $0x6d0] ss:$24 sps:$4 sm:$0xff]  }
 0x276   : > { %5170 = vmatpush1.bf16.msra.mxu0 %v7870_v8  ;;  %v7918_v8 = vld [vmem:[%s11065_s2 + $0x340] ss:$24 sps:$4 sm:$0xff]  }
 0x277   : > { %5171 = vmatprep.subr.bf16.mxu0 %v7875_v55  ;;  %v7921_v55 = vld [vmem:[%s11065_s2 + $0x370] ss:$24 sps:$4 sm:$0xff]  }
 0x278   : > { %5026 = vmatpush1.bf16.msra.mxu1 %v8029_v56  ;;  %v7996_v56 = vld [vmem:[%s11065_s2 + $0x700] ss:$24 sps:$4 sm:$0xff]  }
 0x279   : > { %5027 = vmatprep.subr.bf16.mxu1 %v8037_v58  ;;  %v8002_v58 = vld [vmem:[%s11065_s2 + $0x730] ss:$24 sps:$4 sm:$0xff]  }
 0x27a   : > { %5172 = vmatpush1.bf16.msra.mxu0 %v7873_v11  ;;  %v7924_v11 = vld [vmem:[%s11065_s2 + $0x3a0] ss:$24 sps:$4 sm:$0xff]  }
 0x27b   : > { %5173 = vmatprep.subr.bf16.mxu0 %v7878_v13  ;;  %v7927_v13 = vld [vmem:[%s11065_s2 + $0x3d0] ss:$24 sps:$4 sm:$0xff]  }
 0x27c   : > { %5028 = vmatpush1.bf16.msra.mxu1 %v8035_v60  ;;  %v8008_v60 = vld [vmem:[%s11065_s2 + $0x760] ss:$24 sps:$4 sm:$0xff]  }
 0x27d   : > { %5029 = vmatprep.subr.bf16.mxu1 %v8043_v62  ;;  %v8014_v62 = vld [vmem:[%s11065_s2 + $0x790] ss:$24 sps:$4 sm:$0xff]  }
 0x27e   : > { %5174 = vmatpush1.bf16.msra.mxu0 %v7876_v17  ;;  %v7930_v17 = vld [vmem:[%s11065_s2 + $0x400] ss:$24 sps:$4 sm:$0xff]  }
 0x27f   : > { %5175 = vmatprep.subr.bf16.mxu0 %v7881_v20  ;;  %v7935_v20 = vld [vmem:[%s11065_s2 + $0x434] ss:$24 sps:$4 sm:$0xff]  }
 0x280   : > { %5030 = vmatpush1.bf16.msra.mxu1 %v8041_v0  ;;  %v8020_v0 = vld [vmem:[%s11065_s2 + $0x7c0] ss:$24 sps:$4 sm:$0xff]  }
 0x281   : > { %5031 = vmatprep.subr.bf16.mxu1 %v8049_v2  ;;  %v8026_v2 = vld [vmem:[%s11065_s2 + $0x7f0] ss:$24 sps:$4 sm:$0xff]  }
 0x282   : > { %5176 = vmatpush1.bf16.msra.mxu0 %v7879_v37  ;;  %v7933_v37 = vld [vmem:[%s11065_s2 + $0x430] ss:$24 sps:$4 sm:$0xff]  }
 0x283   : > { %5177 = vmatprep.subr.bf16.mxu0 %v7884_v47  ;;  %v7938_v47 = vld [vmem:[%s11065_s2 + $0x464] ss:$24 sps:$4 sm:$0xff]  }
 0x284   : > { %5032 = vmatpush1.bf16.msra.mxu1 %v8047_v4  ;;  %v8032_v4 = vld [vmem:[%s11065_s2 + $0x820] ss:$24 sps:$4 sm:$0xff]  }
 0x285   : > { %5033 = vmatprep.subr.bf16.mxu1 %v8055_v19 }
 0x286   : > { %5178 = vmatpush1.bf16.msra.mxu0 %v7882_v23  ;;  %v7941_v23 = vld [vmem:[%s11065_s2 + $0x494] ss:$24 sps:$4 sm:$0xff]  }
 0x287   : > { %5179 = vmatprep.subr.bf16.mxu0 %v7887_v51  ;;  %v7944_v51 = vld [vmem:[%s11065_s2 + $0x4c4] ss:$24 sps:$4 sm:$0xff]  }
 0x288   : > { %5034 = vmatpush1.bf16.msra.mxu1 %v8053_v21  ;;  %v8064_v21 = vld [vmem:[%s11065_s2 + $0x3c] ss:$24 sps:$4 sm:$0xff]  }
 0x289   : > { %5044 = vmatprep.subr.bf16.mxu1 %v8061_v22  ;;  %v8067_v22 = vld [vmem:[%s11065_s2 + $0x6c] ss:$24 sps:$4 sm:$0xff]  }
 0x28a   : > { %5180 = vmatpush1.bf16.msra.mxu0 %v7885_v26  ;;  %v7947_v26 = vld [vmem:[%s11065_s2 + $0x4f4] ss:$24 sps:$4 sm:$0xff]  }
 0x28b   : > { %5181 = vmatprep.subr.bf16.mxu0 %v7890_v29  ;;  %v7950_v29 = vld [vmem:[%s11065_s2 + $0x524] ss:$24 sps:$4 sm:$0xff]  }
 0x28e   : > { %5182 = vmatpush1.bf16.msra.mxu0 %v7888_v32  ;;  %v7953_v32 = vld [vmem:[%s11065_s2 + $0x554] ss:$24 sps:$4 sm:$0xff]  }
 0x28f   : > { %5183 = vmatprep.subr.bf16.mxu0 %v7893_v34  ;;  %v7956_v34 = vld [vmem:[%s11065_s2 + $0x584] ss:$24 sps:$4 sm:$0xff]  }
 0x292   : > { %5184 = vmatpush1.bf16.msra.mxu0 %v7891_v38  ;;  %v7959_v38 = vld [vmem:[%s11065_s2 + $0x5b4] ss:$24 sps:$4 sm:$0xff]  }
 0x293   : > { %5185 = vmatprep.subr.bf16.mxu0 %v7896_v41  ;;  %v7962_v41 = vld [vmem:[%s11065_s2 + $0x5e4] ss:$24 sps:$4 sm:$0xff]  }
 0x296   : > { %5186 = vmatpush1.bf16.msra.mxu0 %v7894_v43  ;;  %v7968_v43 = vld [vmem:[%s11065_s2 + $0x614] ss:$24 sps:$4 sm:$0xff]  }
 0x297   : > { %5187 = vmatprep.subr.bf16.mxu0 %v7899_v45  ;;  %v7974_v45 = vld [vmem:[%s11065_s2 + $0x644] ss:$24 sps:$4 sm:$0xff]  }
 0x29a   : > { %5188 = vmatpush1.bf16.msra.mxu0 %v7897_v50  ;;  %v7980_v50 = vld [vmem:[%s11065_s2 + $0x674] ss:$24 sps:$4 sm:$0xff]  }
 0x29b   : > { %5189 = vmatprep.subr.bf16.mxu0 %v7902_v16  ;;  %v7986_v16 = vld [vmem:[%s11065_s2 + $0x6a4] ss:$24 sps:$4 sm:$0xff]  }
 0x29e   : > { %5190 = vmatpush1.bf16.msra.mxu0 %v7900_v28  ;;  %v7992_v28 = vld [vmem:[%s11065_s2 + $0x6d4] ss:$24 sps:$4 sm:$0xff]  }
 0x29f   : > { %5191 = vmatprep.subr.bf16.mxu0 %v7905_v54  ;;  %v7998_v54 = vld [vmem:[%s11065_s2 + $0x704] ss:$24 sps:$4 sm:$0xff]  }
 0x2a2   : > { %5192 = vmatpush1.bf16.msra.mxu0 %v7903_v57  ;;  %v8004_v57 = vld [vmem:[%s11065_s2 + $0x734] ss:$24 sps:$4 sm:$0xff]  }
 0x2a3   : > { %5193 = vmatprep.subr.bf16.mxu0 %v7908_v59  ;;  %v8010_v59 = vld [vmem:[%s11065_s2 + $0x764] ss:$24 sps:$4 sm:$0xff]  }
 0x2a6   : > { %5194 = vmatpush1.bf16.msra.mxu0 %v7906_v61  ;;  %v8016_v61 = vld [vmem:[%s11065_s2 + $0x794] ss:$24 sps:$4 sm:$0xff]  }
 0x2a7   : > { %5195 = vmatprep.subr.bf16.mxu0 %v7911_v63  ;;  %v8022_v63 = vld [vmem:[%s11065_s2 + $0x7c4] ss:$24 sps:$4 sm:$0xff]  }
 0x2aa   : > { %5196 = vmatpush1.bf16.msra.mxu0 %v7909_v1  ;;  %v8028_v1 = vld [vmem:[%s11065_s2 + $0x7f4] ss:$24 sps:$4 sm:$0xff]  }
 0x2ab   : > { %5197 = vmatprep.subr.bf16.mxu0 %v7914_v3  ;;  %v8034_v3 = vld [vmem:[%s11065_s2 + $0x824] ss:$24 sps:$4 sm:$0xff]  }
 0x2ae   : > { %5198 = vmatpush1.bf16.msra.mxu0 %v7912_v14  ;;  %v8040_v14 = vld [vmem:[%s11065_s2 + $0x854] ss:$24 sps:$4 sm:$0xff]  }
 0x2af   : > { %5208 = vmatprep.subr.bf16.mxu0 %v7917_v5  ;;  %v8038_v5 = vld [vmem:[%s11065_s2 + $0x850] ss:$24 sps:$4 sm:$0xff]  }
 0x2b1   : > { %5200 = vmatmul.mubr.bf16.vlgmr.msra.gmra.mrb[12].mxu0 %v9733_v35 }
 0x2b2   : > { %5209 = vmatpush1.bf16.msra.mxu0 %v7915_v6  ;;  %5240 = vmatprep.mubr.bf16.mxu0 %v9932_v52  ;;  %v8046_v6 = vld [vmem:[%s11065_s2 + $0x884] ss:$24 sps:$4 sm:$0xff]  }
 0x2b3   : > { %5210 = vmatprep.subr.bf16.mxu0 %v7920_v7  ;;  %v8044_v7 = vld [vmem:[%s11065_s2 + $0x880] ss:$24 sps:$4 sm:$0xff]  }
 0x2b6   : > { %5211 = vmatpush1.bf16.msra.mxu0 %v7918_v8  ;;  %v8052_v8 = vld [vmem:[%s11065_s2 + $0x8b4] ss:$24 sps:$4 sm:$0xff]  }
 0x2b7   : > { %5212 = vmatprep.subr.bf16.mxu0 %v7923_v9  ;;  %v8050_v9 = vld [vmem:[%s11065_s2 + $0x8b0] ss:$24 sps:$4 sm:$0xff]  }
 0x2ba   : > { %5213 = vmatpush1.bf16.msra.mxu0 %v7921_v55  ;;  %v8058_v55 = vld [vmem:[%s11065_s2 + $0x8e4] ss:$24 sps:$4 sm:$0xff]  }
 0x2bb   : > { %5214 = vmatprep.subr.bf16.mxu0 %v7926_v10  ;;  %v8056_v10 = vld [vmem:[%s11065_s2 + $0x8e0] ss:$24 sps:$4 sm:$0xff]  }
 0x2be   : > { %5215 = vmatpush1.bf16.msra.mxu0 %v7924_v11 }
 0x2bf   : > { %5216 = vmatprep.subr.bf16.mxu0 %v7929_v12 }
 0x2c2   : > { %5217 = vmatpush1.bf16.msra.mxu0 %v7927_v13 }
 0x2c3   : > { %5218 = vmatprep.subr.bf16.mxu0 %v7932_v15 }
 0x2c6   : > { %5219 = vmatpush1.bf16.msra.mxu0 %v7930_v17  ;;  %v8059_v17 = vld [vmem:[%s11065_s2 + $0x8] ss:$24 sps:$4 sm:$0xff]  }
 0x2c7   : > { %5220 = vmatprep.subr.bf16.mxu0 %v7935_v20 }
 0x2ca   : > { %5221 = vmatpush1.bf16.msra.mxu0 %v7933_v37  ;;  %v8062_v37 = vld [vmem:[%s11065_s2 + $0x38] ss:$24 sps:$4 sm:$0xff]  }
 0x2cb   : > { %5222 = vmatprep.subr.bf16.mxu0 %v7938_v47  ;;  %v8065_v47 = vld [vmem:[%s11065_s2 + $0x68] ss:$24 sps:$4 sm:$0xff]  }
 0x2ce   : > { %5223 = vmatpush1.bf16.msra.mxu0 %v7936_v40  ;;  %v8070_v40 = vld [vmem:[%s11065_s2 + $0x9c] ss:$24 sps:$4 sm:$0xff]  }
 0x2cf   : > { %5224 = vmatprep.subr.bf16.mxu0 %v7941_v23  ;;  %v8073_v23 = vld [vmem:[%s11065_s2 + $0xcc] ss:$24 sps:$4 sm:$0xff]  }
 0x2d2   : > { %5225 = vmatpush1.bf16.msra.mxu0 %v7939_v24  ;;  %v8071_v24 = vld [vmem:[%s11065_s2 + $0xc8] ss:$24 sps:$4 sm:$0xff]  }
 0x2d3   : > { %5226 = vmatprep.subr.bf16.mxu0 %v7944_v51  ;;  %v8076_v51 = vld [vmem:[%s11065_s2 + $0xfc] ss:$24 sps:$4 sm:$0xff]  }
 0x2d6   : > { %5227 = vmatpush1.bf16.msra.mxu0 %v7942_v25  ;;  %v8074_v25 = vld [vmem:[%s11065_s2 + $0xf8] ss:$24 sps:$4 sm:$0xff]  }
 0x2d7   : > { %5228 = vmatprep.subr.bf16.mxu0 %v7947_v26  ;;  %v8079_v26 = vld [vmem:[%s11065_s2 + $0x12c] ss:$24 sps:$4 sm:$0xff]  }
 0x2da   : > { %5229 = vmatpush1.bf16.msra.mxu0 %v7945_v27  ;;  %v8077_v27 = vld [vmem:[%s11065_s2 + $0x128] ss:$24 sps:$4 sm:$0xff]  }
 0x2db   : > { %5230 = vmatprep.subr.bf16.mxu0 %v7950_v29  ;;  %v8082_v29 = vld [vmem:[%s11065_s2 + $0x15c] ss:$24 sps:$4 sm:$0xff]  }
 0x2de   : > { %5231 = vmatpush1.bf16.msra.mxu0 %v7948_v30  ;;  %v8080_v30 = vld [vmem:[%s11065_s2 + $0x158] ss:$24 sps:$4 sm:$0xff]  }
 0x2df   : > { %5232 = vmatprep.subr.bf16.mxu0 %v7953_v32  ;;  %v8085_v32 = vld [vmem:[%s11065_s2 + $0x18c] ss:$24 sps:$4 sm:$0xff]  }
 0x2e2   : > { %5233 = vmatpush1.bf16.msra.mxu0 %v7951_v33  ;;  %v8083_v33 = vld [vmem:[%s11065_s2 + $0x188] ss:$24 sps:$4 sm:$0xff]  }
 0x2e3   : > { %5234 = vmatprep.subr.bf16.mxu0 %v7956_v34  ;;  %v8088_v34 = vld [vmem:[%s11065_s2 + $0x1bc] ss:$24 sps:$4 sm:$0xff]  }
 0x2e6   : > { %5235 = vmatpush1.bf16.msra.mxu0 %v7954_v36  ;;  %v8086_v36 = vld [vmem:[%s11065_s2 + $0x1b8] ss:$24 sps:$4 sm:$0xff]  }
 0x2e7   : > { %5236 = vmatprep.subr.bf16.mxu0 %v7959_v38  ;;  %v8091_v38 = vld [vmem:[%s11065_s2 + $0x1ec] ss:$24 sps:$4 sm:$0xff]  }
 0x2ea   : > { %5237 = vmatpush1.bf16.msra.mxu0 %v7957_v39  ;;  %v8089_v39 = vld [vmem:[%s11065_s2 + $0x1e8] ss:$24 sps:$4 sm:$0xff]  }
 0x2eb   : > { %5238 = vmatprep.subr.bf16.mxu0 %v7962_v41  ;;  %v8094_v41 = vld [vmem:[%s11065_s2 + $0x21c] ss:$24 sps:$4 sm:$0xff]  }
 0x2ee   : > { %5239 = vmatpush1.bf16.msra.mxu0 %v7960_v42  ;;  %v8092_v42 = vld [vmem:[%s11065_s2 + $0x218] ss:$24 sps:$4 sm:$0xff]  }
 0x2ef   : > { %5249 = vmatprep.subr.bf16.mxu0 %v7968_v43  ;;  %v8097_v43 = vld [vmem:[%s11065_s2 + $0x24c] ss:$24 sps:$4 sm:$0xff]  }
 0x2f1   : > { %5241 = vmatmul.mubr.bf16.vlgmr.msra.gmra.mrb[12].mxu0 %v9927_v48 }
 0x2f2   : > { %5250 = vmatpush1.bf16.msra.mxu0 %v7966_v44  ;;  %v8095_v44 = vld [vmem:[%s11065_s2 + $0x248] ss:$24 sps:$4 sm:$0xff]  }
 0x2f3   : > { %5251 = vmatprep.subr.bf16.mxu0 %v7974_v45  ;;  %v8100_v45 = vld [vmem:[%s11065_s2 + $0x27c] ss:$24 sps:$4 sm:$0xff]  }
 0x2f6   : > { %5252 = vmatpush1.bf16.msra.mxu0 %v7972_v46  ;;  %v8098_v46 = vld [vmem:[%s11065_s2 + $0x278] ss:$24 sps:$4 sm:$0xff]  }
 0x2f7   : > { %5253 = vmatprep.subr.bf16.mxu0 %v7980_v50  ;;  %v8103_v50 = vld [vmem:[%s11065_s2 + $0x2ac] ss:$24 sps:$4 sm:$0xff]  }
 0x2fa   : > { %5254 = vmatpush1.bf16.msra.mxu0 %v7978_v49  ;;  %v8101_v49 = vld [vmem:[%s11065_s2 + $0x2a8] ss:$24 sps:$4 sm:$0xff]  }
 0x2fb   : > { %5255 = vmatprep.subr.bf16.mxu0 %v7986_v16  ;;  %v8106_v16 = vld [vmem:[%s11065_s2 + $0x2dc] ss:$24 sps:$4 sm:$0xff]  }
 0x2fe   : > { %5256 = vmatpush1.bf16.msra.mxu0 %v7984_v18  ;;  %v8104_v18 = vld [vmem:[%s11065_s2 + $0x2d8] ss:$24 sps:$4 sm:$0xff]  }
 0x2ff   : > { %5257 = vmatprep.subr.bf16.mxu0 %v7992_v28  ;;  %v8109_v28 = vld [vmem:[%s11065_s2 + $0x30c] ss:$24 sps:$4 sm:$0xff]  }
 0x302   : > { %5258 = vmatpush1.bf16.msra.mxu0 %v7990_v53  ;;  %v8107_v53 = vld [vmem:[%s11065_s2 + $0x308] ss:$24 sps:$4 sm:$0xff]  }
 0x303   : > { %5259 = vmatprep.subr.bf16.mxu0 %v7998_v54  ;;  %v8112_v54 = vld [vmem:[%s11065_s2 + $0x33c] ss:$24 sps:$4 sm:$0xff]  }
 0x306   : > { %5260 = vmatpush1.bf16.msra.mxu0 %v7996_v56  ;;  %v8110_v56 = vld [vmem:[%s11065_s2 + $0x338] ss:$24 sps:$4 sm:$0xff]  }
 0x307   : > { %5261 = vmatprep.subr.bf16.mxu0 %v8004_v57  ;;  %v8115_v57 = vld [vmem:[%s11065_s2 + $0x36c] ss:$24 sps:$4 sm:$0xff]  }
 0x30a   : > { %5262 = vmatpush1.bf16.msra.mxu0 %v8002_v58  ;;  %v8113_v58 = vld [vmem:[%s11065_s2 + $0x368] ss:$24 sps:$4 sm:$0xff]  }
 0x30b   : > { %5263 = vmatprep.subr.bf16.mxu0 %v8010_v59  ;;  %v8121_v59 = vld [vmem:[%s11065_s2 + $0x3cc] ss:$24 sps:$4 sm:$0xff]  }
 0x30e   : > { %5264 = vmatpush1.bf16.msra.mxu0 %v8008_v60  ;;  %v8119_v60 = vld [vmem:[%s11065_s2 + $0x3c8] ss:$24 sps:$4 sm:$0xff]  }
 0x30f   : > { %5265 = vmatprep.subr.bf16.mxu0 %v8016_v61  ;;  %v8124_v61 = vld [vmem:[%s11065_s2 + $0x3fc] ss:$24 sps:$4 sm:$0xff]  }
 0x312   : > { %5266 = vmatpush1.bf16.msra.mxu0 %v8014_v62  ;;  %v8122_v62 = vld [vmem:[%s11065_s2 + $0x3f8] ss:$24 sps:$4 sm:$0xff]  }
 0x313   : > { %5267 = vmatprep.subr.bf16.mxu0 %v8022_v63  ;;  %v8127_v63 = vld [vmem:[%s11065_s2 + $0x42c] ss:$24 sps:$4 sm:$0xff]  }
 0x316   : > { %5268 = vmatpush1.bf16.msra.mxu0 %v8020_v0  ;;  %v8125_v0 = vld [vmem:[%s11065_s2 + $0x428] ss:$24 sps:$4 sm:$0xff]  }
 0x317   : > { %5269 = vmatprep.subr.bf16.mxu0 %v8028_v1  ;;  %v8130_v1 = vld [vmem:[%s11065_s2 + $0x45c] ss:$24 sps:$4 sm:$0xff]  }
 0x31a   : > { %5270 = vmatpush1.bf16.msra.mxu0 %v8026_v2  ;;  %v8128_v2 = vld [vmem:[%s11065_s2 + $0x458] ss:$24 sps:$4 sm:$0xff]  }
 0x31b   : > { %5271 = vmatprep.subr.bf16.mxu0 %v8034_v3  ;;  %v8133_v3 = vld [vmem:[%s11065_s2 + $0x48c] ss:$24 sps:$4 sm:$0xff]  }
 0x31e   : > { %5272 = vmatpush1.bf16.msra.mxu0 %v8032_v4  ;;  %v8131_v4 = vld [vmem:[%s11065_s2 + $0x488] ss:$24 sps:$4 sm:$0xff]  }
 0x31f   : > { %5273 = vmatprep.subr.bf16.mxu0 %v8040_v14  ;;  %v8136_v14 = vld [vmem:[%s11065_s2 + $0x4bc] ss:$24 sps:$4 sm:$0xff]  }
 0x322   : > { %5274 = vmatpush1.bf16.msra.mxu0 %v8038_v5  ;;  %v8134_v5 = vld [vmem:[%s11065_s2 + $0x4b8] ss:$24 sps:$4 sm:$0xff]  }
 0x323   : > { %5275 = vmatprep.subr.bf16.mxu0 %v8046_v6  ;;  %v8139_v6 = vld [vmem:[%s11065_s2 + $0x4ec] ss:$24 sps:$4 sm:$0xff]  }
 0x326   : > { %5276 = vmatpush1.bf16.msra.mxu0 %v8044_v7  ;;  %v8137_v7 = vld [vmem:[%s11065_s2 + $0x4e8] ss:$24 sps:$4 sm:$0xff]  }
 0x327   : > { %5277 = vmatprep.subr.bf16.mxu0 %v8052_v8  ;;  %v8142_v8 = vld [vmem:[%s11065_s2 + $0x51c] ss:$24 sps:$4 sm:$0xff]  }
 0x32a   : > { %5278 = vmatpush1.bf16.msra.mxu0 %v8050_v9  ;;  %v8140_v9 = vld [vmem:[%s11065_s2 + $0x518] ss:$24 sps:$4 sm:$0xff]  }
 0x32b   : > { %5279 = vmatprep.subr.bf16.mxu0 %v8058_v55  ;;  %v8145_v55 = vld [vmem:[%s11065_s2 + $0x54c] ss:$24 sps:$4 sm:$0xff]  }
 0x32e   : > { %5280 = vmatpush1.bf16.msra.mxu0 %v8056_v10  ;;  %v8143_v10 = vld [vmem:[%s11065_s2 + $0x548] ss:$24 sps:$4 sm:$0xff]  }
 0x344   : > { %v3148_v11 = vpop.f32.mrb[8].mxu0 }
 0x345   : > { %v3150_v12 = vpop.f32.mrb[9].mxu0  ;;  %v10384_v19 = vpack.c.bf16 %v3148_v11, %v3148_v11  ;;  %v8148_v11 = vld [vmem:[%s11065_s2 + $0x57c] ss:$24 sps:$4 sm:$0xff]  }
 0x346   : > { %v10379_v13 = vpack.c.bf16 %v3150_v12, %v3150_v12  ;;  %v3152_v15 = vpop.f32.mrb[10].mxu0  ;;  %v8146_v12 = vld [vmem:[%s11065_s2 + $0x578] ss:$24 sps:$4 sm:$0xff]  }
 0x347   : > { %v3153_v20 = vpop.f32.mrb[11].mxu0  ;;  %v8151_v15 = vld [vmem:[%s11065_s2 + $0x5ac] ss:$24 sps:$4 sm:$0xff]  }
 0x348   : > { %5035 = vmatprep.mubr.bf16.mxu1 %v10379_v13  ;;  %5281 = vmatprep.mubr.bf16.mxu0 %v10379_v13  ;;  %v8154_v20 = vld [vmem:[%s11065_s2 + $0x5dc] ss:$24 sps:$4 sm:$0xff]  }
 0x349   : > { %5036 = vmatmul.mubr.bf16.vlgmr.msra.gmra.mrb[4].mxu1 %v10384_v19  ;;  %5282 = vmatmul.mubr.bf16.vlgmr.msra.gmra.mrb[12].mxu0 %v10384_v19 }
 0x34a   : > { %5045 = vmatpush1.bf16.msra.mxu1 %v8059_v17  ;;  %5076 = vmatprep.mubr.bf16.mxu1 %v9725_v31  ;;  %v8068_v31 = vld [vmem:[%s11065_s2 + $0x98] ss:$24 sps:$4 sm:$0xff]   ;;  %v8149_v17 = vld [vmem:[%s11065_s2 + $0x5a8] ss:$24 sps:$4 sm:$0xff]  }
 0x34b   : > { %5046 = vmatprep.subr.bf16.mxu1 %v8064_v21  ;;  %v8152_v21 = vld [vmem:[%s11065_s2 + $0x5d8] ss:$24 sps:$4 sm:$0xff]  }
 0x34e   : > { %5047 = vmatpush1.bf16.msra.mxu1 %v8062_v37  ;;  %v8157_v37 = vld [vmem:[%s11065_s2 + $0x60c] ss:$24 sps:$4 sm:$0xff]  }
 0x34f   : > { %5048 = vmatprep.subr.bf16.mxu1 %v8067_v22  ;;  %v8155_v22 = vld [vmem:[%s11065_s2 + $0x608] ss:$24 sps:$4 sm:$0xff]  }
 0x352   : > { %5049 = vmatpush1.bf16.msra.mxu1 %v8065_v47  ;;  %v8160_v47 = vld [vmem:[%s11065_s2 + $0x63c] ss:$24 sps:$4 sm:$0xff]  }
 0x353   : > { %5050 = vmatprep.subr.bf16.mxu1 %v8070_v40  ;;  %v8158_v40 = vld [vmem:[%s11065_s2 + $0x638] ss:$24 sps:$4 sm:$0xff]  }
 0x356   : > { %5051 = vmatpush1.bf16.msra.mxu1 %v8068_v31  ;;  %v8163_v31 = vld [vmem:[%s11065_s2 + $0x66c] ss:$24 sps:$4 sm:$0xff]  }
 0x357   : > { %5052 = vmatprep.subr.bf16.mxu1 %v8073_v23  ;;  %v8161_v23 = vld [vmem:[%s11065_s2 + $0x668] ss:$24 sps:$4 sm:$0xff]  }
 0x35a   : > { %5053 = vmatpush1.bf16.msra.mxu1 %v8071_v24  ;;  %v8169_v24 = vld [vmem:[%s11065_s2 + $0x6cc] ss:$24 sps:$4 sm:$0xff]  }
 0x35b   : > { %5054 = vmatprep.subr.bf16.mxu1 %v8076_v51  ;;  %v8167_v51 = vld [vmem:[%s11065_s2 + $0x6c8] ss:$24 sps:$4 sm:$0xff]  }
 0x35e   : > { %5055 = vmatpush1.bf16.msra.mxu1 %v8074_v25  ;;  %v8172_v25 = vld [vmem:[%s11065_s2 + $0x6fc] ss:$24 sps:$4 sm:$0xff]  }
 0x35f   : > { %5056 = vmatprep.subr.bf16.mxu1 %v8079_v26  ;;  %v8170_v26 = vld [vmem:[%s11065_s2 + $0x6f8] ss:$24 sps:$4 sm:$0xff]  }
 0x362   : > { %5057 = vmatpush1.bf16.msra.mxu1 %v8077_v27  ;;  %v8175_v27 = vld [vmem:[%s11065_s2 + $0x72c] ss:$24 sps:$4 sm:$0xff]  }
 0x363   : > { %5058 = vmatprep.subr.bf16.mxu1 %v8082_v29  ;;  %v8173_v29 = vld [vmem:[%s11065_s2 + $0x728] ss:$24 sps:$4 sm:$0xff]  }
 0x366   : > { %5059 = vmatpush1.bf16.msra.mxu1 %v8080_v30  ;;  %v8178_v30 = vld [vmem:[%s11065_s2 + $0x75c] ss:$24 sps:$4 sm:$0xff]  }
 0x367   : > { %5060 = vmatprep.subr.bf16.mxu1 %v8085_v32  ;;  %v8176_v32 = vld [vmem:[%s11065_s2 + $0x758] ss:$24 sps:$4 sm:$0xff]  }
 0x36a   : > { %5061 = vmatpush1.bf16.msra.mxu1 %v8083_v33  ;;  %v8181_v33 = vld [vmem:[%s11065_s2 + $0x78c] ss:$24 sps:$4 sm:$0xff]  }
 0x36b   : > { %5062 = vmatprep.subr.bf16.mxu1 %v8088_v34  ;;  %v8179_v34 = vld [vmem:[%s11065_s2 + $0x788] ss:$24 sps:$4 sm:$0xff]  }
 0x36e   : > { %5063 = vmatpush1.bf16.msra.mxu1 %v8086_v36  ;;  %v8184_v36 = vld [vmem:[%s11065_s2 + $0x7bc] ss:$24 sps:$4 sm:$0xff]  }
 0x36f   : > { %5064 = vmatprep.subr.bf16.mxu1 %v8091_v38  ;;  %v8182_v38 = vld [vmem:[%s11065_s2 + $0x7b8] ss:$24 sps:$4 sm:$0xff]  }
 0x372   : > { %5065 = vmatpush1.bf16.msra.mxu1 %v8089_v39  ;;  %v8187_v39 = vld [vmem:[%s11065_s2 + $0x7ec] ss:$24 sps:$4 sm:$0xff]  }
 0x373   : > { %5066 = vmatprep.subr.bf16.mxu1 %v8094_v41  ;;  %v8185_v41 = vld [vmem:[%s11065_s2 + $0x7e8] ss:$24 sps:$4 sm:$0xff]  }
 0x376   : > { %5067 = vmatpush1.bf16.msra.mxu1 %v8092_v42  ;;  %v8190_v42 = vld [vmem:[%s11065_s2 + $0x81c] ss:$24 sps:$4 sm:$0xff]  }
 0x377   : > { %5068 = vmatprep.subr.bf16.mxu1 %v8097_v43  ;;  %v8188_v43 = vld [vmem:[%s11065_s2 + $0x818] ss:$24 sps:$4 sm:$0xff]  }
 0x37a   : > { %5069 = vmatpush1.bf16.msra.mxu1 %v8095_v44  ;;  %v8193_v44 = vld [vmem:[%s11065_s2 + $0x84c] ss:$24 sps:$4 sm:$0xff]  }
 0x37b   : > { %5070 = vmatprep.subr.bf16.mxu1 %v8100_v45  ;;  %v8191_v45 = vld [vmem:[%s11065_s2 + $0x848] ss:$24 sps:$4 sm:$0xff]  }
 0x37e   : > { %5071 = vmatpush1.bf16.msra.mxu1 %v8098_v46  ;;  %v8196_v46 = vld [vmem:[%s11065_s2 + $0x87c] ss:$24 sps:$4 sm:$0xff]  }
 0x37f   : > { %5072 = vmatprep.subr.bf16.mxu1 %v8103_v50  ;;  %v8194_v50 = vld [vmem:[%s11065_s2 + $0x878] ss:$24 sps:$4 sm:$0xff]  }
 0x382   : > { %5073 = vmatpush1.bf16.msra.mxu1 %v8101_v49  ;;  %v8199_v49 = vld [vmem:[%s11065_s2 + $0x8ac] ss:$24 sps:$4 sm:$0xff]  }
 0x383   : > { %5074 = vmatprep.subr.bf16.mxu1 %v8106_v16  ;;  %v8197_v16 = vld [vmem:[%s11065_s2 + $0x8a8] ss:$24 sps:$4 sm:$0xff]  }
 0x386   : > { %5075 = vmatpush1.bf16.msra.mxu1 %v8104_v18  ;;  %v8202_v18 = vld [vmem:[%s11065_s2 + $0x8dc] ss:$24 sps:$4 sm:$0xff]  }
 0x387   : > { %5085 = vmatprep.subr.bf16.mxu1 %v8109_v28  ;;  %v8200_v28 = vld [vmem:[%s11065_s2 + $0x8d8] ss:$24 sps:$4 sm:$0xff]  }
 0x389   : > { %5077 = vmatmul.mubr.bf16.vlgmr.msra.gmra.mrb[8].mxu1 %v9733_v35  ;;  %v8118_v35 = vld [vmem:[%s11065_s2 + $0x39c] ss:$24 sps:$4 sm:$0xff]  }
 0x38a   : > { %5086 = vmatpush1.bf16.msra.mxu1 %v8107_v53  ;;  %5117 = vmatprep.mubr.bf16.mxu1 %v9932_v52  ;;  %v8116_v52 = vld [vmem:[%s11065_s2 + $0x398] ss:$24 sps:$4 sm:$0xff]   ;;  %v8205_v53 = vld [vmem:[%s11067_s4 + $0x4] ss:$8 sps:$4 sm:$0xff]  }
 0x38b   : > { %5087 = vmatprep.subr.bf16.mxu1 %v8112_v54  ;;  %v8203_v54 = vld [vmem:[%s11067_s4] ss:$8 sps:$4 sm:$0xff]  }
 0x38e   : > { %5088 = vmatpush1.bf16.msra.mxu1 %v8110_v56  ;;  %v8208_v56 = vld [vmem:[%s11067_s4 + $0x14] ss:$8 sps:$4 sm:$0xff]  }
 0x38f   : > { %5089 = vmatprep.subr.bf16.mxu1 %v8115_v57  ;;  %v8206_v57 = vld [vmem:[%s11067_s4 + $0x10] ss:$8 sps:$4 sm:$0xff]  }
 0x392   : > { %5090 = vmatpush1.bf16.msra.mxu1 %v8113_v58  ;;  %v8211_v58 = vld [vmem:[%s11067_s4 + $0x24] ss:$8 sps:$4 sm:$0xff]  }
 0x393   : > { %5091 = vmatprep.subr.bf16.mxu1 %v8118_v35  ;;  %v8209_v35 = vld [vmem:[%s11067_s4 + $0x20] ss:$8 sps:$4 sm:$0xff]  }
 0x396   : > { %5092 = vmatpush1.bf16.msra.mxu1 %v8116_v52  ;;  %v3451_v52 = vlaneseq }
 0x397   : > { %5093 = vmatprep.subr.bf16.mxu1 %v8121_v59  ;;  %v8212_v59 = vld [vmem:[%s11067_s4 + $0x30] ss:$8 sps:$4 sm:$0xff]  }
 0x39a   : > { %5094 = vmatpush1.bf16.msra.mxu1 %v8119_v60  ;;  %v10702_v60 = vshrl.u32 %v3451_v52, 7  ;;  %v8275_v52 = vld [vmem:[%s11067_s4 + $0x180] ss:$8 sps:$4 sm:$0xff]  }
 0x39b   : > { %5095 = vmatprep.subr.bf16.mxu1 %v8124_v61  ;;  %v8217_v61 = vld [vmem:[%s11067_s4 + $0x44] ss:$8 sps:$4 sm:$0xff]  }
 0x39e   : > { %5096 = vmatpush1.bf16.msra.mxu1 %v8122_v62  ;;  %v8215_v62 = vld [vmem:[%s11067_s4 + $0x40] ss:$8 sps:$4 sm:$0xff]  }
 0x39f   : > { %5097 = vmatprep.subr.bf16.mxu1 %v8127_v63  ;;  %v3457_v63 = vsub.s32 1, %v10702_v60 }
 0x3a2   : > { %5098 = vmatpush1.bf16.msra.mxu1 %v8125_v0  ;;  %v10714_v0 = vld [vmem:[%s11066_s3] sm:$0x3f] }
 0x3a3   : > { %5099 = vmatprep.subr.bf16.mxu1 %v8130_v1  ;;  %v8220_v1 = vld [vmem:[%s11067_s4 + $0x54] ss:$8 sps:$4 sm:$0xff]  }
 0x3a6   : > { %5100 = vmatpush1.bf16.msra.mxu1 %v8128_v2  ;;  %v8218_v2 = vld [vmem:[%s11067_s4 + $0x50] ss:$8 sps:$4 sm:$0xff]  }
 0x3a7   : > { %5101 = vmatprep.subr.bf16.mxu1 %v8133_v3  ;;  %v3458_v3 = vrot.slane %v10714_v0, %v3457_v63  ;;  %v8286_v63 = vld [vmem:[%s11067_s4 + $0x1b4] ss:$8 sps:$4 sm:$0xff]  }
 0x3aa   : > { %5102 = vmatpush1.bf16.msra.mxu1 %v8131_v4  ;;  %v8223_v4 = vld [vmem:[%s11067_s4 + $0x64] ss:$8 sps:$4 sm:$0xff]  }
 0x3ab   : > { %5103 = vmatprep.subr.bf16.mxu1 %v8136_v14 }
 0x3ae   : > { %5104 = vmatpush1.bf16.msra.mxu1 %v8134_v5 }
 0x3af   : > { %5105 = vmatprep.subr.bf16.mxu1 %v8139_v6 }
 0x3b2   : > { %5106 = vmatpush1.bf16.msra.mxu1 %v8137_v7 }
 0x3b3   : > { %5107 = vmatprep.subr.bf16.mxu1 %v8142_v8 }
 0x3b6   : > { %5108 = vmatpush1.bf16.msra.mxu1 %v8140_v9 }
 0x3b7   : > { %5109 = vmatprep.subr.bf16.mxu1 %v8145_v55 }
 0x3ba   : > { %5110 = vmatpush1.bf16.msra.mxu1 %v8143_v10  ;;  %v8221_v10 = vld [vmem:[%s11067_s4 + $0x60] ss:$8 sps:$4 sm:$0xff]  }
 0x3bb   : > { %5111 = vmatprep.subr.bf16.mxu1 %v8148_v11 }
 0x3be   : > { %5112 = vmatpush1.bf16.msra.mxu1 %v8146_v12 }
 0x3bf   : > { %5113 = vmatprep.subr.bf16.mxu1 %v8151_v15  ;;  %v8226_v15 = vld [vmem:[%s11067_s4 + $0x74] ss:$8 sps:$4 sm:$0xff]  }
 0x3c2   : > { %5114 = vmatpush1.bf16.msra.mxu1 %v8149_v17  ;;  %v8224_v17 = vld [vmem:[%s11067_s4 + $0x70] ss:$8 sps:$4 sm:$0xff]  }
 0x3c3   : > { %5115 = vmatprep.subr.bf16.mxu1 %v8154_v20  ;;  %v8229_v20 = vld [vmem:[%s11067_s4 + $0x84] ss:$8 sps:$4 sm:$0xff]  }
 0x3c6   : > { %5116 = vmatpush1.bf16.msra.mxu1 %v8152_v21  ;;  %v8227_v21 = vld [vmem:[%s11067_s4 + $0x80] ss:$8 sps:$4 sm:$0xff]  }
 0x3c7   : > { %5126 = vmatprep.subr.bf16.mxu1 %v8157_v37  ;;  %v8232_v37 = vld [vmem:[%s11067_s4 + $0x94] ss:$8 sps:$4 sm:$0xff]  }
 0x3c9   : > { %5118 = vmatmul.mubr.bf16.vlgmr.msra.gmra.mrb[8].mxu1 %v9927_v48  ;;  %v8166_v48 = vld [vmem:[%s11065_s2 + $0x69c] ss:$24 sps:$4 sm:$0xff]  }
 0x3ca   : > { %5127 = vmatpush1.bf16.msra.mxu1 %v8155_v22  ;;  %5158 = vmatprep.mubr.bf16.mxu1 %v10379_v13  ;;  %v8164_v13 = vld [vmem:[%s11065_s2 + $0x698] ss:$24 sps:$4 sm:$0xff]  }
 0x3cb   : > { %5128 = vmatprep.subr.bf16.mxu1 %v8160_v47  ;;  %v8230_v22 = vld [vmem:[%s11067_s4 + $0x90] ss:$8 sps:$4 sm:$0xff]  }
 0x3ce   : > { %5129 = vmatpush1.bf16.msra.mxu1 %v8158_v40  ;;  %v8235_v40 = vld [vmem:[%s11067_s4 + $0xa4] ss:$8 sps:$4 sm:$0xff]  }
 0x3cf   : > { %5130 = vmatprep.subr.bf16.mxu1 %v8163_v31 }
 0x3d2   : > { %5131 = vmatpush1.bf16.msra.mxu1 %v8161_v23  ;;  %v3453_v23 = vsub.s32 0, %v10702_v60 }
 0x3d3   : > { %5132 = vmatprep.subr.bf16.mxu1 %v8166_v48  ;;  %v8233_v48 = vld [vmem:[%s11067_s4 + $0xa0] ss:$8 sps:$4 sm:$0xff]  }
 0x3d6   : > { %5133 = vmatpush1.bf16.msra.mxu1 %v8164_v13  ;;  %v8238_v13 = vld [vmem:[%s11067_s4 + $0xb4] ss:$8 sps:$4 sm:$0xff]  }
 0x3d7   : > { %5134 = vmatprep.subr.bf16.mxu1 %v8169_v24  ;;  %v3454_v24 = vrot.slane %v10714_v0, %v3453_v23  ;;  %v8358_v23 = vld [vmem:[%s11069_s6 + $0x28] sm:$0xff]  }
 0x3da   : > { %5135 = vmatpush1.bf16.msra.mxu1 %v8167_v51  ;;  %v8236_v51 = vld [vmem:[%s11067_s4 + $0xb0] ss:$8 sps:$4 sm:$0xff]  }
 0x3db   : > { %5136 = vmatprep.subr.bf16.mxu1 %v8172_v25  ;;  %v8241_v25 = vld [vmem:[%s11067_s4 + $0xc4] ss:$8 sps:$4 sm:$0xff]  }
 0x3de   : > { %5137 = vmatpush1.bf16.msra.mxu1 %v8170_v26 }
 0x3df   : > { %5138 = vmatprep.subr.bf16.mxu1 %v8175_v27  ;;  %v8239_v27 = vld [vmem:[%s11067_s4 + $0xc0] ss:$8 sps:$4 sm:$0xff]  }
 0x3e2   : > { %5139 = vmatpush1.bf16.msra.mxu1 %v8173_v29  ;;  %v8244_v29 = vld [vmem:[%s11067_s4 + $0xd4] ss:$8 sps:$4 sm:$0xff]  }
 0x3e3   : > { %5140 = vmatprep.subr.bf16.mxu1 %v8178_v30  ;;  %v8242_v30 = vld [vmem:[%s11067_s4 + $0xd0] ss:$8 sps:$4 sm:$0xff]  }
 0x3e6   : > { %5141 = vmatpush1.bf16.msra.mxu1 %v8176_v32  ;;  %v8247_v32 = vld [vmem:[%s11067_s4 + $0xe4] ss:$8 sps:$4 sm:$0xff]  }
 0x3e7   : > { %5142 = vmatprep.subr.bf16.mxu1 %v8181_v33  ;;  %v8245_v33 = vld [vmem:[%s11067_s4 + $0xe0] ss:$8 sps:$4 sm:$0xff]  }
 0x3ea   : > { %5143 = vmatpush1.bf16.msra.mxu1 %v8179_v34  ;;  %v8250_v34 = vld [vmem:[%s11067_s4 + $0xf4] ss:$8 sps:$4 sm:$0xff]  }
 0x3eb   : > { %5144 = vmatprep.subr.bf16.mxu1 %v8184_v36  ;;  %v8248_v36 = vld [vmem:[%s11067_s4 + $0xf0] ss:$8 sps:$4 sm:$0xff]  }
 0x3ee   : > { %5145 = vmatpush1.bf16.msra.mxu1 %v8182_v38  ;;  %v8253_v38 = vld [vmem:[%s11067_s4 + $0x104] ss:$8 sps:$4 sm:$0xff]  }
 0x3ef   : > { %5146 = vmatprep.subr.bf16.mxu1 %v8187_v39 }
 0x3f2   : > { %5147 = vmatpush1.bf16.msra.mxu1 %v8185_v41  ;;  %v8251_v41 = vld [vmem:[%s11067_s4 + $0x100] ss:$8 sps:$4 sm:$0xff]  }
 0x3f3   : > { %5148 = vmatprep.subr.bf16.mxu1 %v8190_v42 }
 0x3f6   : > { %5149 = vmatpush1.bf16.msra.mxu1 %v8188_v43  ;;  %v8256_v43 = vld [vmem:[%s11067_s4 + $0x114] ss:$8 sps:$4 sm:$0xff]  }
 0x3f7   : > { %5150 = vmatprep.subr.bf16.mxu1 %v8193_v44  ;;  %v8254_v44 = vld [vmem:[%s11067_s4 + $0x110] ss:$8 sps:$4 sm:$0xff]  }
 0x3fa   : > { %5151 = vmatpush1.bf16.msra.mxu1 %v8191_v45  ;;  %v8259_v45 = vld [vmem:[%s11067_s4 + $0x124] ss:$8 sps:$4 sm:$0xff]  }
 0x3fb   : > { %5152 = vmatprep.subr.bf16.mxu1 %v8196_v46  ;;  %v8257_v46 = vld [vmem:[%s11067_s4 + $0x120] ss:$8 sps:$4 sm:$0xff]  }
 0x3fe   : > { %5153 = vmatpush1.bf16.msra.mxu1 %v8194_v50  ;;  %v8262_v50 = vld [vmem:[%s11067_s4 + $0x134] ss:$8 sps:$4 sm:$0xff]  }
 0x3ff   : > { %5154 = vmatprep.subr.bf16.mxu1 %v8199_v49  ;;  %v8260_v49 = vld [vmem:[%s11067_s4 + $0x130] ss:$8 sps:$4 sm:$0xff]  }
 0x402   : > { %5155 = vmatpush1.bf16.msra.mxu1 %v8197_v16  ;;  %v8265_v16 = vld [vmem:[%s11067_s4 + $0x144] ss:$8 sps:$4 sm:$0xff]  }
 0x403   : > { %5156 = vmatprep.subr.bf16.mxu1 %v8202_v18  ;;  %v8263_v18 = vld [vmem:[%s11067_s4 + $0x140] ss:$8 sps:$4 sm:$0xff]  }
 0x406   : > { %5157 = vmatpush1.bf16.msra.mxu1 %v8200_v28  ;;  %v8268_v28 = vld [vmem:[%s11067_s4 + $0x154] ss:$8 sps:$4 sm:$0xff]  }
 0x407   : > { %5880 = vmatprep.subr.bf16.mxu1 %v8205_v53  ;;  %v8266_v53 = vld [vmem:[%s11067_s4 + $0x150] ss:$8 sps:$4 sm:$0xff]  }
 0x409   : > { %5159 = vmatmul.mubr.bf16.vlgmr.msra.gmra.mrb[8].mxu1 %v10384_v19  ;;  %v8214_v19 = vld [vmem:[%s11067_s4 + $0x34] ss:$8 sps:$4 sm:$0xff]  }
 0x40a   : > { %5881 = vmatpush1.bf16.msra.mxu1 %v8203_v54  ;;  %v8271_v54 = vld [vmem:[%s11067_s4 + $0x164] ss:$8 sps:$4 sm:$0xff]  }
 0x40b   : > { %5882 = vmatprep.subr.bf16.mxu1 %v8208_v56  ;;  %v8269_v56 = vld [vmem:[%s11067_s4 + $0x160] ss:$8 sps:$4 sm:$0xff]  }
 0x40e   : > { %5883 = vmatpush1.bf16.msra.mxu1 %v8206_v57  ;;  %v8274_v57 = vld [vmem:[%s11067_s4 + $0x174] ss:$8 sps:$4 sm:$0xff]  }
 0x40f   : > { %5884 = vmatprep.subr.bf16.mxu1 %v8211_v58  ;;  %v8272_v58 = vld [vmem:[%s11067_s4 + $0x170] ss:$8 sps:$4 sm:$0xff]  }
 0x412   : > { %5885 = vmatpush1.bf16.msra.mxu1 %v8209_v35  ;;  %v8277_v35 = vld [vmem:[%s11067_s4 + $0x184] ss:$8 sps:$4 sm:$0xff]  }
 0x413   : > { %5886 = vmatprep.subr.bf16.mxu1 %v8214_v19  ;;  %v8280_v19 = vld [vmem:[%s11067_s4 + $0x194] ss:$8 sps:$4 sm:$0xff]  }
 0x416   : > { %5887 = vmatpush1.bf16.msra.mxu1 %v8212_v59  ;;  %v8278_v59 = vld [vmem:[%s11067_s4 + $0x190] ss:$8 sps:$4 sm:$0xff]  }
 0x417   : > { %5888 = vmatprep.subr.bf16.mxu1 %v8217_v61  ;;  %v8283_v61 = vld [vmem:[%s11067_s4 + $0x1a4] ss:$8 sps:$4 sm:$0xff]  }
 0x41a   : > { %5889 = vmatpush1.bf16.msra.mxu1 %v8215_v62  ;;  %v8281_v62 = vld [vmem:[%s11067_s4 + $0x1a0] ss:$8 sps:$4 sm:$0xff]  }
 0x41b   : > { %5890 = vmatprep.subr.bf16.mxu1 %v8220_v1  ;;  %v8284_v1 = vld [vmem:[%s11067_s4 + $0x1b0] ss:$8 sps:$4 sm:$0xff]  }
 0x41c   : > { %v5037_v14 = vpop.f32.mrb[4].mxu1  ;;  %v10726_v5 = vpop.f32.mrb[12].mxu0 }
 0x41d   : > { %v5039_v6 = vpop.f32.mrb[5].mxu1  ;;  %v10728_v7 = vpop.f32.mrb[13].mxu0  ;;  %v7084_v26 = vadd.f32 %v5037_v14, %v3454_v24  ;;  %v8290_v14 = vld [vmem:[%s11067_s4 + $0x1d0] ss:$8 sps:$4 sm:$0xff]  }
 0x41e   : > { %v7085_v8 = vadd.f32 %v5039_v6, %v3458_v3  ;;  %5891 = vmatpush1.bf16.msra.mxu1 %v8218_v2  ;;  %v5041_v9 = vpop.f32.mrb[6].mxu1  ;;  %v5287_v55 = vpop.f32.mrb[14].mxu0  ;;  %v8289_v2 = vld [vmem:[%s11067_s4 + $0x1c4] ss:$8 sps:$4 sm:$0xff]   ;;  %v8287_v3 = vld [vmem:[%s11067_s4 + $0x1c0] ss:$8 sps:$4 sm:$0xff]  }
 0x41f   : > { %v5042_v11 = vpop.f32.mrb[7].mxu1  ;;  %v5288_v12 = vpop.f32.mrb[15].mxu0  ;;  %5892 = vmatprep.subr.bf16.mxu1 %v8223_v4  ;;  %v8292_v4 = vld [vmem:[%s11067_s4 + $0x1d4] ss:$8 sps:$4 sm:$0xff]   ;;  %v8295_v6 = vld [vmem:[%s11067_s4 + $0x1e4] ss:$8 sps:$4 sm:$0xff]  }
 0x420   : > { %8363 = vtanh.f32 %v7085_v8  ;;  %v8293_v8 = vld [vmem:[%s11067_s4 + $0x1e0] ss:$8 sps:$4 sm:$0xff]   ;;  %v8298_v9 = vld [vmem:[%s11067_s4 + $0x1f4] ss:$8 sps:$4 sm:$0xff]   ;;  %v8296_v55 = vld [vmem:[%s11067_s4 + $0x1f0] ss:$8 sps:$4 sm:$0xff]  }
 0x421   : > { %8365 = vtanh.f32 %v7084_v26  ;;  %v8347_v11 = vld [vmem:[%s11069_s6 + $0x40] sm:$0xff]  }
 0x422   : > { %5893 = vmatpush1.bf16.msra.mxu1 %v8221_v10  ;;  %v8301_v10 = vld [vmem:[%s11067_s4 + $0x204] ss:$8 sps:$4 sm:$0xff]   ;;  %7060 = vmatprep.subr.bf16.mxu0 %v8347_v11  ;;  %v8344_v11 = vld [vmem:[%s11067_s4 + $0x2f0] ss:$8 sps:$4 sm:$0xff]  }
 0x423   : > { %5894 = vmatprep.subr.bf16.mxu1 %v8226_v15  ;;  %v8348_v12 = vld [vmem:[%s11069_s6] sm:$0xff]   ;;  %v8349_v15 = vld [vmem:[%s11069_s6 + $0x48] sm:$0xff]  }
 0x424   : > { %7061 = vmatpush3.bf16.msra.mxu0 %v8348_v12 }
 0x425   : > { %7062 = vmatprep.subr.bf16.mxu0 %v8349_v15 }
 0x426   : > { %5895 = vmatpush1.bf16.msra.mxu1 %v8224_v17  ;;  %v8350_v17 = vld [vmem:[%s11069_s6 + $0x8] sm:$0xff]  }
 0x427   : > { %5896 = vmatprep.subr.bf16.mxu1 %v8229_v20  ;;  %v8351_v20 = vld [vmem:[%s11069_s6 + $0x50] sm:$0xff]  }
 0x428   : > { %7063 = vmatpush3.bf16.msra.mxu0 %v8350_v17  ;;  %v8359_v17 = vld [vmem:[%s11069_s6 + $0x70] sm:$0xff]  }
 0x429   : > { %7064 = vmatprep.subr.bf16.mxu0 %v8351_v20  ;;  %v8360_v20 = vld [vmem:[%s11069_s6 + $0x30] sm:$0xff]  }
 0x42a   : > { %5897 = vmatpush1.bf16.msra.mxu1 %v8227_v21  ;;  %v8364_v47 = vpop.eup %8363  ;;  %v8352_v21 = vld [vmem:[%s11069_s6 + $0x10] sm:$0xff]  }
 0x42b   : > { %5898 = vmatprep.subr.bf16.mxu1 %v8232_v37  ;;  %v5297_v31 = vpack.c.bf16 %v8364_v47, %v8364_v47  ;;  %v8366_v39 = vpop.eup %8365  ;;  %v8353_v37 = vld [vmem:[%s11069_s6 + $0x58] sm:$0xff]   ;;  %v8355_v47 = vld [vmem:[%s11069_s6 + $0x60] sm:$0xff]  }
 0x42c   : > { %v5296_v42 = vpack.c.bf16 %v8366_v39, %v8366_v39  ;;  %7065 = vmatpush3.bf16.msra.mxu0 %v8352_v21  ;;  %v8361_v21 = vld [vmem:[%s11069_s6 + $0x78] sm:$0xff]  }
 0x42d   : > { %5912 = vmatprep.mubr.bf16.mxu1 %v5297_v31  ;;  %7066 = vmatprep.subr.bf16.mxu0 %v8353_v37  ;;  %v8357_v31 = vld [vmem:[%s11069_s6 + $0x68] sm:$0xff]   ;;  %v8362_v37 = vld [vmem:[%s11069_s6 + $0x38] sm:$0xff]  }
 0x42e   : > { %5899 = vmatpush1.bf16.msra.mxu1 %v8230_v22  ;;  %v8354_v22 = vld [vmem:[%s11069_s6 + $0x18] sm:$0xff]  }
 0x42f   : > { %5900 = vmatprep.subr.bf16.mxu1 %v8235_v40  ;;  %v8356_v40 = vld [vmem:[%s11069_s6 + $0x20] sm:$0xff]  }
 0x430   : > { %7067 = vmatpush3.bf16.msra.mxu0 %v8354_v22  ;;  %v5398_v22 = vld [vmem:[%s337_s20] sm:$0xff] }
 0x431   : > { %7068 = vmatprep.subr.bf16.mxu0 %v8355_v47  ;;  %v5399_v47 = vld [vmem:[%s337_s20 + $0x8] sm:$0xff] }
 0x432   : > { %5901 = vmatpush1.bf16.msra.mxu1 %v8233_v48  ;;  %v3473_v48 = vsub.s32 5, %v10702_v60 }
 0x433   : > { %5902 = vmatprep.subr.bf16.mxu1 %v8238_v13  ;;  %v3461_v13 = vsub.s32 2, %v10702_v60 }
 0x434   : > { %7069 = vmatpush3.bf16.msra.mxu0 %v8356_v40  ;;  %v3474_v24 = vrot.slane %v10714_v0, %v3473_v48 }
 0x435   : > { %7070 = vmatprep.subr.bf16.mxu0 %v8357_v31 }
 0x436   : > { %5903 = vmatpush1.bf16.msra.mxu1 %v8236_v51  ;;  %v3465_v51 = vsub.s32 3, %v10702_v60  ;;  %v7089_v26 = vadd.f32 %v10728_v7, %v3474_v24 }
 0x437   : > { %5904 = vmatprep.subr.bf16.mxu1 %v8241_v25  ;;  %v3462_v25 = vrot.slane %v10714_v0, %v3461_v13 }
 0x438   : > { %7071 = vmatpush3.bf16.msra.mxu0 %v8358_v23  ;;  %8367 = vtanh.f32 %v7089_v26 }
 0x439   : > { %7072 = vmatprep.subr.bf16.mxu0 %v8359_v17 }
 0x43a   : > { %5905 = vmatpush1.bf16.msra.mxu1 %v8239_v27  ;;  %v3466_v27 = vrot.slane %v10714_v0, %v3465_v51 }
 0x43b   : > { %5906 = vmatprep.subr.bf16.mxu1 %v8244_v29 }
 0x43c   : > { %7073 = vmatpush3.bf16.msra.mxu0 %v8360_v20 }
 0x43d   : > { %7074 = vmatprep.subr.bf16.mxu0 %v8361_v21 }
 0x43e   : > { %5907 = vmatpush1.bf16.msra.mxu1 %v8242_v30 }
 0x43f   : > { %5908 = vmatprep.subr.bf16.mxu1 %v8247_v32 }
 0x440   : > { %7075 = vmatpush3.bf16.msra.mxu0 %v8362_v37 }
 0x442   : > { %5909 = vmatpush1.bf16.msra.mxu1 %v8245_v33 }
 0x443   : > { %5910 = vmatprep.subr.bf16.mxu1 %v8250_v34 }
 0x446   : > { %5911 = vmatpush1.bf16.msra.mxu1 %v8248_v36 }
 0x447   : > { %5921 = vmatprep.subr.bf16.mxu1 %v8253_v38  ;;  %v8368_v38 = vpop.eup %8367 }
 0x449   : > { %5913 = vmatmul.mubr.bf16.vlgmr.msra.gmra.mrb[12].mxu1 %v5296_v42 }
 0x44a   : > { %5922 = vmatpush1.bf16.msra.mxu1 %v8251_v41 }
 0x44b   : > { %5923 = vmatprep.subr.bf16.mxu1 %v8256_v43  ;;  %v8299_v43 = vld [vmem:[%s11067_s4 + $0x200] ss:$8 sps:$4 sm:$0xff]  }
 0x44e   : > { %5924 = vmatpush1.bf16.msra.mxu1 %v8254_v44  ;;  %v8304_v44 = vld [vmem:[%s11067_s4 + $0x214] ss:$8 sps:$4 sm:$0xff]  }
 0x44f   : > { %5925 = vmatprep.subr.bf16.mxu1 %v8259_v45  ;;  %v5301_v45 = vpack.c.bf16 %v8368_v38, %v8368_v38 }
 0x452   : > { %5926 = vmatpush1.bf16.msra.mxu1 %v8257_v46  ;;  %v8302_v46 = vld [vmem:[%s11067_s4 + $0x210] ss:$8 sps:$4 sm:$0xff]  }
 0x453   : > { %5927 = vmatprep.subr.bf16.mxu1 %v8262_v50  ;;  %v8307_v50 = vld [vmem:[%s11067_s4 + $0x224] ss:$8 sps:$4 sm:$0xff]  }
 0x456   : > { %5928 = vmatpush1.bf16.msra.mxu1 %v8260_v49  ;;  %v8305_v49 = vld [vmem:[%s11067_s4 + $0x220] ss:$8 sps:$4 sm:$0xff]  }
 0x457   : > { %5929 = vmatprep.subr.bf16.mxu1 %v8265_v16  ;;  %v8310_v16 = vld [vmem:[%s11067_s4 + $0x234] ss:$8 sps:$4 sm:$0xff]  }
 0x45a   : > { %5930 = vmatpush1.bf16.msra.mxu1 %v8263_v18  ;;  %v8308_v18 = vld [vmem:[%s11067_s4 + $0x230] ss:$8 sps:$4 sm:$0xff]  }
 0x45b   : > { %5931 = vmatprep.subr.bf16.mxu1 %v8268_v28  ;;  %v8313_v28 = vld [vmem:[%s11067_s4 + $0x244] ss:$8 sps:$4 sm:$0xff]  }
 0x45e   : > { %5932 = vmatpush1.bf16.msra.mxu1 %v8266_v53  ;;  %v8311_v53 = vld [vmem:[%s11067_s4 + $0x240] ss:$8 sps:$4 sm:$0xff]  }
 0x45f   : > { %5933 = vmatprep.subr.bf16.mxu1 %v8271_v54  ;;  %v8316_v54 = vld [vmem:[%s11067_s4 + $0x254] ss:$8 sps:$4 sm:$0xff]  }
 0x462   : > { %5934 = vmatpush1.bf16.msra.mxu1 %v8269_v56  ;;  %v8314_v56 = vld [vmem:[%s11067_s4 + $0x250] ss:$8 sps:$4 sm:$0xff]  }
 0x463   : > { %5935 = vmatprep.subr.bf16.mxu1 %v8274_v57  ;;  %v8319_v57 = vld [vmem:[%s11067_s4 + $0x264] ss:$8 sps:$4 sm:$0xff]  }
 0x466   : > { %5936 = vmatpush1.bf16.msra.mxu1 %v8272_v58  ;;  %v8317_v58 = vld [vmem:[%s11067_s4 + $0x260] ss:$8 sps:$4 sm:$0xff]  }
 0x467   : > { %5937 = vmatprep.subr.bf16.mxu1 %v8277_v35  ;;  %v8322_v35 = vld [vmem:[%s11067_s4 + $0x274] ss:$8 sps:$4 sm:$0xff]  }
 0x46a   : > { %5938 = vmatpush1.bf16.msra.mxu1 %v8275_v52  ;;  %v8320_v52 = vld [vmem:[%s11067_s4 + $0x270] ss:$8 sps:$4 sm:$0xff]  }
 0x46b   : > { %5939 = vmatprep.subr.bf16.mxu1 %v8280_v19  ;;  %v8325_v19 = vld [vmem:[%s11067_s4 + $0x284] ss:$8 sps:$4 sm:$0xff]  }
 0x46e   : > { %5940 = vmatpush1.bf16.msra.mxu1 %v8278_v59  ;;  %v8323_v59 = vld [vmem:[%s11067_s4 + $0x280] ss:$8 sps:$4 sm:$0xff]  }
 0x46f   : > { %5941 = vmatprep.subr.bf16.mxu1 %v8283_v61  ;;  %v8328_v61 = vld [vmem:[%s11067_s4 + $0x294] ss:$8 sps:$4 sm:$0xff]  }
 0x472   : > { %5942 = vmatpush1.bf16.msra.mxu1 %v8281_v62  ;;  %v8326_v62 = vld [vmem:[%s11067_s4 + $0x290] ss:$8 sps:$4 sm:$0xff]  }
 0x473   : > { %5943 = vmatprep.subr.bf16.mxu1 %v8286_v63  ;;  %v8331_v63 = vld [vmem:[%s11067_s4 + $0x2a4] ss:$8 sps:$4 sm:$0xff]  }
 0x476   : > { %5944 = vmatpush1.bf16.msra.mxu1 %v8284_v1  ;;  %v3469_v1 = vsub.s32 4, %v10702_v60  ;;  %v8337_v60 = vld [vmem:[%s11067_s4 + $0x2c4] ss:$8 sps:$4 sm:$0xff]  }
 0x477   : > { %5945 = vmatprep.subr.bf16.mxu1 %v8289_v2  ;;  %v8329_v2 = vld [vmem:[%s11067_s4 + $0x2a0] ss:$8 sps:$4 sm:$0xff]  }
 0x47a   : > { %5946 = vmatpush1.bf16.msra.mxu1 %v8287_v3  ;;  %v8334_v3 = vld [vmem:[%s11067_s4 + $0x2b4] ss:$8 sps:$4 sm:$0xff]  }
 0x47b   : > { %5947 = vmatprep.subr.bf16.mxu1 %v8292_v4  ;;  %v3470_v4 = vrot.slane %v10714_v0, %v3469_v1  ;;  %v8340_v0 = vld [vmem:[%s11067_s4 + $0x2d4] ss:$8 sps:$4 sm:$0xff]  }
 0x47e   : > { %5948 = vmatpush1.bf16.msra.mxu1 %v8290_v14  ;;  %v8332_v14 = vld [vmem:[%s11067_s4 + $0x2b0] ss:$8 sps:$4 sm:$0xff]  }
 0x47f   : > { %5949 = vmatprep.subr.bf16.mxu1 %v8295_v6  ;;  %v7088_v6 = vadd.f32 %v10726_v5, %v3470_v4  ;;  %v8343_v5 = vld [vmem:[%s11067_s4 + $0x2e4] ss:$8 sps:$4 sm:$0xff]  }
 0x482   : > { %5950 = vmatpush1.bf16.msra.mxu1 %v8293_v8  ;;  %v8335_v8 = vld [vmem:[%s11067_s4 + $0x2c0] ss:$8 sps:$4 sm:$0xff]  }
 0x483   : > { %5951 = vmatprep.subr.bf16.mxu1 %v8298_v9  ;;  %v8338_v9 = vld [vmem:[%s11067_s4 + $0x2d0] ss:$8 sps:$4 sm:$0xff]  }
 0x486   : > { %5952 = vmatpush1.bf16.msra.mxu1 %v8296_v55  ;;  %v8341_v55 = vld [vmem:[%s11067_s4 + $0x2e0] ss:$8 sps:$4 sm:$0xff]  }
 0x487   : > { %5962 = vmatprep.subr.bf16.mxu1 %v8301_v10  ;;  %v8346_v10 = vld [vmem:[%s11067_s4 + $0x2f4] ss:$8 sps:$4 sm:$0xff]  }
 0x4dc   : > { %v5160_v29 = vpop.f32.mrb[8].mxu1 }
 0x4dd   : > { %v7086_v30 = vadd.f32 %v5160_v29, %v3462_v25  ;;  %v5162_v32 = vpop.f32.mrb[9].mxu1 }
 0x4de   : > { %v7087_v33 = vadd.f32 %v5162_v32, %v3466_v27  ;;  %v5164_v34 = vpop.f32.mrb[10].mxu1 }
 0x4df   : > { %8369 = vtanh.f32 %v7086_v30  ;;  %v5165_v36 = vpop.f32.mrb[11].mxu1  ;;  %v7039_v30 = vld [vmem:[%s11070_s7] ss:$0 sm:$0xff] }
 0x4e0   : > { %8371 = vtanh.f32 %v7087_v33 }
 0x4e1   : > { %8373 = vtanh.f32 %v7088_v6 }
 0x4e9   : > { %v8370_v39 = vpop.eup %8369 }
 0x4ea   : > { %v8372_v41 = vpop.eup %8371  ;;  %v5298_v7 = vpack.c.bf16 %v8370_v39, %v8370_v39 }
 0x4eb   : > { %v5299_v42 = vpack.c.bf16 %v8372_v41, %v8372_v41  ;;  %v8374_v12 = vpop.eup %8373 }
 0x4ec   : > { %v5300_v15 = vpack.c.bf16 %v8374_v12, %v8374_v12 }
 0x4ed   : > { %5953 = vmatprep.mubr.bf16.mxu1 %v5299_v42 }
 0x4ee   : > { %5954 = vmatmul.mubr.bf16.vlgmr.msra.gmra.mrb[12].mxu1 %v5298_v7 }
 0x4ef   : > { %5963 = vmatpush1.bf16.msra.mxu1 %v8299_v43  ;;  %5994 = vmatprep.mubr.bf16.mxu1 %v5301_v45 }
 0x4f0   : > { %5964 = vmatprep.subr.bf16.mxu1 %v8304_v44 }
 0x4f3   : > { %5965 = vmatpush1.bf16.msra.mxu1 %v8302_v46 }
 0x4f4   : > { %5966 = vmatprep.subr.bf16.mxu1 %v8307_v50 }
 0x4f7   : > { %5967 = vmatpush1.bf16.msra.mxu1 %v8305_v49 }
 0x4f8   : > { %5968 = vmatprep.subr.bf16.mxu1 %v8310_v16 }
 0x4fb   : > { %5969 = vmatpush1.bf16.msra.mxu1 %v8308_v18 }
 0x4fc   : > { %5970 = vmatprep.subr.bf16.mxu1 %v8313_v28 }
 0x4ff   : > { %5971 = vmatpush1.bf16.msra.mxu1 %v8311_v53 }
 0x500   : > { %5972 = vmatprep.subr.bf16.mxu1 %v8316_v54 }
 0x503   : > { %5973 = vmatpush1.bf16.msra.mxu1 %v8314_v56 }
 0x504   : > { %5974 = vmatprep.subr.bf16.mxu1 %v8319_v57 }
 0x507   : > { %5975 = vmatpush1.bf16.msra.mxu1 %v8317_v58 }
 0x508   : > { %5976 = vmatprep.subr.bf16.mxu1 %v8322_v35 }
 0x50b   : > { %5977 = vmatpush1.bf16.msra.mxu1 %v8320_v52 }
 0x50c   : > { %5978 = vmatprep.subr.bf16.mxu1 %v8325_v19 }
 0x50f   : > { %5979 = vmatpush1.bf16.msra.mxu1 %v8323_v59 }
 0x510   : > { %5980 = vmatprep.subr.bf16.mxu1 %v8328_v61 }
 0x513   : > { %5981 = vmatpush1.bf16.msra.mxu1 %v8326_v62 }
 0x514   : > { %5982 = vmatprep.subr.bf16.mxu1 %v8331_v63 }
 0x517   : > { %5983 = vmatpush1.bf16.msra.mxu1 %v8329_v2 }
 0x518   : > { %5984 = vmatprep.subr.bf16.mxu1 %v8334_v3 }
 0x51b   : > { %5985 = vmatpush1.bf16.msra.mxu1 %v8332_v14 }
 0x51c   : > { %5986 = vmatprep.subr.bf16.mxu1 %v8337_v60 }
 0x51f   : > { %5987 = vmatpush1.bf16.msra.mxu1 %v8335_v8 }
 0x520   : > { %5988 = vmatprep.subr.bf16.mxu1 %v8340_v0 }
 0x523   : > { %5989 = vmatpush1.bf16.msra.mxu1 %v8338_v9 }
 0x524   : > { %5990 = vmatprep.subr.bf16.mxu1 %v8343_v5 }
 0x527   : > { %5991 = vmatpush1.bf16.msra.mxu1 %v8341_v55 }
 0x528   : > { %5992 = vmatprep.subr.bf16.mxu1 %v8346_v10 }
 0x52b   : > { %5993 = vmatpush1.bf16.msra.mxu1 %v8344_v11 }
 0x52e   : > { %5995 = vmatmul.mubr.bf16.vlgmr.msra.gmra.mrb[12].mxu1 %v5300_v15 }
 0x601   : > { %v5996_v40 = vpop.f32.mrb[12].mxu1 }
 0x602   : > { %v7090_v31 = vadd.f32 %v5996_v40, %v5398_v22  ;;  %v5998_v23 = vpop.f32.mrb[13].mxu1 }
 0x603   : > { %v7091_v48 = vadd.f32 %v5998_v23, %v5399_v47  ;;  %v6000_v13 = vpop.f32.mrb[14].mxu1 }
 0x604   : > { %v6003_v24 = vmax.f32 %v7090_v31, 0.0  ;;  %v6001_v51 = vpop.f32.mrb[15].mxu1 }
 0x605   : > { %v6004_v25 = vmax.f32 %v7091_v48, 0.0 }
 0x606   : > { %v6005_v27 = vpack.c.bf16 %v6003_v24, %v6003_v24 }
 0x607   : > { %v6006_v26 = vpack.c.bf16 %v6004_v25, %v6004_v25 }
 0x609   : > { %6174 = vmatprep.mubr.bf16.mxu0 %v6006_v26 }
 0x60a   : > { %6175 = vmatmul.mubr.bf16.vlgmr.msra.gmra.mrb[16].mxu0 %v6005_v27 }
 0x6dd   : > { %v7076_v29 = vpop.f32.mrb[16].mxu0 }
 0x6de   : > { %v7077_v32 = vpop.f32.mrb[17].mxu0 }
 0x6df   : > { %v7078_v33 = vadd.f32 %v7077_v32, %v7076_v29  ;;  %v7079_v34 = vpop.f32.mrb[18].mxu0 }
 0x6e0   : > { %v7080_v36 = vpop.f32.mrb[19].mxu0 }
 0x6e1   : > { %v6177_v38 = vadd.f32 %v7078_v33, %v7039_v30 }
 0x6e3   : > { %6182 = vst [vmem:[%s341_s16] sm:$0xff] %v6177_v38 }
 0x6e4 PF: > { %p18_p8 = scmp.ge.s32.totalorder %s8509_s10, 4   ;;  %s11076_s27 = smov %s8431_s28 }
 0x6e5   : > { %s11077_s28 = smov %s8435_s29  ;;  %s11078_s29 = smov %s8519_s13 }
 0x6e6   : > { %s11079_s30 = smov %s8509_s10  ;;  %20 = sbr.rel (!%p18_p8) target bundleno = 3 (0x3), region = 95 }
 0x6ed   :  { %6202 = vsyncpa [#allocation3], 1 }
 0x6ee   :  { %6204 = vsyncpa [#allocation3 + $0x1], 1 }

</bundles_post_ra>
